<compile_context>
chip_gen: v6e
topology: v6e:2x2x1
jax: 0.10.0
libtpu: 0.0.40
codegen_flags: <defaults>
</compile_context>

<pallas_src>
import jax
import jax.numpy as jnp
from jax import lax
from jax.experimental import pallas as pl
from jax.experimental.pallas import tpu as pltpu


# ------------------------------- helpers -------------------------------------
def _round_up(x, m):
    return (x + m - 1) // m * m


def _pick_time_chunk(T, Bp, gate_row_bytes):
    """Largest Tt dividing T with Tt*Bp rows whose xg chunk stays ~<=2 MiB."""
    max_rows = max(Bp, min(1024, (2 * 1024 * 1024) // max(gate_row_bytes, 1)))
    best = 1
    for tt in range(1, T + 1):
        if T % tt == 0 and tt * Bp <= max_rows:
            best = tt
    return best


# --------------------------- fused forward kernel ----------------------------
def _make_fused_kernel(num_layers, t_chunk, b_pad, h_pad, num_chunks, unroll):
    Bp, Hp = b_pad, h_pad

    def kernel(*refs):
        # inputs: xg0, w_hh[0..L-1], (w_ih, bias) for layers 1..L-1, fc_w, fc_b
        # output: out ; scratch: h_scr (L,Bp,Hp), c_scr (L,Bp,Hp) [, seq_scr, xg_scr]
        idx = 0
        xg0_ref = refs[idx]; idx += 1
        w_hh_refs = refs[idx: idx + num_layers]; idx += num_layers
        ih_refs = refs[idx: idx + 2 * (num_layers - 1)]; idx += 2 * (num_layers - 1)
        fc_w_ref = refs[idx]; fc_b_ref = refs[idx + 1]; idx += 2
        out_ref = refs[idx]; idx += 1
        if num_layers > 1:
            h_scr, c_scr, seq_scr, xg_scr = refs[idx:]
        else:
            h_scr, c_scr = refs[idx:]
            seq_scr = xg_scr = None

        k = pl.program_id(0)

        @pl.when(k == 0)
        def _init():
            h_scr[...] = jnp.zeros_like(h_scr)
            c_scr[...] = jnp.zeros_like(c_scr)
            out_ref[...] = jnp.zeros_like(out_ref)   # guard: resident block never flushed uninit

        for layer in range(num_layers):
            w_hh_ref = w_hh_refs[layer]
            if layer == 0:
                gate_src = xg0_ref                    # layer-0 gates precomputed in wrapper
            else:
                w_ih = ih_refs[2 * (layer - 1)][...]          # (Hp, 4Hp)
                bias = ih_refs[2 * (layer - 1) + 1][...]      # (1, 4Hp)
                # Hoisted input projection for the whole chunk: one MXU matmul with
                # M = Tt*Bp rows, staged into VMEM scratch (not held in vregs).
                xg_scr[...] = (
                    jnp.dot(seq_scr[...], w_ih, preferred_element_type=jnp.float32)
                    + bias
                )
                gate_src = xg_scr

            last_layer = layer == num_layers - 1

            def step(t, carry, w_hh_ref=w_hh_ref, gate_src=gate_src, last_layer=last_layer):
                h, c = carry
                row0 = pl.multiple_of(t * Bp, 8)      # sublane-aligned per-step slice
                g = gate_src[pl.ds(row0, Bp), :] + jnp.dot(
                    h.astype(w_hh_ref.dtype), w_hh_ref[...],
                    preferred_element_type=jnp.float32)            # (Bp, 4Hp)
                # Gate order matches PyTorch [i, f, g, o]; each block is 128-lane aligned.
                # sigmoid(x) = 0.5*tanh(0.5*x)+0.5 : one EUP op instead of exp+recip.
                i_g = 0.5 * jnp.tanh(0.5 * g[:, 0 * Hp:1 * Hp]) + 0.5
                f_g = 0.5 * jnp.tanh(0.5 * g[:, 1 * Hp:2 * Hp]) + 0.5
                g_g = jnp.tanh(g[:, 2 * Hp:3 * Hp])
                o_g = 0.5 * jnp.tanh(0.5 * g[:, 3 * Hp:4 * Hp]) + 0.5
                c = f_g * c + i_g * g_g
                h = o_g * jnp.tanh(c)
                if not last_layer:
                    # Inter-layer sequence stays in VMEM — never touches HBM.
                    seq_scr[pl.ds(row0, Bp), :] = h.astype(seq_scr.dtype)
                return h, c

            h, c = lax.fori_loop(0, t_chunk, step,
                                 (h_scr[layer], c_scr[layer]), unroll=unroll)
            h_scr[layer] = h
            c_scr[layer] = c

        # Fused final Linear, written once on the last chunk (lane-dense Op block).
        @pl.when(k == num_chunks - 1)
        def _emit():
            fc_w = fc_w_ref[...]
            fc_b = fc_b_ref[...]
            h_last = h_scr[num_layers - 1]
            out_ref[...] = (
                jnp.dot(h_last.astype(fc_w.dtype), fc_w,
                        preferred_element_type=jnp.float32) + fc_b
            ).astype(out_ref.dtype)

    return kernel


# --------------------------------- wrapper -----------------------------------
def lstm_forward_pallas(params, x, param_dtype=jnp.float32):
    """x: (B, T, input_dim) batch_first (PyTorch layout). Returns (B, output_dim)."""
    x = x.astype(jnp.float32)
    B, T, D = x.shape
    layers = params["layers"]
    L = len(layers)
    H = layers[0]["w_hh"].shape[1]
    O = params["fc_w"].shape[0]

    Bp = _round_up(max(B, 1), 8)       # sublane-aligned batch
    Hp = _round_up(H, 128)             # lane-aligned hidden (per-gate block)
    Op = _round_up(O, 128)             # lane-dense output block
    G = 4 * Hp

    Tt = _pick_time_chunk(T, Bp, G * 4)
    num_chunks = T // Tt
    rows = Tt * Bp
    unroll = 1
    for u in (8, 4, 2):
        if Tt % u == 0:
            unroll = u
            break

    def pack_gate_cols(w_t):
        # w_t: (in_d, 4H), PyTorch gate order [i,f,g,o] stacked along columns.
        in_d = w_t.shape[0]
        out = jnp.zeros((_round_up(in_d, 1) if in_d == D else Hp, G), jnp.float32)
        out = jnp.zeros((in_d if in_d == D else Hp, G), jnp.float32)
        for gk in range(4):
            out = out.at[:in_d, gk * Hp: gk * Hp + H].set(w_t[:, gk * H:(gk + 1) * H])
        return out

    def pack_bias(b):
        out = jnp.zeros((1, G), jnp.float32)
        for gk in range(4):
            out = out.at[0, gk * Hp: gk * Hp + H].set(b[gk * H:(gk + 1) * H])
        return out

    # Time-major, batch padded to Bp, flattened to (T*Bp, D).
    x_tm = jnp.transpose(x, (1, 0, 2))                     # (T, B, D)
    x_tm = jnp.pad(x_tm, ((0, 0), (0, Bp - B), (0, 0)))
    x_flat = x_tm.reshape(T * Bp, D)

    # Layer-0 input projection hoisted out of the kernel entirely (plain XLA):
    # removes the tiny-K (K=D) matmul from every chunk and makes the chunk DMA lane-dense.
    lp0 = layers[0]
    w_ih0 = pack_gate_cols(jnp.transpose(lp0["w_ih"]))     # (D, 4Hp)
    b0 = pack_bias(lp0["b_ih"] + lp0["b_hh"])              # (1, 4Hp)
    xg0 = x_flat @ w_ih0 + b0                              # (T*Bp, 4Hp) f32

    args = [xg0]
    in_specs = [pl.BlockSpec((rows, G), lambda k: (k, 0))]

    for lp in layers:                                      # recurrent weights, resident in VMEM
        w_hh_t = pack_gate_cols(jnp.transpose(lp["w_hh"]))           # (Hp, 4Hp)
        args.append(w_hh_t.astype(param_dtype))
        in_specs.append(pl.BlockSpec((Hp, G), lambda k: (0, 0)))

    for lp in layers[1:]:                                  # input weights for layers >= 1
        w_ih_t = pack_gate_cols(jnp.transpose(lp["w_ih"]))           # (Hp, 4Hp)
        bias = pack_bias(lp["b_ih"] + lp["b_hh"])
        args += [w_ih_t.astype(param_dtype), bias]
        in_specs += [pl.BlockSpec((Hp, G), lambda k: (0, 0)),
                     pl.BlockSpec((1, G), lambda k: (0, 0))]

    fc_w = jnp.zeros((Hp, Op), jnp.float32).at[:H, :O].set(jnp.transpose(params["fc_w"]))
    fc_b = jnp.zeros((1, Op), jnp.float32).at[0, :O].set(params["fc_b"])
    args += [fc_w.astype(param_dtype), fc_b]
    in_specs += [pl.BlockSpec((Hp, Op), lambda k: (0, 0)),
                 pl.BlockSpec((1, Op), lambda k: (0, 0))]

    seq_dtype = param_dtype
    scratch = [
        pltpu.VMEM((L, Bp, Hp), jnp.float32),   # carried h per layer
        pltpu.VMEM((L, Bp, Hp), jnp.float32),   # carried c per layer
    ]
    if L > 1:
        scratch += [
            pltpu.VMEM((rows, Hp), seq_dtype),  # inter-layer hidden chunk
            pltpu.VMEM((rows, G), jnp.float32), # staged hoisted gate projection
        ]

    # Explicit VMEM budget (default pipelining double-buffers every block).
    pbytes = jnp.dtype(param_dtype).itemsize
    weight_bytes = (L * Hp * G + (L - 1) * Hp * G + Hp * Op) * pbytes + ((L - 1) * G + Op) * 4
    io_bytes = rows * G * 4 + Bp * Op * 4
    scratch_bytes = 2 * L * Bp * Hp * 4
    if L > 1:
        scratch_bytes += rows * Hp * jnp.dtype(seq_dtype).itemsize + rows * G * 4
    est = 2 * (weight_bytes + io_bytes) + scratch_bytes
    vmem_limit = int(min(64 * 1024 * 1024, max(32 * 1024 * 1024, int(est * 1.25))))

    kernel = _make_fused_kernel(L, Tt, Bp, Hp, num_chunks, unroll)

    grid_spec = pltpu.PrefetchScalarGridSpec(
        num_scalar_prefetch=0,
        grid=(num_chunks,),
        in_specs=in_specs,
        out_specs=pl.BlockSpec((Bp, Op), lambda k: (0, 0)),
        scratch_shapes=scratch,
    )

    out_p = pl.pallas_call(
        kernel,
        out_shape=jax.ShapeDtypeStruct((Bp, Op), jnp.float32),
        grid_spec=grid_spec,
        compiler_params=pltpu.CompilerParams(
            dimension_semantics=("arbitrary",),   # recurrence: chunks are sequential
            vmem_limit_bytes=vmem_limit,
        ),
    )(*args)
    return out_p[:B, :O]


lstm_forward = jax.jit(lstm_forward_pallas, static_argnames=("param_dtype",))


# ------------------------------ parameter init --------------------------------
def init_lstm_params(key, input_dim, hidden_dim, num_layers, output_dim):
    """PyTorch-shaped params: uniform(-1/sqrt(H), 1/sqrt(H))."""
    params = {"layers": []}
    bound = 1.0 / jnp.sqrt(jnp.float32(hidden_dim))
    for layer in range(num_layers):
        in_d = input_dim if layer == 0 else hidden_dim
        key, k1, k2, k3, k4 = jax.random.split(key, 5)
        params["layers"].append(
            dict(
                w_ih=jax.random.uniform(k1, (4 * hidden_dim, in_d), jnp.float32, -bound, bound),
                w_hh=jax.random.uniform(k2, (4 * hidden_dim, hidden_dim), jnp.float32, -bound, bound),
                b_ih=jax.random.uniform(k3, (4 * hidden_dim,), jnp.float32, -bound, bound),
                b_hh=jax.random.uniform(k4, (4 * hidden_dim,), jnp.float32, -bound, bound),
            )
        )
    key, k5, k6 = jax.random.split(key, 3)
    params["fc_w"] = jax.random.uniform(k5, (output_dim, hidden_dim), jnp.float32, -bound, bound)
    params["fc_b"] = jax.random.uniform(k6, (output_dim,), jnp.float32, -bound, bound)
    return params


# ---------------------------- pure-JAX reference ------------------------------
def lstm_forward_ref(params, x):
    x_tm = jnp.transpose(x, (1, 0, 2)).astype(jnp.float32)
    h_seq = x_tm
    for lp in params["layers"]:
        H = lp["w_hh"].shape[1]
        B = x.shape[0]

        def step(carry, x_t, lp=lp, H=H):
            h, c = carry
            g = x_t @ lp["w_ih"].T + h @ lp["w_hh"].T + lp["b_ih"] + lp["b_hh"]
            i = jax.nn.sigmoid(g[:, 0 * H:1 * H])
            f = jax.nn.sigmoid(g[:, 1 * H:2 * H])
            gg = jnp.tanh(g[:, 2 * H:3 * H])
            o = jax.nn.sigmoid(g[:, 3 * H:4 * H])
            c = f * c + i * gg
            h = o * jnp.tanh(c)
            return (h, c), h

        init = (jnp.zeros((B, H), jnp.float32), jnp.zeros((B, H), jnp.float32))
        _, h_seq = jax.lax.scan(step, init, h_seq)
    return h_seq[-1] @ params["fc_w"].T + params["fc_b"]


# ----------------------------------- main --------------------------------------
if __name__ == "__main__":
    # TODO(synk): stateful predict()/initHC()/reset() (persistent h0/c0 between calls)
    # is not translated — only the forward() pass (zero initial state, fc on last step).
    batch, seq_len = 2, 8
    input_dim, hidden_dim, num_layers, output_dim = 4, 32, 2, 2

    key = jax.random.PRNGKey(0)
    key, kx = jax.random.split(key)
    x = jax.random.normal(kx, (batch, seq_len, input_dim), jnp.float32)
    params = init_lstm_params(key, input_dim, hidden_dim, num_layers, output_dim)

    # f32 weights: tight check against the pure-JAX reference.
    out = jax.block_until_ready(lstm_forward(params, x))
    ref = lstm_forward_ref(params, x)
    assert out.shape == (batch, output_dim)
    assert jnp.allclose(out, ref, atol=1e-4, rtol=1e-4), (out, ref)

    # bf16 weights (halves resident weight VMEM / MXU weight-feed); gate math stays f32.
    out_bf16 = jax.block_until_ready(lstm_forward(params, x, param_dtype=jnp.bfloat16))
    assert out_bf16.shape == (batch, output_dim)
    assert bool(jnp.all(jnp.isfinite(out_bf16)))
    assert jnp.allclose(out_bf16, ref, atol=1e-1, rtol=1e-1), (out_bf16, ref)

    print("KERNEL_OK")
</pallas_src>

<mosaic_0001>
module attributes {stable_mosaic.version = 11 : i64} {
  func.func @kernel(%arg0: i32, %arg1: memref<64x512xf32, #tpu.memory_space<vmem>>, %arg2: memref<128x512xf32, #tpu.memory_space<vmem>>, %arg3: memref<128x512xf32, #tpu.memory_space<vmem>>, %arg4: memref<128x512xf32, #tpu.memory_space<vmem>>, %arg5: memref<1x512xf32, #tpu.memory_space<vmem>>, %arg6: memref<128x128xf32, #tpu.memory_space<vmem>>, %arg7: memref<1x128xf32, #tpu.memory_space<vmem>>, %arg8: memref<8x128xf32, #tpu.memory_space<vmem>>, %arg9: memref<2x8x128xf32, #tpu.memory_space<vmem>>, %arg10: memref<2x8x128xf32, #tpu.memory_space<vmem>>, %arg11: memref<64x128xf32, #tpu.memory_space<vmem>>, %arg12: memref<64x512xf32, #tpu.memory_space<vmem>>) attributes {dimension_semantics = [#tpu.dimension_semantics<arbitrary>], iteration_bounds = array<i64: 1>, scalar_prefetch = 0 : i64, scratch_operands = 4 : i64, tpu.core_type = #tpu.core_type<tc>, window_params = [{transform_indices = @transform_0, window_bounds = array<i64: 64, 512>}, {pipeline_mode = #tpu.pipeline_mode<synchronous>, transform_indices = @transform_1, window_bounds = array<i64: 128, 512>}, {pipeline_mode = #tpu.pipeline_mode<synchronous>, transform_indices = @transform_2, window_bounds = array<i64: 128, 512>}, {pipeline_mode = #tpu.pipeline_mode<synchronous>, transform_indices = @transform_3, window_bounds = array<i64: 128, 512>}, {pipeline_mode = #tpu.pipeline_mode<synchronous>, transform_indices = @transform_4, window_bounds = array<i64: 1, 512>}, {pipeline_mode = #tpu.pipeline_mode<synchronous>, transform_indices = @transform_5, window_bounds = array<i64: 128, 128>}, {pipeline_mode = #tpu.pipeline_mode<synchronous>, transform_indices = @transform_6, window_bounds = array<i64: 1, 128>}, {pipeline_mode = #tpu.pipeline_mode<synchronous>, transform_indices = @transform_7, window_bounds = array<i64: 8, 128>}]} {
    %c0_i32 = arith.constant 0 : i32
    %0 = arith.cmpi eq, %arg0, %c0_i32 : i32
    %1 = arith.extui %0 : i1 to i32
    %c0_i32_0 = arith.constant 0 : i32
    %2 = arith.cmpi ne, %1, %c0_i32_0 : i32
    scf.if %2 {
      %cst_275 = arith.constant 0.000000e+00 : f32
      %657 = vector.broadcast %cst_275 : f32 to vector<2x8x128xf32>
      %c0_276 = arith.constant 0 : index
      %c0_277 = arith.constant 0 : index
      %c0_278 = arith.constant 0 : index
      %658 = vector.load %arg9[%c0_276, %c0_277, %c0_278] : memref<2x8x128xf32, #tpu.memory_space<vmem>>, vector<2x8x128xf32>
      tpu.vector_store %arg9[%c0_276, %c0_277, %c0_278], %657 {strides = array<i32>} : memref<2x8x128xf32, #tpu.memory_space<vmem>>, vector<2x8x128xf32>,
      %cst_279 = arith.constant 0.000000e+00 : f32
      %659 = vector.broadcast %cst_279 : f32 to vector<2x8x128xf32>
      %c0_280 = arith.constant 0 : index
      %c0_281 = arith.constant 0 : index
      %c0_282 = arith.constant 0 : index
      %660 = vector.load %arg10[%c0_280, %c0_281, %c0_282] : memref<2x8x128xf32, #tpu.memory_space<vmem>>, vector<2x8x128xf32>
      tpu.vector_store %arg10[%c0_280, %c0_281, %c0_282], %659 {strides = array<i32>} : memref<2x8x128xf32, #tpu.memory_space<vmem>>, vector<2x8x128xf32>,
      %cst_283 = arith.constant 0.000000e+00 : f32
      %661 = vector.broadcast %cst_283 : f32 to vector<8x128xf32>
      %c0_284 = arith.constant 0 : index
      %c0_285 = arith.constant 0 : index
      %662 = vector.load %arg8[%c0_284, %c0_285] : memref<8x128xf32, #tpu.memory_space<vmem>>, vector<8x128xf32>
      tpu.vector_store %arg8[%c0_284, %c0_285], %661 {strides = array<i32>} : memref<8x128xf32, #tpu.memory_space<vmem>>, vector<8x128xf32>,
    } else {
    }
    %c0 = arith.constant 0 : index
    %c0_1 = arith.constant 0 : index
    %c0_2 = arith.constant 0 : index
    %3 = vector.load %arg9[%c0, %c0_1, %c0_2] : memref<2x8x128xf32, #tpu.memory_space<vmem>>, vector<1x8x128xf32>
    %4 = vector.shape_cast %3 : vector<1x8x128xf32> to vector<8x128xf32>
    %c0_3 = arith.constant 0 : index
    %c0_4 = arith.constant 0 : index
    %c0_5 = arith.constant 0 : index
    %5 = vector.load %arg10[%c0_3, %c0_4, %c0_5] : memref<2x8x128xf32, #tpu.memory_space<vmem>>, vector<1x8x128xf32>
    %6 = vector.shape_cast %5 : vector<1x8x128xf32> to vector<8x128xf32>
    %c0_i32_6 = arith.constant 0 : i32
    %c8_i32 = arith.constant 8 : i32
    %7 = arith.muli %c0_i32_6, %c8_i32 : i32
    %8 = tpu.assume_multiple %7, 8 : i32
    %9 = arith.index_cast %8 : i32 to index
    %c0_7 = arith.constant 0 : index
    %10 = vector.load %arg1[%9, %c0_7] : memref<64x512xf32, #tpu.memory_space<vmem>>, vector<8x512xf32>
    %c0_8 = arith.constant 0 : index
    %c0_9 = arith.constant 0 : index
    %11 = vector.load %arg2[%c0_8, %c0_9] : memref<128x512xf32, #tpu.memory_space<vmem>>, vector<128x512xf32>
    %cst = arith.constant dense<0.000000e+00> : vector<8x512xf32>
    %12 = tpu.matmul %4, %11, %cst {dimension_numbers = #tpu.dot_dimension_numbers<[1], [0], [0], [1], [0, 0, 1, 1], [], []>} : vector<8x128xf32>, vector<128x512xf32>, vector<8x512xf32> -> vector<8x512xf32>
    %13 = arith.addf %10, %12 : vector<8x512xf32>
    %14 = vector.extract_strided_slice %13 {offsets = [0, 0], sizes = [8, 128], strides = [1, 1]} : vector<8x512xf32> to vector<8x128xf32>
    %cst_10 = arith.constant 5.000000e-01 : f32
    %15 = vector.broadcast %cst_10 : f32 to vector<8x128xf32>
    %16 = arith.mulf %15, %14 : vector<8x128xf32>
    %17 = math.tanh %16 : vector<8x128xf32>
    %cst_11 = arith.constant 5.000000e-01 : f32
    %18 = vector.broadcast %cst_11 : f32 to vector<8x128xf32>
    %19 = arith.mulf %18, %17 : vector<8x128xf32>
    %cst_12 = arith.constant 5.000000e-01 : f32
    %20 = vector.broadcast %cst_12 : f32 to vector<8x128xf32>
    %21 = arith.addf %19, %20 : vector<8x128xf32>
    %22 = vector.extract_strided_slice %13 {offsets = [0, 128], sizes = [8, 128], strides = [1, 1]} : vector<8x512xf32> to vector<8x128xf32>
    %cst_13 = arith.constant 5.000000e-01 : f32
    %23 = vector.broadcast %cst_13 : f32 to vector<8x128xf32>
    %24 = arith.mulf %23, %22 : vector<8x128xf32>
    %25 = math.tanh %24 : vector<8x128xf32>
    %cst_14 = arith.constant 5.000000e-01 : f32
    %26 = vector.broadcast %cst_14 : f32 to vector<8x128xf32>
    %27 = arith.mulf %26, %25 : vector<8x128xf32>
    %cst_15 = arith.constant 5.000000e-01 : f32
    %28 = vector.broadcast %cst_15 : f32 to vector<8x128xf32>
    %29 = arith.addf %27, %28 : vector<8x128xf32>
    %30 = vector.extract_strided_slice %13 {offsets = [0, 256], sizes = [8, 128], strides = [1, 1]} : vector<8x512xf32> to vector<8x128xf32>
    %31 = math.tanh %30 : vector<8x128xf32>
    %32 = vector.extract_strided_slice %13 {offsets = [0, 384], sizes = [8, 128], strides = [1, 1]} : vector<8x512xf32> to vector<8x128xf32>
    %cst_16 = arith.constant 5.000000e-01 : f32
    %33 = vector.broadcast %cst_16 : f32 to vector<8x128xf32>
    %34 = arith.mulf %33, %32 : vector<8x128xf32>
    %35 = math.tanh %34 : vector<8x128xf32>
    %cst_17 = arith.constant 5.000000e-01 : f32
    %36 = vector.broadcast %cst_17 : f32 to vector<8x128xf32>
    %37 = arith.mulf %36, %35 : vector<8x128xf32>
    %cst_18 = arith.constant 5.000000e-01 : f32
    %38 = vector.broadcast %cst_18 : f32 to vector<8x128xf32>
    %39 = arith.addf %37, %38 : vector<8x128xf32>
    %40 = arith.mulf %29, %6 : vector<8x128xf32>
    %41 = arith.mulf %21, %31 : vector<8x128xf32>
    %42 = arith.addf %40, %41 : vector<8x128xf32>
    %43 = math.tanh %42 : vector<8x128xf32>
    %44 = arith.mulf %39, %43 : vector<8x128xf32>
    %45 = arith.index_cast %8 : i32 to index
    %c0_19 = arith.constant 0 : index
    %46 = vector.load %arg11[%45, %c0_19] : memref<64x128xf32, #tpu.memory_space<vmem>>, vector<8x128xf32>
    tpu.vector_store %arg11[%45, %c0_19], %44 {strides = array<i32>} : memref<64x128xf32, #tpu.memory_space<vmem>>, vector<8x128xf32>,
    %c1_i32 = arith.constant 1 : i32
    %c8_i32_20 = arith.constant 8 : i32
    %47 = arith.muli %c1_i32, %c8_i32_20 : i32
    %48 = tpu.assume_multiple %47, 8 : i32
    %49 = arith.index_cast %48 : i32 to index
    %c0_21 = arith.constant 0 : index
    %50 = vector.load %arg1[%49, %c0_21] : memref<64x512xf32, #tpu.memory_space<vmem>>, vector<8x512xf32>
    %c0_22 = arith.constant 0 : index
    %c0_23 = arith.constant 0 : index
    %51 = vector.load %arg2[%c0_22, %c0_23] : memref<128x512xf32, #tpu.memory_space<vmem>>, vector<128x512xf32>
    %cst_24 = arith.constant dense<0.000000e+00> : vector<8x512xf32>
    %52 = tpu.matmul %44, %51, %cst_24 {dimension_numbers = #tpu.dot_dimension_numbers<[1], [0], [0], [1], [0, 0, 1, 1], [], []>} : vector<8x128xf32>, vector<128x512xf32>, vector<8x512xf32> -> vector<8x512xf32>
    %53 = arith.addf %50, %52 : vector<8x512xf32>
    %54 = vector.extract_strided_slice %53 {offsets = [0, 0], sizes = [8, 128], strides = [1, 1]} : vector<8x512xf32> to vector<8x128xf32>
    %cst_25 = arith.constant 5.000000e-01 : f32
    %55 = vector.broadcast %cst_25 : f32 to vector<8x128xf32>
    %56 = arith.mulf %55, %54 : vector<8x128xf32>
    %57 = math.tanh %56 : vector<8x128xf32>
    %cst_26 = arith.constant 5.000000e-01 : f32
    %58 = vector.broadcast %cst_26 : f32 to vector<8x128xf32>
    %59 = arith.mulf %58, %57 : vector<8x128xf32>
    %cst_27 = arith.constant 5.000000e-01 : f32
    %60 = vector.broadcast %cst_27 : f32 to vector<8x128xf32>
    %61 = arith.addf %59, %60 : vector<8x128xf32>
    %62 = vector.extract_strided_slice %53 {offsets = [0, 128], sizes = [8, 128], strides = [1, 1]} : vector<8x512xf32> to vector<8x128xf32>
    %cst_28 = arith.constant 5.000000e-01 : f32
    %63 = vector.broadcast %cst_28 : f32 to vector<8x128xf32>
    %64 = arith.mulf %63, %62 : vector<8x128xf32>
    %65 = math.tanh %64 : vector<8x128xf32>
    %cst_29 = arith.constant 5.000000e-01 : f32
    %66 = vector.broadcast %cst_29 : f32 to vector<8x128xf32>
    %67 = arith.mulf %66, %65 : vector<8x128xf32>
    %cst_30 = arith.constant 5.000000e-01 : f32
    %68 = vector.broadcast %cst_30 : f32 to vector<8x128xf32>
    %69 = arith.addf %67, %68 : vector<8x128xf32>
    %70 = vector.extract_strided_slice %53 {offsets = [0, 256], sizes = [8, 128], strides = [1, 1]} : vector<8x512xf32> to vector<8x128xf32>
    %71 = math.tanh %70 : vector<8x128xf32>
    %72 = vector.extract_strided_slice %53 {offsets = [0, 384], sizes = [8, 128], strides = [1, 1]} : vector<8x512xf32> to vector<8x128xf32>
    %cst_31 = arith.constant 5.000000e-01 : f32
    %73 = vector.broadcast %cst_31 : f32 to vector<8x128xf32>
    %74 = arith.mulf %73, %72 : vector<8x128xf32>
    %75 = math.tanh %74 : vector<8x128xf32>
    %cst_32 = arith.constant 5.000000e-01 : f32
    %76 = vector.broadcast %cst_32 : f32 to vector<8x128xf32>
    %77 = arith.mulf %76, %75 : vector<8x128xf32>
    %cst_33 = arith.constant 5.000000e-01 : f32
    %78 = vector.broadcast %cst_33 : f32 to vector<8x128xf32>
    %79 = arith.addf %77, %78 : vector<8x128xf32>
    %80 = arith.mulf %69, %42 : vector<8x128xf32>
    %81 = arith.mulf %61, %71 : vector<8x128xf32>
    %82 = arith.addf %80, %81 : vector<8x128xf32>
    %83 = math.tanh %82 : vector<8x128xf32>
    %84 = arith.mulf %79, %83 : vector<8x128xf32>
    %85 = arith.index_cast %48 : i32 to index
    %c0_34 = arith.constant 0 : index
    %86 = vector.load %arg11[%85, %c0_34] : memref<64x128xf32, #tpu.memory_space<vmem>>, vector<8x128xf32>
    tpu.vector_store %arg11[%85, %c0_34], %84 {strides = array<i32>} : memref<64x128xf32, #tpu.memory_space<vmem>>, vector<8x128xf32>,
    %c2_i32 = arith.constant 2 : i32
    %c8_i32_35 = arith.constant 8 : i32
    %87 = arith.muli %c2_i32, %c8_i32_35 : i32
    %88 = tpu.assume_multiple %87, 8 : i32
    %89 = arith.index_cast %88 : i32 to index
    %c0_36 = arith.constant 0 : index
    %90 = vector.load %arg1[%89, %c0_36] : memref<64x512xf32, #tpu.memory_space<vmem>>, vector<8x512xf32>
    %c0_37 = arith.constant 0 : index
    %c0_38 = arith.constant 0 : index
    %91 = vector.load %arg2[%c0_37, %c0_38] : memref<128x512xf32, #tpu.memory_space<vmem>>, vector<128x512xf32>
    %cst_39 = arith.constant dense<0.000000e+00> : vector<8x512xf32>
    %92 = tpu.matmul %84, %91, %cst_39 {dimension_numbers = #tpu.dot_dimension_numbers<[1], [0], [0], [1], [0, 0, 1, 1], [], []>} : vector<8x128xf32>, vector<128x512xf32>, vector<8x512xf32> -> vector<8x512xf32>
    %93 = arith.addf %90, %92 : vector<8x512xf32>
    %94 = vector.extract_strided_slice %93 {offsets = [0, 0], sizes = [8, 128], strides = [1, 1]} : vector<8x512xf32> to vector<8x128xf32>
    %cst_40 = arith.constant 5.000000e-01 : f32
    %95 = vector.broadcast %cst_40 : f32 to vector<8x128xf32>
    %96 = arith.mulf %95, %94 : vector<8x128xf32>
    %97 = math.tanh %96 : vector<8x128xf32>
    %cst_41 = arith.constant 5.000000e-01 : f32
    %98 = vector.broadcast %cst_41 : f32 to vector<8x128xf32>
    %99 = arith.mulf %98, %97 : vector<8x128xf32>
    %cst_42 = arith.constant 5.000000e-01 : f32
    %100 = vector.broadcast %cst_42 : f32 to vector<8x128xf32>
    %101 = arith.addf %99, %100 : vector<8x128xf32>
    %102 = vector.extract_strided_slice %93 {offsets = [0, 128], sizes = [8, 128], strides = [1, 1]} : vector<8x512xf32> to vector<8x128xf32>
    %cst_43 = arith.constant 5.000000e-01 : f32
    %103 = vector.broadcast %cst_43 : f32 to vector<8x128xf32>
    %104 = arith.mulf %103, %102 : vector<8x128xf32>
    %105 = math.tanh %104 : vector<8x128xf32>
    %cst_44 = arith.constant 5.000000e-01 : f32
    %106 = vector.broadcast %cst_44 : f32 to vector<8x128xf32>
    %107 = arith.mulf %106, %105 : vector<8x128xf32>
    %cst_45 = arith.constant 5.000000e-01 : f32
    %108 = vector.broadcast %cst_45 : f32 to vector<8x128xf32>
    %109 = arith.addf %107, %108 : vector<8x128xf32>
    %110 = vector.extract_strided_slice %93 {offsets = [0, 256], sizes = [8, 128], strides = [1, 1]} : vector<8x512xf32> to vector<8x128xf32>
    %111 = math.tanh %110 : vector<8x128xf32>
    %112 = vector.extract_strided_slice %93 {offsets = [0, 384], sizes = [8, 128], strides = [1, 1]} : vector<8x512xf32> to vector<8x128xf32>
    %cst_46 = arith.constant 5.000000e-01 : f32
    %113 = vector.broadcast %cst_46 : f32 to vector<8x128xf32>
    %114 = arith.mulf %113, %112 : vector<8x128xf32>
    %115 = math.tanh %114 : vector<8x128xf32>
    %cst_47 = arith.constant 5.000000e-01 : f32
    %116 = vector.broadcast %cst_47 : f32 to vector<8x128xf32>
    %117 = arith.mulf %116, %115 : vector<8x128xf32>
    %cst_48 = arith.constant 5.000000e-01 : f32
    %118 = vector.broadcast %cst_48 : f32 to vector<8x128xf32>
    %119 = arith.addf %117, %118 : vector<8x128xf32>
    %120 = arith.mulf %109, %82 : vector<8x128xf32>
    %121 = arith.mulf %101, %111 : vector<8x128xf32>
    %122 = arith.addf %120, %121 : vector<8x128xf32>
    %123 = math.tanh %122 : vector<8x128xf32>
    %124 = arith.mulf %119, %123 : vector<8x128xf32>
    %125 = arith.index_cast %88 : i32 to index
    %c0_49 = arith.constant 0 : index
    %126 = vector.load %arg11[%125, %c0_49] : memref<64x128xf32, #tpu.memory_space<vmem>>, vector<8x128xf32>
    tpu.vector_store %arg11[%125, %c0_49], %124 {strides = array<i32>} : memref<64x128xf32, #tpu.memory_space<vmem>>, vector<8x128xf32>,
    %c3_i32 = arith.constant 3 : i32
    %c8_i32_50 = arith.constant 8 : i32
    %127 = arith.muli %c3_i32, %c8_i32_50 : i32
    %128 = tpu.assume_multiple %127, 8 : i32
    %129 = arith.index_cast %128 : i32 to index
    %c0_51 = arith.constant 0 : index
    %130 = vector.load %arg1[%129, %c0_51] : memref<64x512xf32, #tpu.memory_space<vmem>>, vector<8x512xf32>
    %c0_52 = arith.constant 0 : index
    %c0_53 = arith.constant 0 : index
    %131 = vector.load %arg2[%c0_52, %c0_53] : memref<128x512xf32, #tpu.memory_space<vmem>>, vector<128x512xf32>
    %cst_54 = arith.constant dense<0.000000e+00> : vector<8x512xf32>
    %132 = tpu.matmul %124, %131, %cst_54 {dimension_numbers = #tpu.dot_dimension_numbers<[1], [0], [0], [1], [0, 0, 1, 1], [], []>} : vector<8x128xf32>, vector<128x512xf32>, vector<8x512xf32> -> vector<8x512xf32>
    %133 = arith.addf %130, %132 : vector<8x512xf32>
    %134 = vector.extract_strided_slice %133 {offsets = [0, 0], sizes = [8, 128], strides = [1, 1]} : vector<8x512xf32> to vector<8x128xf32>
    %cst_55 = arith.constant 5.000000e-01 : f32
    %135 = vector.broadcast %cst_55 : f32 to vector<8x128xf32>
    %136 = arith.mulf %135, %134 : vector<8x128xf32>
    %137 = math.tanh %136 : vector<8x128xf32>
    %cst_56 = arith.constant 5.000000e-01 : f32
    %138 = vector.broadcast %cst_56 : f32 to vector<8x128xf32>
    %139 = arith.mulf %138, %137 : vector<8x128xf32>
    %cst_57 = arith.constant 5.000000e-01 : f32
    %140 = vector.broadcast %cst_57 : f32 to vector<8x128xf32>
    %141 = arith.addf %139, %140 : vector<8x128xf32>
    %142 = vector.extract_strided_slice %133 {offsets = [0, 128], sizes = [8, 128], strides = [1, 1]} : vector<8x512xf32> to vector<8x128xf32>
    %cst_58 = arith.constant 5.000000e-01 : f32
    %143 = vector.broadcast %cst_58 : f32 to vector<8x128xf32>
    %144 = arith.mulf %143, %142 : vector<8x128xf32>
    %145 = math.tanh %144 : vector<8x128xf32>
    %cst_59 = arith.constant 5.000000e-01 : f32
    %146 = vector.broadcast %cst_59 : f32 to vector<8x128xf32>
    %147 = arith.mulf %146, %145 : vector<8x128xf32>
    %cst_60 = arith.constant 5.000000e-01 : f32
    %148 = vector.broadcast %cst_60 : f32 to vector<8x128xf32>
    %149 = arith.addf %147, %148 : vector<8x128xf32>
    %150 = vector.extract_strided_slice %133 {offsets = [0, 256], sizes = [8, 128], strides = [1, 1]} : vector<8x512xf32> to vector<8x128xf32>
    %151 = math.tanh %150 : vector<8x128xf32>
    %152 = vector.extract_strided_slice %133 {offsets = [0, 384], sizes = [8, 128], strides = [1, 1]} : vector<8x512xf32> to vector<8x128xf32>
    %cst_61 = arith.constant 5.000000e-01 : f32
    %153 = vector.broadcast %cst_61 : f32 to vector<8x128xf32>
    %154 = arith.mulf %153, %152 : vector<8x128xf32>
    %155 = math.tanh %154 : vector<8x128xf32>
    %cst_62 = arith.constant 5.000000e-01 : f32
    %156 = vector.broadcast %cst_62 : f32 to vector<8x128xf32>
    %157 = arith.mulf %156, %155 : vector<8x128xf32>
    %cst_63 = arith.constant 5.000000e-01 : f32
    %158 = vector.broadcast %cst_63 : f32 to vector<8x128xf32>
    %159 = arith.addf %157, %158 : vector<8x128xf32>
    %160 = arith.mulf %149, %122 : vector<8x128xf32>
    %161 = arith.mulf %141, %151 : vector<8x128xf32>
    %162 = arith.addf %160, %161 : vector<8x128xf32>
    %163 = math.tanh %162 : vector<8x128xf32>
    %164 = arith.mulf %159, %163 : vector<8x128xf32>
    %165 = arith.index_cast %128 : i32 to index
    %c0_64 = arith.constant 0 : index
    %166 = vector.load %arg11[%165, %c0_64] : memref<64x128xf32, #tpu.memory_space<vmem>>, vector<8x128xf32>
    tpu.vector_store %arg11[%165, %c0_64], %164 {strides = array<i32>} : memref<64x128xf32, #tpu.memory_space<vmem>>, vector<8x128xf32>,
    %c4_i32 = arith.constant 4 : i32
    %c8_i32_65 = arith.constant 8 : i32
    %167 = arith.muli %c4_i32, %c8_i32_65 : i32
    %168 = tpu.assume_multiple %167, 8 : i32
    %169 = arith.index_cast %168 : i32 to index
    %c0_66 = arith.constant 0 : index
    %170 = vector.load %arg1[%169, %c0_66] : memref<64x512xf32, #tpu.memory_space<vmem>>, vector<8x512xf32>
    %c0_67 = arith.constant 0 : index
    %c0_68 = arith.constant 0 : index
    %171 = vector.load %arg2[%c0_67, %c0_68] : memref<128x512xf32, #tpu.memory_space<vmem>>, vector<128x512xf32>
    %cst_69 = arith.constant dense<0.000000e+00> : vector<8x512xf32>
    %172 = tpu.matmul %164, %171, %cst_69 {dimension_numbers = #tpu.dot_dimension_numbers<[1], [0], [0], [1], [0, 0, 1, 1], [], []>} : vector<8x128xf32>, vector<128x512xf32>, vector<8x512xf32> -> vector<8x512xf32>
    %173 = arith.addf %170, %172 : vector<8x512xf32>
    %174 = vector.extract_strided_slice %173 {offsets = [0, 0], sizes = [8, 128], strides = [1, 1]} : vector<8x512xf32> to vector<8x128xf32>
    %cst_70 = arith.constant 5.000000e-01 : f32
    %175 = vector.broadcast %cst_70 : f32 to vector<8x128xf32>
    %176 = arith.mulf %175, %174 : vector<8x128xf32>
    %177 = math.tanh %176 : vector<8x128xf32>
    %cst_71 = arith.constant 5.000000e-01 : f32
    %178 = vector.broadcast %cst_71 : f32 to vector<8x128xf32>
    %179 = arith.mulf %178, %177 : vector<8x128xf32>
    %cst_72 = arith.constant 5.000000e-01 : f32
    %180 = vector.broadcast %cst_72 : f32 to vector<8x128xf32>
    %181 = arith.addf %179, %180 : vector<8x128xf32>
    %182 = vector.extract_strided_slice %173 {offsets = [0, 128], sizes = [8, 128], strides = [1, 1]} : vector<8x512xf32> to vector<8x128xf32>
    %cst_73 = arith.constant 5.000000e-01 : f32
    %183 = vector.broadcast %cst_73 : f32 to vector<8x128xf32>
    %184 = arith.mulf %183, %182 : vector<8x128xf32>
    %185 = math.tanh %184 : vector<8x128xf32>
    %cst_74 = arith.constant 5.000000e-01 : f32
    %186 = vector.broadcast %cst_74 : f32 to vector<8x128xf32>
    %187 = arith.mulf %186, %185 : vector<8x128xf32>
    %cst_75 = arith.constant 5.000000e-01 : f32
    %188 = vector.broadcast %cst_75 : f32 to vector<8x128xf32>
    %189 = arith.addf %187, %188 : vector<8x128xf32>
    %190 = vector.extract_strided_slice %173 {offsets = [0, 256], sizes = [8, 128], strides = [1, 1]} : vector<8x512xf32> to vector<8x128xf32>
    %191 = math.tanh %190 : vector<8x128xf32>
    %192 = vector.extract_strided_slice %173 {offsets = [0, 384], sizes = [8, 128], strides = [1, 1]} : vector<8x512xf32> to vector<8x128xf32>
    %cst_76 = arith.constant 5.000000e-01 : f32
    %193 = vector.broadcast %cst_76 : f32 to vector<8x128xf32>
    %194 = arith.mulf %193, %192 : vector<8x128xf32>
    %195 = math.tanh %194 : vector<8x128xf32>
    %cst_77 = arith.constant 5.000000e-01 : f32
    %196 = vector.broadcast %cst_77 : f32 to vector<8x128xf32>
    %197 = arith.mulf %196, %195 : vector<8x128xf32>
    %cst_78 = arith.constant 5.000000e-01 : f32
    %198 = vector.broadcast %cst_78 : f32 to vector<8x128xf32>
    %199 = arith.addf %197, %198 : vector<8x128xf32>
    %200 = arith.mulf %189, %162 : vector<8x128xf32>
    %201 = arith.mulf %181, %191 : vector<8x128xf32>
    %202 = arith.addf %200, %201 : vector<8x128xf32>
    %203 = math.tanh %202 : vector<8x128xf32>
    %204 = arith.mulf %199, %203 : vector<8x128xf32>
    %205 = arith.index_cast %168 : i32 to index
    %c0_79 = arith.constant 0 : index
    %206 = vector.load %arg11[%205, %c0_79] : memref<64x128xf32, #tpu.memory_space<vmem>>, vector<8x128xf32>
    tpu.vector_store %arg11[%205, %c0_79], %204 {strides = array<i32>} : memref<64x128xf32, #tpu.memory_space<vmem>>, vector<8x128xf32>,
    %c5_i32 = arith.constant 5 : i32
    %c8_i32_80 = arith.constant 8 : i32
    %207 = arith.muli %c5_i32, %c8_i32_80 : i32
    %208 = tpu.assume_multiple %207, 8 : i32
    %209 = arith.index_cast %208 : i32 to index
    %c0_81 = arith.constant 0 : index
    %210 = vector.load %arg1[%209, %c0_81] : memref<64x512xf32, #tpu.memory_space<vmem>>, vector<8x512xf32>
    %c0_82 = arith.constant 0 : index
    %c0_83 = arith.constant 0 : index
    %211 = vector.load %arg2[%c0_82, %c0_83] : memref<128x512xf32, #tpu.memory_space<vmem>>, vector<128x512xf32>
    %cst_84 = arith.constant dense<0.000000e+00> : vector<8x512xf32>
    %212 = tpu.matmul %204, %211, %cst_84 {dimension_numbers = #tpu.dot_dimension_numbers<[1], [0], [0], [1], [0, 0, 1, 1], [], []>} : vector<8x128xf32>, vector<128x512xf32>, vector<8x512xf32> -> vector<8x512xf32>
    %213 = arith.addf %210, %212 : vector<8x512xf32>
    %214 = vector.extract_strided_slice %213 {offsets = [0, 0], sizes = [8, 128], strides = [1, 1]} : vector<8x512xf32> to vector<8x128xf32>
    %cst_85 = arith.constant 5.000000e-01 : f32
    %215 = vector.broadcast %cst_85 : f32 to vector<8x128xf32>
    %216 = arith.mulf %215, %214 : vector<8x128xf32>
    %217 = math.tanh %216 : vector<8x128xf32>
    %cst_86 = arith.constant 5.000000e-01 : f32
    %218 = vector.broadcast %cst_86 : f32 to vector<8x128xf32>
    %219 = arith.mulf %218, %217 : vector<8x128xf32>
    %cst_87 = arith.constant 5.000000e-01 : f32
    %220 = vector.broadcast %cst_87 : f32 to vector<8x128xf32>
    %221 = arith.addf %219, %220 : vector<8x128xf32>
    %222 = vector.extract_strided_slice %213 {offsets = [0, 128], sizes = [8, 128], strides = [1, 1]} : vector<8x512xf32> to vector<8x128xf32>
    %cst_88 = arith.constant 5.000000e-01 : f32
    %223 = vector.broadcast %cst_88 : f32 to vector<8x128xf32>
    %224 = arith.mulf %223, %222 : vector<8x128xf32>
    %225 = math.tanh %224 : vector<8x128xf32>
    %cst_89 = arith.constant 5.000000e-01 : f32
    %226 = vector.broadcast %cst_89 : f32 to vector<8x128xf32>
    %227 = arith.mulf %226, %225 : vector<8x128xf32>
    %cst_90 = arith.constant 5.000000e-01 : f32
    %228 = vector.broadcast %cst_90 : f32 to vector<8x128xf32>
    %229 = arith.addf %227, %228 : vector<8x128xf32>
    %230 = vector.extract_strided_slice %213 {offsets = [0, 256], sizes = [8, 128], strides = [1, 1]} : vector<8x512xf32> to vector<8x128xf32>
    %231 = math.tanh %230 : vector<8x128xf32>
    %232 = vector.extract_strided_slice %213 {offsets = [0, 384], sizes = [8, 128], strides = [1, 1]} : vector<8x512xf32> to vector<8x128xf32>
    %cst_91 = arith.constant 5.000000e-01 : f32
    %233 = vector.broadcast %cst_91 : f32 to vector<8x128xf32>
    %234 = arith.mulf %233, %232 : vector<8x128xf32>
    %235 = math.tanh %234 : vector<8x128xf32>
    %cst_92 = arith.constant 5.000000e-01 : f32
    %236 = vector.broadcast %cst_92 : f32 to vector<8x128xf32>
    %237 = arith.mulf %236, %235 : vector<8x128xf32>
    %cst_93 = arith.constant 5.000000e-01 : f32
    %238 = vector.broadcast %cst_93 : f32 to vector<8x128xf32>
    %239 = arith.addf %237, %238 : vector<8x128xf32>
    %240 = arith.mulf %229, %202 : vector<8x128xf32>
    %241 = arith.mulf %221, %231 : vector<8x128xf32>
    %242 = arith.addf %240, %241 : vector<8x128xf32>
    %243 = math.tanh %242 : vector<8x128xf32>
    %244 = arith.mulf %239, %243 : vector<8x128xf32>
    %245 = arith.index_cast %208 : i32 to index
    %c0_94 = arith.constant 0 : index
    %246 = vector.load %arg11[%245, %c0_94] : memref<64x128xf32, #tpu.memory_space<vmem>>, vector<8x128xf32>
    tpu.vector_store %arg11[%245, %c0_94], %244 {strides = array<i32>} : memref<64x128xf32, #tpu.memory_space<vmem>>, vector<8x128xf32>,
    %c6_i32 = arith.constant 6 : i32
    %c8_i32_95 = arith.constant 8 : i32
    %247 = arith.muli %c6_i32, %c8_i32_95 : i32
    %248 = tpu.assume_multiple %247, 8 : i32
    %249 = arith.index_cast %248 : i32 to index
    %c0_96 = arith.constant 0 : index
    %250 = vector.load %arg1[%249, %c0_96] : memref<64x512xf32, #tpu.memory_space<vmem>>, vector<8x512xf32>
    %c0_97 = arith.constant 0 : index
    %c0_98 = arith.constant 0 : index
    %251 = vector.load %arg2[%c0_97, %c0_98] : memref<128x512xf32, #tpu.memory_space<vmem>>, vector<128x512xf32>
    %cst_99 = arith.constant dense<0.000000e+00> : vector<8x512xf32>
    %252 = tpu.matmul %244, %251, %cst_99 {dimension_numbers = #tpu.dot_dimension_numbers<[1], [0], [0], [1], [0, 0, 1, 1], [], []>} : vector<8x128xf32>, vector<128x512xf32>, vector<8x512xf32> -> vector<8x512xf32>
    %253 = arith.addf %250, %252 : vector<8x512xf32>
    %254 = vector.extract_strided_slice %253 {offsets = [0, 0], sizes = [8, 128], strides = [1, 1]} : vector<8x512xf32> to vector<8x128xf32>
    %cst_100 = arith.constant 5.000000e-01 : f32
    %255 = vector.broadcast %cst_100 : f32 to vector<8x128xf32>
    %256 = arith.mulf %255, %254 : vector<8x128xf32>
    %257 = math.tanh %256 : vector<8x128xf32>
    %cst_101 = arith.constant 5.000000e-01 : f32
    %258 = vector.broadcast %cst_101 : f32 to vector<8x128xf32>
    %259 = arith.mulf %258, %257 : vector<8x128xf32>
    %cst_102 = arith.constant 5.000000e-01 : f32
    %260 = vector.broadcast %cst_102 : f32 to vector<8x128xf32>
    %261 = arith.addf %259, %260 : vector<8x128xf32>
    %262 = vector.extract_strided_slice %253 {offsets = [0, 128], sizes = [8, 128], strides = [1, 1]} : vector<8x512xf32> to vector<8x128xf32>
    %cst_103 = arith.constant 5.000000e-01 : f32
    %263 = vector.broadcast %cst_103 : f32 to vector<8x128xf32>
    %264 = arith.mulf %263, %262 : vector<8x128xf32>
    %265 = math.tanh %264 : vector<8x128xf32>
    %cst_104 = arith.constant 5.000000e-01 : f32
    %266 = vector.broadcast %cst_104 : f32 to vector<8x128xf32>
    %267 = arith.mulf %266, %265 : vector<8x128xf32>
    %cst_105 = arith.constant 5.000000e-01 : f32
    %268 = vector.broadcast %cst_105 : f32 to vector<8x128xf32>
    %269 = arith.addf %267, %268 : vector<8x128xf32>
    %270 = vector.extract_strided_slice %253 {offsets = [0, 256], sizes = [8, 128], strides = [1, 1]} : vector<8x512xf32> to vector<8x128xf32>
    %271 = math.tanh %270 : vector<8x128xf32>
    %272 = vector.extract_strided_slice %253 {offsets = [0, 384], sizes = [8, 128], strides = [1, 1]} : vector<8x512xf32> to vector<8x128xf32>
    %cst_106 = arith.constant 5.000000e-01 : f32
    %273 = vector.broadcast %cst_106 : f32 to vector<8x128xf32>
    %274 = arith.mulf %273, %272 : vector<8x128xf32>
    %275 = math.tanh %274 : vector<8x128xf32>
    %cst_107 = arith.constant 5.000000e-01 : f32
    %276 = vector.broadcast %cst_107 : f32 to vector<8x128xf32>
    %277 = arith.mulf %276, %275 : vector<8x128xf32>
    %cst_108 = arith.constant 5.000000e-01 : f32
    %278 = vector.broadcast %cst_108 : f32 to vector<8x128xf32>
    %279 = arith.addf %277, %278 : vector<8x128xf32>
    %280 = arith.mulf %269, %242 : vector<8x128xf32>
    %281 = arith.mulf %261, %271 : vector<8x128xf32>
    %282 = arith.addf %280, %281 : vector<8x128xf32>
    %283 = math.tanh %282 : vector<8x128xf32>
    %284 = arith.mulf %279, %283 : vector<8x128xf32>
    %285 = arith.index_cast %248 : i32 to index
    %c0_109 = arith.constant 0 : index
    %286 = vector.load %arg11[%285, %c0_109] : memref<64x128xf32, #tpu.memory_space<vmem>>, vector<8x128xf32>
    tpu.vector_store %arg11[%285, %c0_109], %284 {strides = array<i32>} : memref<64x128xf32, #tpu.memory_space<vmem>>, vector<8x128xf32>,
    %c7_i32 = arith.constant 7 : i32
    %c8_i32_110 = arith.constant 8 : i32
    %287 = arith.muli %c7_i32, %c8_i32_110 : i32
    %288 = tpu.assume_multiple %287, 8 : i32
    %289 = arith.index_cast %288 : i32 to index
    %c0_111 = arith.constant 0 : index
    %290 = vector.load %arg1[%289, %c0_111] : memref<64x512xf32, #tpu.memory_space<vmem>>, vector<8x512xf32>
    %c0_112 = arith.constant 0 : index
    %c0_113 = arith.constant 0 : index
    %291 = vector.load %arg2[%c0_112, %c0_113] : memref<128x512xf32, #tpu.memory_space<vmem>>, vector<128x512xf32>
    %cst_114 = arith.constant dense<0.000000e+00> : vector<8x512xf32>
    %292 = tpu.matmul %284, %291, %cst_114 {dimension_numbers = #tpu.dot_dimension_numbers<[1], [0], [0], [1], [0, 0, 1, 1], [], []>} : vector<8x128xf32>, vector<128x512xf32>, vector<8x512xf32> -> vector<8x512xf32>
    %293 = arith.addf %290, %292 : vector<8x512xf32>
    %294 = vector.extract_strided_slice %293 {offsets = [0, 0], sizes = [8, 128], strides = [1, 1]} : vector<8x512xf32> to vector<8x128xf32>
    %cst_115 = arith.constant 5.000000e-01 : f32
    %295 = vector.broadcast %cst_115 : f32 to vector<8x128xf32>
    %296 = arith.mulf %295, %294 : vector<8x128xf32>
    %297 = math.tanh %296 : vector<8x128xf32>
    %cst_116 = arith.constant 5.000000e-01 : f32
    %298 = vector.broadcast %cst_116 : f32 to vector<8x128xf32>
    %299 = arith.mulf %298, %297 : vector<8x128xf32>
    %cst_117 = arith.constant 5.000000e-01 : f32
    %300 = vector.broadcast %cst_117 : f32 to vector<8x128xf32>
    %301 = arith.addf %299, %300 : vector<8x128xf32>
    %302 = vector.extract_strided_slice %293 {offsets = [0, 128], sizes = [8, 128], strides = [1, 1]} : vector<8x512xf32> to vector<8x128xf32>
    %cst_118 = arith.constant 5.000000e-01 : f32
    %303 = vector.broadcast %cst_118 : f32 to vector<8x128xf32>
    %304 = arith.mulf %303, %302 : vector<8x128xf32>
    %305 = math.tanh %304 : vector<8x128xf32>
    %cst_119 = arith.constant 5.000000e-01 : f32
    %306 = vector.broadcast %cst_119 : f32 to vector<8x128xf32>
    %307 = arith.mulf %306, %305 : vector<8x128xf32>
    %cst_120 = arith.constant 5.000000e-01 : f32
    %308 = vector.broadcast %cst_120 : f32 to vector<8x128xf32>
    %309 = arith.addf %307, %308 : vector<8x128xf32>
    %310 = vector.extract_strided_slice %293 {offsets = [0, 256], sizes = [8, 128], strides = [1, 1]} : vector<8x512xf32> to vector<8x128xf32>
    %311 = math.tanh %310 : vector<8x128xf32>
    %312 = vector.extract_strided_slice %293 {offsets = [0, 384], sizes = [8, 128], strides = [1, 1]} : vector<8x512xf32> to vector<8x128xf32>
    %cst_121 = arith.constant 5.000000e-01 : f32
    %313 = vector.broadcast %cst_121 : f32 to vector<8x128xf32>
    %314 = arith.mulf %313, %312 : vector<8x128xf32>
    %315 = math.tanh %314 : vector<8x128xf32>
    %cst_122 = arith.constant 5.000000e-01 : f32
    %316 = vector.broadcast %cst_122 : f32 to vector<8x128xf32>
    %317 = arith.mulf %316, %315 : vector<8x128xf32>
    %cst_123 = arith.constant 5.000000e-01 : f32
    %318 = vector.broadcast %cst_123 : f32 to vector<8x128xf32>
    %319 = arith.addf %317, %318 : vector<8x128xf32>
    %320 = arith.mulf %309, %282 : vector<8x128xf32>
    %321 = arith.mulf %301, %311 : vector<8x128xf32>
    %322 = arith.addf %320, %321 : vector<8x128xf32>
    %323 = math.tanh %322 : vector<8x128xf32>
    %324 = arith.mulf %319, %323 : vector<8x128xf32>
    %325 = arith.index_cast %288 : i32 to index
    %c0_124 = arith.constant 0 : index
    %326 = vector.load %arg11[%325, %c0_124] : memref<64x128xf32, #tpu.memory_space<vmem>>, vector<8x128xf32>
    tpu.vector_store %arg11[%325, %c0_124], %324 {strides = array<i32>} : memref<64x128xf32, #tpu.memory_space<vmem>>, vector<8x128xf32>,
    %c8_i32_125 = arith.constant 8 : i32
    %c0_126 = arith.constant 0 : index
    %c0_127 = arith.constant 0 : index
    %c0_128 = arith.constant 0 : index
    %327 = vector.load %arg9[%c0_126, %c0_127, %c0_128] : memref<2x8x128xf32, #tpu.memory_space<vmem>>, vector<1x8x128xf32>
    %328 = vector.shape_cast %327 : vector<1x8x128xf32> to vector<8x128xf32>
    %329 = vector.shape_cast %324 : vector<8x128xf32> to vector<1x8x128xf32>
    tpu.vector_store %arg9[%c0_126, %c0_127, %c0_128], %329 {strides = array<i32>} : memref<2x8x128xf32, #tpu.memory_space<vmem>>, vector<1x8x128xf32>,
    %c0_129 = arith.constant 0 : index
    %c0_130 = arith.constant 0 : index
    %c0_131 = arith.constant 0 : index
    %330 = vector.load %arg10[%c0_129, %c0_130, %c0_131] : memref<2x8x128xf32, #tpu.memory_space<vmem>>, vector<1x8x128xf32>
    %331 = vector.shape_cast %330 : vector<1x8x128xf32> to vector<8x128xf32>
    %332 = vector.shape_cast %322 : vector<8x128xf32> to vector<1x8x128xf32>
    tpu.vector_store %arg10[%c0_129, %c0_130, %c0_131], %332 {strides = array<i32>} : memref<2x8x128xf32, #tpu.memory_space<vmem>>, vector<1x8x128xf32>,
    %c0_132 = arith.constant 0 : index
    %c0_133 = arith.constant 0 : index
    %333 = vector.load %arg4[%c0_132, %c0_133] : memref<128x512xf32, #tpu.memory_space<vmem>>, vector<128x512xf32>
    %c0_134 = arith.constant 0 : index
    %c0_135 = arith.constant 0 : index
    %334 = vector.load %arg5[%c0_134, %c0_135] : memref<1x512xf32, #tpu.memory_space<vmem>>, vector<1x512xf32>
    %c0_136 = arith.constant 0 : index
    %c0_137 = arith.constant 0 : index
    %335 = vector.load %arg11[%c0_136, %c0_137] : memref<64x128xf32, #tpu.memory_space<vmem>>, vector<64x128xf32>
    %cst_138 = arith.constant dense<0.000000e+00> : vector<64x512xf32>
    %336 = tpu.matmul %335, %333, %cst_138 {dimension_numbers = #tpu.dot_dimension_numbers<[1], [0], [0], [1], [0, 0, 1, 1], [], []>} : vector<64x128xf32>, vector<128x512xf32>, vector<64x512xf32> -> vector<64x512xf32>
    %337 = vector.broadcast %334 : vector<1x512xf32> to vector<64x512xf32>
    %338 = arith.addf %336, %337 : vector<64x512xf32>
    %c0_139 = arith.constant 0 : index
    %c0_140 = arith.constant 0 : index
    %339 = vector.load %arg12[%c0_139, %c0_140] : memref<64x512xf32, #tpu.memory_space<vmem>>, vector<64x512xf32>
    tpu.vector_store %arg12[%c0_139, %c0_140], %338 {strides = array<i32>} : memref<64x512xf32, #tpu.memory_space<vmem>>, vector<64x512xf32>,
    %c1 = arith.constant 1 : index
    %c0_141 = arith.constant 0 : index
    %c0_142 = arith.constant 0 : index
    %340 = vector.load %arg9[%c1, %c0_141, %c0_142] : memref<2x8x128xf32, #tpu.memory_space<vmem>>, vector<1x8x128xf32>
    %341 = vector.shape_cast %340 : vector<1x8x128xf32> to vector<8x128xf32>
    %c1_143 = arith.constant 1 : index
    %c0_144 = arith.constant 0 : index
    %c0_145 = arith.constant 0 : index
    %342 = vector.load %arg10[%c1_143, %c0_144, %c0_145] : memref<2x8x128xf32, #tpu.memory_space<vmem>>, vector<1x8x128xf32>
    %343 = vector.shape_cast %342 : vector<1x8x128xf32> to vector<8x128xf32>
    %c0_i32_146 = arith.constant 0 : i32
    %c8_i32_147 = arith.constant 8 : i32
    %344 = arith.muli %c0_i32_146, %c8_i32_147 : i32
    %345 = tpu.assume_multiple %344, 8 : i32
    %346 = arith.index_cast %345 : i32 to index
    %c0_148 = arith.constant 0 : index
    %347 = vector.load %arg12[%346, %c0_148] : memref<64x512xf32, #tpu.memory_space<vmem>>, vector<8x512xf32>
    %c0_149 = arith.constant 0 : index
    %c0_150 = arith.constant 0 : index
    %348 = vector.load %arg3[%c0_149, %c0_150] : memref<128x512xf32, #tpu.memory_space<vmem>>, vector<128x512xf32>
    %cst_151 = arith.constant dense<0.000000e+00> : vector<8x512xf32>
    %349 = tpu.matmul %341, %348, %cst_151 {dimension_numbers = #tpu.dot_dimension_numbers<[1], [0], [0], [1], [0, 0, 1, 1], [], []>} : vector<8x128xf32>, vector<128x512xf32>, vector<8x512xf32> -> vector<8x512xf32>
    %350 = arith.addf %347, %349 : vector<8x512xf32>
    %351 = vector.extract_strided_slice %350 {offsets = [0, 0], sizes = [8, 128], strides = [1, 1]} : vector<8x512xf32> to vector<8x128xf32>
    %cst_152 = arith.constant 5.000000e-01 : f32
    %352 = vector.broadcast %cst_152 : f32 to vector<8x128xf32>
    %353 = arith.mulf %352, %351 : vector<8x128xf32>
    %354 = math.tanh %353 : vector<8x128xf32>
    %cst_153 = arith.constant 5.000000e-01 : f32
    %355 = vector.broadcast %cst_153 : f32 to vector<8x128xf32>
    %356 = arith.mulf %355, %354 : vector<8x128xf32>
    %cst_154 = arith.constant 5.000000e-01 : f32
    %357 = vector.broadcast %cst_154 : f32 to vector<8x128xf32>
    %358 = arith.addf %356, %357 : vector<8x128xf32>
    %359 = vector.extract_strided_slice %350 {offsets = [0, 128], sizes = [8, 128], strides = [1, 1]} : vector<8x512xf32> to vector<8x128xf32>
    %cst_155 = arith.constant 5.000000e-01 : f32
    %360 = vector.broadcast %cst_155 : f32 to vector<8x128xf32>
    %361 = arith.mulf %360, %359 : vector<8x128xf32>
    %362 = math.tanh %361 : vector<8x128xf32>
    %cst_156 = arith.constant 5.000000e-01 : f32
    %363 = vector.broadcast %cst_156 : f32 to vector<8x128xf32>
    %364 = arith.mulf %363, %362 : vector<8x128xf32>
    %cst_157 = arith.constant 5.000000e-01 : f32
    %365 = vector.broadcast %cst_157 : f32 to vector<8x128xf32>
    %366 = arith.addf %364, %365 : vector<8x128xf32>
    %367 = vector.extract_strided_slice %350 {offsets = [0, 256], sizes = [8, 128], strides = [1, 1]} : vector<8x512xf32> to vector<8x128xf32>
    %368 = math.tanh %367 : vector<8x128xf32>
    %369 = vector.extract_strided_slice %350 {offsets = [0, 384], sizes = [8, 128], strides = [1, 1]} : vector<8x512xf32> to vector<8x128xf32>
    %cst_158 = arith.constant 5.000000e-01 : f32
    %370 = vector.broadcast %cst_158 : f32 to vector<8x128xf32>
    %371 = arith.mulf %370, %369 : vector<8x128xf32>
    %372 = math.tanh %371 : vector<8x128xf32>
    %cst_159 = arith.constant 5.000000e-01 : f32
    %373 = vector.broadcast %cst_159 : f32 to vector<8x128xf32>
    %374 = arith.mulf %373, %372 : vector<8x128xf32>
    %cst_160 = arith.constant 5.000000e-01 : f32
    %375 = vector.broadcast %cst_160 : f32 to vector<8x128xf32>
    %376 = arith.addf %374, %375 : vector<8x128xf32>
    %377 = arith.mulf %366, %343 : vector<8x128xf32>
    %378 = arith.mulf %358, %368 : vector<8x128xf32>
    %379 = arith.addf %377, %378 : vector<8x128xf32>
    %380 = math.tanh %379 : vector<8x128xf32>
    %381 = arith.mulf %376, %380 : vector<8x128xf32>
    %c1_i32_161 = arith.constant 1 : i32
    %c8_i32_162 = arith.constant 8 : i32
    %382 = arith.muli %c1_i32_161, %c8_i32_162 : i32
    %383 = tpu.assume_multiple %382, 8 : i32
    %384 = arith.index_cast %383 : i32 to index
    %c0_163 = arith.constant 0 : index
    %385 = vector.load %arg12[%384, %c0_163] : memref<64x512xf32, #tpu.memory_space<vmem>>, vector<8x512xf32>
    %c0_164 = arith.constant 0 : index
    %c0_165 = arith.constant 0 : index
    %386 = vector.load %arg3[%c0_164, %c0_165] : memref<128x512xf32, #tpu.memory_space<vmem>>, vector<128x512xf32>
    %cst_166 = arith.constant dense<0.000000e+00> : vector<8x512xf32>
    %387 = tpu.matmul %381, %386, %cst_166 {dimension_numbers = #tpu.dot_dimension_numbers<[1], [0], [0], [1], [0, 0, 1, 1], [], []>} : vector<8x128xf32>, vector<128x512xf32>, vector<8x512xf32> -> vector<8x512xf32>
    %388 = arith.addf %385, %387 : vector<8x512xf32>
    %389 = vector.extract_strided_slice %388 {offsets = [0, 0], sizes = [8, 128], strides = [1, 1]} : vector<8x512xf32> to vector<8x128xf32>
    %cst_167 = arith.constant 5.000000e-01 : f32
    %390 = vector.broadcast %cst_167 : f32 to vector<8x128xf32>
    %391 = arith.mulf %390, %389 : vector<8x128xf32>
    %392 = math.tanh %391 : vector<8x128xf32>
    %cst_168 = arith.constant 5.000000e-01 : f32
    %393 = vector.broadcast %cst_168 : f32 to vector<8x128xf32>
    %394 = arith.mulf %393, %392 : vector<8x128xf32>
    %cst_169 = arith.constant 5.000000e-01 : f32
    %395 = vector.broadcast %cst_169 : f32 to vector<8x128xf32>
    %396 = arith.addf %394, %395 : vector<8x128xf32>
    %397 = vector.extract_strided_slice %388 {offsets = [0, 128], sizes = [8, 128], strides = [1, 1]} : vector<8x512xf32> to vector<8x128xf32>
    %cst_170 = arith.constant 5.000000e-01 : f32
    %398 = vector.broadcast %cst_170 : f32 to vector<8x128xf32>
    %399 = arith.mulf %398, %397 : vector<8x128xf32>
    %400 = math.tanh %399 : vector<8x128xf32>
    %cst_171 = arith.constant 5.000000e-01 : f32
    %401 = vector.broadcast %cst_171 : f32 to vector<8x128xf32>
    %402 = arith.mulf %401, %400 : vector<8x128xf32>
    %cst_172 = arith.constant 5.000000e-01 : f32
    %403 = vector.broadcast %cst_172 : f32 to vector<8x128xf32>
    %404 = arith.addf %402, %403 : vector<8x128xf32>
    %405 = vector.extract_strided_slice %388 {offsets = [0, 256], sizes = [8, 128], strides = [1, 1]} : vector<8x512xf32> to vector<8x128xf32>
    %406 = math.tanh %405 : vector<8x128xf32>
    %407 = vector.extract_strided_slice %388 {offsets = [0, 384], sizes = [8, 128], strides = [1, 1]} : vector<8x512xf32> to vector<8x128xf32>
    %cst_173 = arith.constant 5.000000e-01 : f32
    %408 = vector.broadcast %cst_173 : f32 to vector<8x128xf32>
    %409 = arith.mulf %408, %407 : vector<8x128xf32>
    %410 = math.tanh %409 : vector<8x128xf32>
    %cst_174 = arith.constant 5.000000e-01 : f32
    %411 = vector.broadcast %cst_174 : f32 to vector<8x128xf32>
    %412 = arith.mulf %411, %410 : vector<8x128xf32>
    %cst_175 = arith.constant 5.000000e-01 : f32
    %413 = vector.broadcast %cst_175 : f32 to vector<8x128xf32>
    %414 = arith.addf %412, %413 : vector<8x128xf32>
    %415 = arith.mulf %404, %379 : vector<8x128xf32>
    %416 = arith.mulf %396, %406 : vector<8x128xf32>
    %417 = arith.addf %415, %416 : vector<8x128xf32>
    %418 = math.tanh %417 : vector<8x128xf32>
    %419 = arith.mulf %414, %418 : vector<8x128xf32>
    %c2_i32_176 = arith.constant 2 : i32
    %c8_i32_177 = arith.constant 8 : i32
    %420 = arith.muli %c2_i32_176, %c8_i32_177 : i32
    %421 = tpu.assume_multiple %420, 8 : i32
    %422 = arith.index_cast %421 : i32 to index
    %c0_178 = arith.constant 0 : index
    %423 = vector.load %arg12[%422, %c0_178] : memref<64x512xf32, #tpu.memory_space<vmem>>, vector<8x512xf32>
    %c0_179 = arith.constant 0 : index
    %c0_180 = arith.constant 0 : index
    %424 = vector.load %arg3[%c0_179, %c0_180] : memref<128x512xf32, #tpu.memory_space<vmem>>, vector<128x512xf32>
    %cst_181 = arith.constant dense<0.000000e+00> : vector<8x512xf32>
    %425 = tpu.matmul %419, %424, %cst_181 {dimension_numbers = #tpu.dot_dimension_numbers<[1], [0], [0], [1], [0, 0, 1, 1], [], []>} : vector<8x128xf32>, vector<128x512xf32>, vector<8x512xf32> -> vector<8x512xf32>
    %426 = arith.addf %423, %425 : vector<8x512xf32>
    %427 = vector.extract_strided_slice %426 {offsets = [0, 0], sizes = [8, 128], strides = [1, 1]} : vector<8x512xf32> to vector<8x128xf32>
    %cst_182 = arith.constant 5.000000e-01 : f32
    %428 = vector.broadcast %cst_182 : f32 to vector<8x128xf32>
    %429 = arith.mulf %428, %427 : vector<8x128xf32>
    %430 = math.tanh %429 : vector<8x128xf32>
    %cst_183 = arith.constant 5.000000e-01 : f32
    %431 = vector.broadcast %cst_183 : f32 to vector<8x128xf32>
    %432 = arith.mulf %431, %430 : vector<8x128xf32>
    %cst_184 = arith.constant 5.000000e-01 : f32
    %433 = vector.broadcast %cst_184 : f32 to vector<8x128xf32>
    %434 = arith.addf %432, %433 : vector<8x128xf32>
    %435 = vector.extract_strided_slice %426 {offsets = [0, 128], sizes = [8, 128], strides = [1, 1]} : vector<8x512xf32> to vector<8x128xf32>
    %cst_185 = arith.constant 5.000000e-01 : f32
    %436 = vector.broadcast %cst_185 : f32 to vector<8x128xf32>
    %437 = arith.mulf %436, %435 : vector<8x128xf32>
    %438 = math.tanh %437 : vector<8x128xf32>
    %cst_186 = arith.constant 5.000000e-01 : f32
    %439 = vector.broadcast %cst_186 : f32 to vector<8x128xf32>
    %440 = arith.mulf %439, %438 : vector<8x128xf32>
    %cst_187 = arith.constant 5.000000e-01 : f32
    %441 = vector.broadcast %cst_187 : f32 to vector<8x128xf32>
    %442 = arith.addf %440, %441 : vector<8x128xf32>
    %443 = vector.extract_strided_slice %426 {offsets = [0, 256], sizes = [8, 128], strides = [1, 1]} : vector<8x512xf32> to vector<8x128xf32>
    %444 = math.tanh %443 : vector<8x128xf32>
    %445 = vector.extract_strided_slice %426 {offsets = [0, 384], sizes = [8, 128], strides = [1, 1]} : vector<8x512xf32> to vector<8x128xf32>
    %cst_188 = arith.constant 5.000000e-01 : f32
    %446 = vector.broadcast %cst_188 : f32 to vector<8x128xf32>
    %447 = arith.mulf %446, %445 : vector<8x128xf32>
    %448 = math.tanh %447 : vector<8x128xf32>
    %cst_189 = arith.constant 5.000000e-01 : f32
    %449 = vector.broadcast %cst_189 : f32 to vector<8x128xf32>
    %450 = arith.mulf %449, %448 : vector<8x128xf32>
    %cst_190 = arith.constant 5.000000e-01 : f32
    %451 = vector.broadcast %cst_190 : f32 to vector<8x128xf32>
    %452 = arith.addf %450, %451 : vector<8x128xf32>
    %453 = arith.mulf %442, %417 : vector<8x128xf32>
    %454 = arith.mulf %434, %444 : vector<8x128xf32>
    %455 = arith.addf %453, %454 : vector<8x128xf32>
    %456 = math.tanh %455 : vector<8x128xf32>
    %457 = arith.mulf %452, %456 : vector<8x128xf32>
    %c3_i32_191 = arith.constant 3 : i32
    %c8_i32_192 = arith.constant 8 : i32
    %458 = arith.muli %c3_i32_191, %c8_i32_192 : i32
    %459 = tpu.assume_multiple %458, 8 : i32
    %460 = arith.index_cast %459 : i32 to index
    %c0_193 = arith.constant 0 : index
    %461 = vector.load %arg12[%460, %c0_193] : memref<64x512xf32, #tpu.memory_space<vmem>>, vector<8x512xf32>
    %c0_194 = arith.constant 0 : index
    %c0_195 = arith.constant 0 : index
    %462 = vector.load %arg3[%c0_194, %c0_195] : memref<128x512xf32, #tpu.memory_space<vmem>>, vector<128x512xf32>
    %cst_196 = arith.constant dense<0.000000e+00> : vector<8x512xf32>
    %463 = tpu.matmul %457, %462, %cst_196 {dimension_numbers = #tpu.dot_dimension_numbers<[1], [0], [0], [1], [0, 0, 1, 1], [], []>} : vector<8x128xf32>, vector<128x512xf32>, vector<8x512xf32> -> vector<8x512xf32>
    %464 = arith.addf %461, %463 : vector<8x512xf32>
    %465 = vector.extract_strided_slice %464 {offsets = [0, 0], sizes = [8, 128], strides = [1, 1]} : vector<8x512xf32> to vector<8x128xf32>
    %cst_197 = arith.constant 5.000000e-01 : f32
    %466 = vector.broadcast %cst_197 : f32 to vector<8x128xf32>
    %467 = arith.mulf %466, %465 : vector<8x128xf32>
    %468 = math.tanh %467 : vector<8x128xf32>
    %cst_198 = arith.constant 5.000000e-01 : f32
    %469 = vector.broadcast %cst_198 : f32 to vector<8x128xf32>
    %470 = arith.mulf %469, %468 : vector<8x128xf32>
    %cst_199 = arith.constant 5.000000e-01 : f32
    %471 = vector.broadcast %cst_199 : f32 to vector<8x128xf32>
    %472 = arith.addf %470, %471 : vector<8x128xf32>
    %473 = vector.extract_strided_slice %464 {offsets = [0, 128], sizes = [8, 128], strides = [1, 1]} : vector<8x512xf32> to vector<8x128xf32>
    %cst_200 = arith.constant 5.000000e-01 : f32
    %474 = vector.broadcast %cst_200 : f32 to vector<8x128xf32>
    %475 = arith.mulf %474, %473 : vector<8x128xf32>
    %476 = math.tanh %475 : vector<8x128xf32>
    %cst_201 = arith.constant 5.000000e-01 : f32
    %477 = vector.broadcast %cst_201 : f32 to vector<8x128xf32>
    %478 = arith.mulf %477, %476 : vector<8x128xf32>
    %cst_202 = arith.constant 5.000000e-01 : f32
    %479 = vector.broadcast %cst_202 : f32 to vector<8x128xf32>
    %480 = arith.addf %478, %479 : vector<8x128xf32>
    %481 = vector.extract_strided_slice %464 {offsets = [0, 256], sizes = [8, 128], strides = [1, 1]} : vector<8x512xf32> to vector<8x128xf32>
    %482 = math.tanh %481 : vector<8x128xf32>
    %483 = vector.extract_strided_slice %464 {offsets = [0, 384], sizes = [8, 128], strides = [1, 1]} : vector<8x512xf32> to vector<8x128xf32>
    %cst_203 = arith.constant 5.000000e-01 : f32
    %484 = vector.broadcast %cst_203 : f32 to vector<8x128xf32>
    %485 = arith.mulf %484, %483 : vector<8x128xf32>
    %486 = math.tanh %485 : vector<8x128xf32>
    %cst_204 = arith.constant 5.000000e-01 : f32
    %487 = vector.broadcast %cst_204 : f32 to vector<8x128xf32>
    %488 = arith.mulf %487, %486 : vector<8x128xf32>
    %cst_205 = arith.constant 5.000000e-01 : f32
    %489 = vector.broadcast %cst_205 : f32 to vector<8x128xf32>
    %490 = arith.addf %488, %489 : vector<8x128xf32>
    %491 = arith.mulf %480, %455 : vector<8x128xf32>
    %492 = arith.mulf %472, %482 : vector<8x128xf32>
    %493 = arith.addf %491, %492 : vector<8x128xf32>
    %494 = math.tanh %493 : vector<8x128xf32>
    %495 = arith.mulf %490, %494 : vector<8x128xf32>
    %c4_i32_206 = arith.constant 4 : i32
    %c8_i32_207 = arith.constant 8 : i32
    %496 = arith.muli %c4_i32_206, %c8_i32_207 : i32
    %497 = tpu.assume_multiple %496, 8 : i32
    %498 = arith.index_cast %497 : i32 to index
    %c0_208 = arith.constant 0 : index
    %499 = vector.load %arg12[%498, %c0_208] : memref<64x512xf32, #tpu.memory_space<vmem>>, vector<8x512xf32>
    %c0_209 = arith.constant 0 : index
    %c0_210 = arith.constant 0 : index
    %500 = vector.load %arg3[%c0_209, %c0_210] : memref<128x512xf32, #tpu.memory_space<vmem>>, vector<128x512xf32>
    %cst_211 = arith.constant dense<0.000000e+00> : vector<8x512xf32>
    %501 = tpu.matmul %495, %500, %cst_211 {dimension_numbers = #tpu.dot_dimension_numbers<[1], [0], [0], [1], [0, 0, 1, 1], [], []>} : vector<8x128xf32>, vector<128x512xf32>, vector<8x512xf32> -> vector<8x512xf32>
    %502 = arith.addf %499, %501 : vector<8x512xf32>
    %503 = vector.extract_strided_slice %502 {offsets = [0, 0], sizes = [8, 128], strides = [1, 1]} : vector<8x512xf32> to vector<8x128xf32>
    %cst_212 = arith.constant 5.000000e-01 : f32
    %504 = vector.broadcast %cst_212 : f32 to vector<8x128xf32>
    %505 = arith.mulf %504, %503 : vector<8x128xf32>
    %506 = math.tanh %505 : vector<8x128xf32>
    %cst_213 = arith.constant 5.000000e-01 : f32
    %507 = vector.broadcast %cst_213 : f32 to vector<8x128xf32>
    %508 = arith.mulf %507, %506 : vector<8x128xf32>
    %cst_214 = arith.constant 5.000000e-01 : f32
    %509 = vector.broadcast %cst_214 : f32 to vector<8x128xf32>
    %510 = arith.addf %508, %509 : vector<8x128xf32>
    %511 = vector.extract_strided_slice %502 {offsets = [0, 128], sizes = [8, 128], strides = [1, 1]} : vector<8x512xf32> to vector<8x128xf32>
    %cst_215 = arith.constant 5.000000e-01 : f32
    %512 = vector.broadcast %cst_215 : f32 to vector<8x128xf32>
    %513 = arith.mulf %512, %511 : vector<8x128xf32>
    %514 = math.tanh %513 : vector<8x128xf32>
    %cst_216 = arith.constant 5.000000e-01 : f32
    %515 = vector.broadcast %cst_216 : f32 to vector<8x128xf32>
    %516 = arith.mulf %515, %514 : vector<8x128xf32>
    %cst_217 = arith.constant 5.000000e-01 : f32
    %517 = vector.broadcast %cst_217 : f32 to vector<8x128xf32>
    %518 = arith.addf %516, %517 : vector<8x128xf32>
    %519 = vector.extract_strided_slice %502 {offsets = [0, 256], sizes = [8, 128], strides = [1, 1]} : vector<8x512xf32> to vector<8x128xf32>
    %520 = math.tanh %519 : vector<8x128xf32>
    %521 = vector.extract_strided_slice %502 {offsets = [0, 384], sizes = [8, 128], strides = [1, 1]} : vector<8x512xf32> to vector<8x128xf32>
    %cst_218 = arith.constant 5.000000e-01 : f32
    %522 = vector.broadcast %cst_218 : f32 to vector<8x128xf32>
    %523 = arith.mulf %522, %521 : vector<8x128xf32>
    %524 = math.tanh %523 : vector<8x128xf32>
    %cst_219 = arith.constant 5.000000e-01 : f32
    %525 = vector.broadcast %cst_219 : f32 to vector<8x128xf32>
    %526 = arith.mulf %525, %524 : vector<8x128xf32>
    %cst_220 = arith.constant 5.000000e-01 : f32
    %527 = vector.broadcast %cst_220 : f32 to vector<8x128xf32>
    %528 = arith.addf %526, %527 : vector<8x128xf32>
    %529 = arith.mulf %518, %493 : vector<8x128xf32>
    %530 = arith.mulf %510, %520 : vector<8x128xf32>
    %531 = arith.addf %529, %530 : vector<8x128xf32>
    %532 = math.tanh %531 : vector<8x128xf32>
    %533 = arith.mulf %528, %532 : vector<8x128xf32>
    %c5_i32_221 = arith.constant 5 : i32
    %c8_i32_222 = arith.constant 8 : i32
    %534 = arith.muli %c5_i32_221, %c8_i32_222 : i32
    %535 = tpu.assume_multiple %534, 8 : i32
    %536 = arith.index_cast %535 : i32 to index
    %c0_223 = arith.constant 0 : index
    %537 = vector.load %arg12[%536, %c0_223] : memref<64x512xf32, #tpu.memory_space<vmem>>, vector<8x512xf32>
    %c0_224 = arith.constant 0 : index
    %c0_225 = arith.constant 0 : index
    %538 = vector.load %arg3[%c0_224, %c0_225] : memref<128x512xf32, #tpu.memory_space<vmem>>, vector<128x512xf32>
    %cst_226 = arith.constant dense<0.000000e+00> : vector<8x512xf32>
    %539 = tpu.matmul %533, %538, %cst_226 {dimension_numbers = #tpu.dot_dimension_numbers<[1], [0], [0], [1], [0, 0, 1, 1], [], []>} : vector<8x128xf32>, vector<128x512xf32>, vector<8x512xf32> -> vector<8x512xf32>
    %540 = arith.addf %537, %539 : vector<8x512xf32>
    %541 = vector.extract_strided_slice %540 {offsets = [0, 0], sizes = [8, 128], strides = [1, 1]} : vector<8x512xf32> to vector<8x128xf32>
    %cst_227 = arith.constant 5.000000e-01 : f32
    %542 = vector.broadcast %cst_227 : f32 to vector<8x128xf32>
    %543 = arith.mulf %542, %541 : vector<8x128xf32>
    %544 = math.tanh %543 : vector<8x128xf32>
    %cst_228 = arith.constant 5.000000e-01 : f32
    %545 = vector.broadcast %cst_228 : f32 to vector<8x128xf32>
    %546 = arith.mulf %545, %544 : vector<8x128xf32>
    %cst_229 = arith.constant 5.000000e-01 : f32
    %547 = vector.broadcast %cst_229 : f32 to vector<8x128xf32>
    %548 = arith.addf %546, %547 : vector<8x128xf32>
    %549 = vector.extract_strided_slice %540 {offsets = [0, 128], sizes = [8, 128], strides = [1, 1]} : vector<8x512xf32> to vector<8x128xf32>
    %cst_230 = arith.constant 5.000000e-01 : f32
    %550 = vector.broadcast %cst_230 : f32 to vector<8x128xf32>
    %551 = arith.mulf %550, %549 : vector<8x128xf32>
    %552 = math.tanh %551 : vector<8x128xf32>
    %cst_231 = arith.constant 5.000000e-01 : f32
    %553 = vector.broadcast %cst_231 : f32 to vector<8x128xf32>
    %554 = arith.mulf %553, %552 : vector<8x128xf32>
    %cst_232 = arith.constant 5.000000e-01 : f32
    %555 = vector.broadcast %cst_232 : f32 to vector<8x128xf32>
    %556 = arith.addf %554, %555 : vector<8x128xf32>
    %557 = vector.extract_strided_slice %540 {offsets = [0, 256], sizes = [8, 128], strides = [1, 1]} : vector<8x512xf32> to vector<8x128xf32>
    %558 = math.tanh %557 : vector<8x128xf32>
    %559 = vector.extract_strided_slice %540 {offsets = [0, 384], sizes = [8, 128], strides = [1, 1]} : vector<8x512xf32> to vector<8x128xf32>
    %cst_233 = arith.constant 5.000000e-01 : f32
    %560 = vector.broadcast %cst_233 : f32 to vector<8x128xf32>
    %561 = arith.mulf %560, %559 : vector<8x128xf32>
    %562 = math.tanh %561 : vector<8x128xf32>
    %cst_234 = arith.constant 5.000000e-01 : f32
    %563 = vector.broadcast %cst_234 : f32 to vector<8x128xf32>
    %564 = arith.mulf %563, %562 : vector<8x128xf32>
    %cst_235 = arith.constant 5.000000e-01 : f32
    %565 = vector.broadcast %cst_235 : f32 to vector<8x128xf32>
    %566 = arith.addf %564, %565 : vector<8x128xf32>
    %567 = arith.mulf %556, %531 : vector<8x128xf32>
    %568 = arith.mulf %548, %558 : vector<8x128xf32>
    %569 = arith.addf %567, %568 : vector<8x128xf32>
    %570 = math.tanh %569 : vector<8x128xf32>
    %571 = arith.mulf %566, %570 : vector<8x128xf32>
    %c6_i32_236 = arith.constant 6 : i32
    %c8_i32_237 = arith.constant 8 : i32
    %572 = arith.muli %c6_i32_236, %c8_i32_237 : i32
    %573 = tpu.assume_multiple %572, 8 : i32
    %574 = arith.index_cast %573 : i32 to index
    %c0_238 = arith.constant 0 : index
    %575 = vector.load %arg12[%574, %c0_238] : memref<64x512xf32, #tpu.memory_space<vmem>>, vector<8x512xf32>
    %c0_239 = arith.constant 0 : index
    %c0_240 = arith.constant 0 : index
    %576 = vector.load %arg3[%c0_239, %c0_240] : memref<128x512xf32, #tpu.memory_space<vmem>>, vector<128x512xf32>
    %cst_241 = arith.constant dense<0.000000e+00> : vector<8x512xf32>
    %577 = tpu.matmul %571, %576, %cst_241 {dimension_numbers = #tpu.dot_dimension_numbers<[1], [0], [0], [1], [0, 0, 1, 1], [], []>} : vector<8x128xf32>, vector<128x512xf32>, vector<8x512xf32> -> vector<8x512xf32>
    %578 = arith.addf %575, %577 : vector<8x512xf32>
    %579 = vector.extract_strided_slice %578 {offsets = [0, 0], sizes = [8, 128], strides = [1, 1]} : vector<8x512xf32> to vector<8x128xf32>
    %cst_242 = arith.constant 5.000000e-01 : f32
    %580 = vector.broadcast %cst_242 : f32 to vector<8x128xf32>
    %581 = arith.mulf %580, %579 : vector<8x128xf32>
    %582 = math.tanh %581 : vector<8x128xf32>
    %cst_243 = arith.constant 5.000000e-01 : f32
    %583 = vector.broadcast %cst_243 : f32 to vector<8x128xf32>
    %584 = arith.mulf %583, %582 : vector<8x128xf32>
    %cst_244 = arith.constant 5.000000e-01 : f32
    %585 = vector.broadcast %cst_244 : f32 to vector<8x128xf32>
    %586 = arith.addf %584, %585 : vector<8x128xf32>
    %587 = vector.extract_strided_slice %578 {offsets = [0, 128], sizes = [8, 128], strides = [1, 1]} : vector<8x512xf32> to vector<8x128xf32>
    %cst_245 = arith.constant 5.000000e-01 : f32
    %588 = vector.broadcast %cst_245 : f32 to vector<8x128xf32>
    %589 = arith.mulf %588, %587 : vector<8x128xf32>
    %590 = math.tanh %589 : vector<8x128xf32>
    %cst_246 = arith.constant 5.000000e-01 : f32
    %591 = vector.broadcast %cst_246 : f32 to vector<8x128xf32>
    %592 = arith.mulf %591, %590 : vector<8x128xf32>
    %cst_247 = arith.constant 5.000000e-01 : f32
    %593 = vector.broadcast %cst_247 : f32 to vector<8x128xf32>
    %594 = arith.addf %592, %593 : vector<8x128xf32>
    %595 = vector.extract_strided_slice %578 {offsets = [0, 256], sizes = [8, 128], strides = [1, 1]} : vector<8x512xf32> to vector<8x128xf32>
    %596 = math.tanh %595 : vector<8x128xf32>
    %597 = vector.extract_strided_slice %578 {offsets = [0, 384], sizes = [8, 128], strides = [1, 1]} : vector<8x512xf32> to vector<8x128xf32>
    %cst_248 = arith.constant 5.000000e-01 : f32
    %598 = vector.broadcast %cst_248 : f32 to vector<8x128xf32>
    %599 = arith.mulf %598, %597 : vector<8x128xf32>
    %600 = math.tanh %599 : vector<8x128xf32>
    %cst_249 = arith.constant 5.000000e-01 : f32
    %601 = vector.broadcast %cst_249 : f32 to vector<8x128xf32>
    %602 = arith.mulf %601, %600 : vector<8x128xf32>
    %cst_250 = arith.constant 5.000000e-01 : f32
    %603 = vector.broadcast %cst_250 : f32 to vector<8x128xf32>
    %604 = arith.addf %602, %603 : vector<8x128xf32>
    %605 = arith.mulf %594, %569 : vector<8x128xf32>
    %606 = arith.mulf %586, %596 : vector<8x128xf32>
    %607 = arith.addf %605, %606 : vector<8x128xf32>
    %608 = math.tanh %607 : vector<8x128xf32>
    %609 = arith.mulf %604, %608 : vector<8x128xf32>
    %c7_i32_251 = arith.constant 7 : i32
    %c8_i32_252 = arith.constant 8 : i32
    %610 = arith.muli %c7_i32_251, %c8_i32_252 : i32
    %611 = tpu.assume_multiple %610, 8 : i32
    %612 = arith.index_cast %611 : i32 to index
    %c0_253 = arith.constant 0 : index
    %613 = vector.load %arg12[%612, %c0_253] : memref<64x512xf32, #tpu.memory_space<vmem>>, vector<8x512xf32>
    %c0_254 = arith.constant 0 : index
    %c0_255 = arith.constant 0 : index
    %614 = vector.load %arg3[%c0_254, %c0_255] : memref<128x512xf32, #tpu.memory_space<vmem>>, vector<128x512xf32>
    %cst_256 = arith.constant dense<0.000000e+00> : vector<8x512xf32>
    %615 = tpu.matmul %609, %614, %cst_256 {dimension_numbers = #tpu.dot_dimension_numbers<[1], [0], [0], [1], [0, 0, 1, 1], [], []>} : vector<8x128xf32>, vector<128x512xf32>, vector<8x512xf32> -> vector<8x512xf32>
    %616 = arith.addf %613, %615 : vector<8x512xf32>
    %617 = vector.extract_strided_slice %616 {offsets = [0, 0], sizes = [8, 128], strides = [1, 1]} : vector<8x512xf32> to vector<8x128xf32>
    %cst_257 = arith.constant 5.000000e-01 : f32
    %618 = vector.broadcast %cst_257 : f32 to vector<8x128xf32>
    %619 = arith.mulf %618, %617 : vector<8x128xf32>
    %620 = math.tanh %619 : vector<8x128xf32>
    %cst_258 = arith.constant 5.000000e-01 : f32
    %621 = vector.broadcast %cst_258 : f32 to vector<8x128xf32>
    %622 = arith.mulf %621, %620 : vector<8x128xf32>
    %cst_259 = arith.constant 5.000000e-01 : f32
    %623 = vector.broadcast %cst_259 : f32 to vector<8x128xf32>
    %624 = arith.addf %622, %623 : vector<8x128xf32>
    %625 = vector.extract_strided_slice %616 {offsets = [0, 128], sizes = [8, 128], strides = [1, 1]} : vector<8x512xf32> to vector<8x128xf32>
    %cst_260 = arith.constant 5.000000e-01 : f32
    %626 = vector.broadcast %cst_260 : f32 to vector<8x128xf32>
    %627 = arith.mulf %626, %625 : vector<8x128xf32>
    %628 = math.tanh %627 : vector<8x128xf32>
    %cst_261 = arith.constant 5.000000e-01 : f32
    %629 = vector.broadcast %cst_261 : f32 to vector<8x128xf32>
    %630 = arith.mulf %629, %628 : vector<8x128xf32>
    %cst_262 = arith.constant 5.000000e-01 : f32
    %631 = vector.broadcast %cst_262 : f32 to vector<8x128xf32>
    %632 = arith.addf %630, %631 : vector<8x128xf32>
    %633 = vector.extract_strided_slice %616 {offsets = [0, 256], sizes = [8, 128], strides = [1, 1]} : vector<8x512xf32> to vector<8x128xf32>
    %634 = math.tanh %633 : vector<8x128xf32>
    %635 = vector.extract_strided_slice %616 {offsets = [0, 384], sizes = [8, 128], strides = [1, 1]} : vector<8x512xf32> to vector<8x128xf32>
    %cst_263 = arith.constant 5.000000e-01 : f32
    %636 = vector.broadcast %cst_263 : f32 to vector<8x128xf32>
    %637 = arith.mulf %636, %635 : vector<8x128xf32>
    %638 = math.tanh %637 : vector<8x128xf32>
    %cst_264 = arith.constant 5.000000e-01 : f32
    %639 = vector.broadcast %cst_264 : f32 to vector<8x128xf32>
    %640 = arith.mulf %639, %638 : vector<8x128xf32>
    %cst_265 = arith.constant 5.000000e-01 : f32
    %641 = vector.broadcast %cst_265 : f32 to vector<8x128xf32>
    %642 = arith.addf %640, %641 : vector<8x128xf32>
    %643 = arith.mulf %632, %607 : vector<8x128xf32>
    %644 = arith.mulf %624, %634 : vector<8x128xf32>
    %645 = arith.addf %643, %644 : vector<8x128xf32>
    %646 = math.tanh %645 : vector<8x128xf32>
    %647 = arith.mulf %642, %646 : vector<8x128xf32>
    %c8_i32_266 = arith.constant 8 : i32
    %c1_267 = arith.constant 1 : index
    %c0_268 = arith.constant 0 : index
    %c0_269 = arith.constant 0 : index
    %648 = vector.load %arg9[%c1_267, %c0_268, %c0_269] : memref<2x8x128xf32, #tpu.memory_space<vmem>>, vector<1x8x128xf32>
    %649 = vector.shape_cast %648 : vector<1x8x128xf32> to vector<8x128xf32>
    %650 = vector.shape_cast %647 : vector<8x128xf32> to vector<1x8x128xf32>
    tpu.vector_store %arg9[%c1_267, %c0_268, %c0_269], %650 {strides = array<i32>} : memref<2x8x128xf32, #tpu.memory_space<vmem>>, vector<1x8x128xf32>,
    %c1_270 = arith.constant 1 : index
    %c0_271 = arith.constant 0 : index
    %c0_272 = arith.constant 0 : index
    %651 = vector.load %arg10[%c1_270, %c0_271, %c0_272] : memref<2x8x128xf32, #tpu.memory_space<vmem>>, vector<1x8x128xf32>
    %652 = vector.shape_cast %651 : vector<1x8x128xf32> to vector<8x128xf32>
    %653 = vector.shape_cast %645 : vector<8x128xf32> to vector<1x8x128xf32>
    tpu.vector_store %arg10[%c1_270, %c0_271, %c0_272], %653 {strides = array<i32>} : memref<2x8x128xf32, #tpu.memory_space<vmem>>, vector<1x8x128xf32>,
    %c0_i32_273 = arith.constant 0 : i32
    %654 = arith.cmpi eq, %arg0, %c0_i32_273 : i32
    %655 = arith.extui %654 : i1 to i32
    %c0_i32_274 = arith.constant 0 : i32
    %656 = arith.cmpi ne, %655, %c0_i32_274 : i32
    scf.if %656 {
      %c0_275 = arith.constant 0 : index
      %c0_276 = arith.constant 0 : index
      %657 = vector.load %arg6[%c0_275, %c0_276] : memref<128x128xf32, #tpu.memory_space<vmem>>, vector<128x128xf32>
      %c0_277 = arith.constant 0 : index
      %c0_278 = arith.constant 0 : index
      %658 = vector.load %arg7[%c0_277, %c0_278] : memref<1x128xf32, #tpu.memory_space<vmem>>, vector<1x128xf32>
      %c1_279 = arith.constant 1 : index
      %c0_280 = arith.constant 0 : index
      %c0_281 = arith.constant 0 : index
      %659 = vector.load %arg9[%c1_279, %c0_280, %c0_281] : memref<2x8x128xf32, #tpu.memory_space<vmem>>, vector<1x8x128xf32>
      %660 = vector.shape_cast %659 : vector<1x8x128xf32> to vector<8x128xf32>
      %cst_282 = arith.constant dense<0.000000e+00> : vector<8x128xf32>
      %661 = tpu.matmul %660, %657, %cst_282 {dimension_numbers = #tpu.dot_dimension_numbers<[1], [0], [0], [1], [0, 0, 1, 1], [], []>} : vector<8x128xf32>, vector<128x128xf32>, vector<8x128xf32> -> vector<8x128xf32>
      %662 = vector.broadcast %658 : vector<1x128xf32> to vector<8x128xf32>
      %663 = arith.addf %661, %662 : vector<8x128xf32>
      %c0_283 = arith.constant 0 : index
      %c0_284 = arith.constant 0 : index
      %664 = vector.load %arg8[%c0_283, %c0_284] : memref<8x128xf32, #tpu.memory_space<vmem>>, vector<8x128xf32>
      tpu.vector_store %arg8[%c0_283, %c0_284], %663 {strides = array<i32>} : memref<8x128xf32, #tpu.memory_space<vmem>>, vector<8x128xf32>,
    } else {
    }
    return
  }
  func.func @transform_0(%arg0: i32) -> (i32, i32) {
    %c0_i32 = arith.constant 0 : i32
    %c0_i32_0 = arith.constant 0 : i32
    return %arg0, %c0_i32 : i32, i32
  }
  func.func @transform_1(%arg0: i32) -> (i32, i32) {
    %c0_i32 = arith.constant 0 : i32
    %c0_i32_0 = arith.constant 0 : i32
    %c0_i32_1 = arith.constant 0 : i32
    return %c0_i32, %c0_i32_0 : i32, i32
  }
  func.func @transform_2(%arg0: i32) -> (i32, i32) {
    %c0_i32 = arith.constant 0 : i32
    %c0_i32_0 = arith.constant 0 : i32
    %c0_i32_1 = arith.constant 0 : i32
    return %c0_i32, %c0_i32_0 : i32, i32
  }
  func.func @transform_3(%arg0: i32) -> (i32, i32) {
    %c0_i32 = arith.constant 0 : i32
    %c0_i32_0 = arith.constant 0 : i32
    %c0_i32_1 = arith.constant 0 : i32
    return %c0_i32, %c0_i32_0 : i32, i32
  }
  func.func @transform_4(%arg0: i32) -> (i32, i32) {
    %c0_i32 = arith.constant 0 : i32
    %c0_i32_0 = arith.constant 0 : i32
    %c0_i32_1 = arith.constant 0 : i32
    return %c0_i32, %c0_i32_0 : i32, i32
  }
  func.func @transform_5(%arg0: i32) -> (i32, i32) {
    %c0_i32 = arith.constant 0 : i32
    %c0_i32_0 = arith.constant 0 : i32
    %c0_i32_1 = arith.constant 0 : i32
    return %c0_i32, %c0_i32_0 : i32, i32
  }
  func.func @transform_6(%arg0: i32) -> (i32, i32) {
    %c0_i32 = arith.constant 0 : i32
    %c0_i32_0 = arith.constant 0 : i32
    %c0_i32_1 = arith.constant 0 : i32
    return %c0_i32, %c0_i32_0 : i32, i32
  }
  func.func @transform_7(%arg0: i32) -> (i32, i32) {
    %c0_i32 = arith.constant 0 : i32
    %c0_i32_0 = arith.constant 0 : i32
    %c0_i32_1 = arith.constant 0 : i32
    return %c0_i32, %c0_i32_0 : i32, i32
  }
}

</mosaic_0001>

<bundles_post_ra>
// kernel: lstm_forward_pallas.1
= control target key start
LH: loop header
LB: loop body
LE: loop exit
PB: predicated region body
PF: predicated region fallthrough
CT: control target
= control target key end

     0   :  { %v7129_v3 = vmov 0.0   ;;  %vm4140_vm0 = vmmov 0   ;;  %s7121_s1 = inlined_call_operand.vmem [shape: f32[128,512], index: 1, kind: input, shape index: {}]   ;;  %s7122_s0 = inlined_call_operand.vmem [shape: f32[64,512], index: 0, kind: input, shape index: {}]   ;;  %s7123_s3 = inlined_call_operand.vmem [shape: f32[128,512], index: 3, kind: input, shape index: {}]   ;;  %s7124_s2 = inlined_call_operand.vmem [shape: f32[128,512], index: 2, kind: input, shape index: {}]   ;;  %s7125_s4 = inlined_call_operand.vmem [shape: f32[1,512], index: 4, kind: input, shape index: {}]   ;;  %s7126_s5 = inlined_call_operand.vmem [shape: f32[128,128], index: 5, kind: input, shape index: {}]   ;;  %s7127_s6 = inlined_call_operand.vmem [shape: f32[1,128], index: 6, kind: input, shape index: {}]   ;;  %s7128_s7 = inlined_call_operand.vmem [shape: f32[8,128], index: 7, kind: output, shape index: {}]  }
   0x1   :  { %v4184_v0 = vld [vmem:[%s7121_s1 + $0x1e8] sm:$0xff]  ;;  %v4189_v1 = vld [vmem:[%s7121_s1 + $0x1e0] sm:$0xff]  ;;  %172 = vmatprep.mubr.f32.mxu0 %v7129_v3  ;;  %243 = vmatprep.mubr.f32.mxu1 %v7129_v3  ;;  %v4213_v6 = vld [vmem:[%s7121_s1 + $0x1f8] sm:$0xff] }
   0x2   :  { %7318 = vst [vmem:[#allocation6_spill] sm:$0xff] %v4184_v0  ;;  %v4194_v2 = vld [vmem:[%s7121_s1 + $0x1c8] sm:$0xff]  ;;  %108 = vmatprep.subr.mxu0 %v4184_v0  ;;  %v4202_v4 = vld [vmem:[%s7121_s1 + $0x1c0] sm:$0xff]  ;;  %7319 = vst [vmem:[#allocation7_spill] sm:$0xff] %v4213_v6  ;;  %179 = vmatprep.subr.mxu1 %v4213_v6 }
   0x3   :  { %109 = vmatpush1.msra.mxu0 %v4189_v1  ;;  %v4208_v5 = vld [vmem:[%s7121_s1 + $0x1a8] sm:$0xff]  ;;  %v4219_v7 = vld [vmem:[%s7121_s1 + $0x1a0] sm:$0xff]  ;;  %v4225_v8 = vld [vmem:[%s7121_s1 + $0x1f0] sm:$0xff] }
   0x4   :  { %110 = vmatprep.subr.mxu0 %v4194_v2  ;;  %v4230_v9 = vld [vmem:[%s7121_s1 + $0x1d8] sm:$0xff]  ;;  %v4236_v10 = vld [vmem:[%s7121_s1 + $0x188] sm:$0xff]  ;;  %180 = vmatpush1.msra.mxu1 %v4225_v8  ;;  %v4242_v11 = vld [vmem:[%s7121_s1 + $0x1d0] sm:$0xff] }
   0x5   :  { %111 = vmatpush1.msra.mxu0 %v4202_v4  ;;  %v4248_v12 = vld [vmem:[%s7121_s1 + $0x180] sm:$0xff]  ;;  %181 = vmatprep.subr.mxu1 %v4230_v9  ;;  %v4254_v13 = vld [vmem:[%s7121_s1 + $0x1b8] sm:$0xff]  ;;  %v4259_v14 = vld [vmem:[%s7121_s1 + $0x1b0] sm:$0xff] }
   0x6   :  { %112 = vmatprep.subr.mxu0 %v4208_v5  ;;  %v4265_v15 = vld [vmem:[%s7121_s1 + $0x168] sm:$0xff]  ;;  %182 = vmatpush1.msra.mxu1 %v4242_v11  ;;  %v4271_v16 = vld [vmem:[%s7121_s1 + $0x198] sm:$0xff]  ;;  %v4277_v17 = vld [vmem:[%s7121_s1 + $0x160] sm:$0xff] }
   0x7   :  { %113 = vmatpush1.msra.mxu0 %v4219_v7  ;;  %183 = vmatprep.subr.mxu1 %v4254_v13  ;;  %v4283_v18 = vld [vmem:[%s7121_s1 + $0x190] sm:$0xff]  ;;  %v4289_v19 = vld [vmem:[%s7121_s1 + $0x148] sm:$0xff]  ;;  %v4295_v20 = vld [vmem:[%s7121_s1 + $0x178] sm:$0xff] }
   0x8   :  { %114 = vmatprep.subr.mxu0 %v4236_v10  ;;  %184 = vmatpush1.msra.mxu1 %v4259_v14  ;;  %v4301_v21 = vld [vmem:[%s7121_s1 + $0x140] sm:$0xff]  ;;  %v4307_v22 = vld [vmem:[%s7121_s1 + $0x170] sm:$0xff]  ;;  %v4313_v23 = vld [vmem:[%s7121_s1 + $0x128] sm:$0xff] }
   0x9   :  { %115 = vmatpush1.msra.mxu0 %v4248_v12  ;;  %185 = vmatprep.subr.mxu1 %v4271_v16  ;;  %v4319_v24 = vld [vmem:[%s7121_s1 + $0x158] sm:$0xff]  ;;  %v4325_v25 = vld [vmem:[%s7121_s1 + $0x120] sm:$0xff]  ;;  %v4331_v26 = vld [vmem:[%s7121_s1 + $0x150] sm:$0xff] }
   0xa   :  { %116 = vmatprep.subr.mxu0 %v4265_v15  ;;  %186 = vmatpush1.msra.mxu1 %v4283_v18  ;;  %v4337_v27 = vld [vmem:[%s7121_s1 + $0x108] sm:$0xff]  ;;  %v4343_v28 = vld [vmem:[%s7121_s1 + $0x138] sm:$0xff]  ;;  %v4349_v29 = vld [vmem:[%s7121_s1 + $0x100] sm:$0xff] }
   0xb   :  { %117 = vmatpush1.msra.mxu0 %v4277_v17  ;;  %187 = vmatprep.subr.mxu1 %v4295_v20  ;;  %v4355_v30 = vld [vmem:[%s7121_s1 + $0x130] sm:$0xff]  ;;  %v4361_v31 = vld [vmem:[%s7121_s1 + $0xe8] sm:$0xff]  ;;  %v4367_v32 = vld [vmem:[%s7121_s1 + $0x118] sm:$0xff] }
   0xc   :  { %118 = vmatprep.subr.mxu0 %v4289_v19  ;;  %188 = vmatpush1.msra.mxu1 %v4307_v22  ;;  %v4373_v33 = vld [vmem:[%s7121_s1 + $0xe0] sm:$0xff]  ;;  %v4379_v34 = vld [vmem:[%s7121_s1 + $0x110] sm:$0xff]  ;;  %v4385_v35 = vld [vmem:[%s7121_s1 + $0xc8] sm:$0xff] }
   0xd   :  { %119 = vmatpush1.msra.mxu0 %v4301_v21  ;;  %189 = vmatprep.subr.mxu1 %v4319_v24  ;;  %v4391_v36 = vld [vmem:[%s7121_s1 + $0xf8] sm:$0xff]  ;;  %v4397_v37 = vld [vmem:[%s7121_s1 + $0xc0] sm:$0xff]  ;;  %v4403_v38 = vld [vmem:[%s7121_s1 + $0xf0] sm:$0xff] }
   0xe   :  { %120 = vmatprep.subr.mxu0 %v4313_v23  ;;  %190 = vmatpush1.msra.mxu1 %v4331_v26  ;;  %v4409_v39 = vld [vmem:[%s7121_s1 + $0xa8] sm:$0xff]  ;;  %v4415_v40 = vld [vmem:[%s7121_s1 + $0xd8] sm:$0xff]  ;;  %v4421_v41 = vld [vmem:[%s7121_s1 + $0xa0] sm:$0xff] }
   0xf   :  { %121 = vmatpush1.msra.mxu0 %v4325_v25  ;;  %191 = vmatprep.subr.mxu1 %v4343_v28  ;;  %v4427_v42 = vld [vmem:[%s7121_s1 + $0xd0] sm:$0xff]  ;;  %v4433_v43 = vld [vmem:[%s7121_s1 + $0x88] sm:$0xff]  ;;  %v4439_v44 = vld [vmem:[%s7121_s1 + $0xb8] sm:$0xff] }
  0x10   :  { %122 = vmatprep.subr.mxu0 %v4337_v27  ;;  %192 = vmatpush1.msra.mxu1 %v4355_v30  ;;  %v4445_v45 = vld [vmem:[%s7121_s1 + $0x80] sm:$0xff]  ;;  %v4451_v46 = vld [vmem:[%s7121_s1 + $0xb0] sm:$0xff]  ;;  %v4457_v47 = vld [vmem:[%s7121_s1 + $0x68] sm:$0xff] }
  0x11   :  { %123 = vmatpush1.msra.mxu0 %v4349_v29  ;;  %193 = vmatprep.subr.mxu1 %v4367_v32  ;;  %7320 = vst [vmem:[#allocation8_spill] sm:$0xff] %v4457_v47  ;;  %v4463_v48 = vld [vmem:[%s7121_s1 + $0x98] sm:$0xff]  ;;  %v4469_v49 = vld [vmem:[%s7121_s1 + $0x60] sm:$0xff]  ;;  %v4475_v50 = vld [vmem:[%s7121_s1 + $0x90] sm:$0xff] }
  0x12   :  { %124 = vmatprep.subr.mxu0 %v4361_v31  ;;  %194 = vmatpush1.msra.mxu1 %v4379_v34  ;;  %7321 = vst [vmem:[#allocation9_spill] sm:$0xff] %v4469_v49  ;;  %7322 = vst [vmem:[#allocation10_spill] sm:$0xff] %v4475_v50  ;;  %v4481_v51 = vld [vmem:[%s7121_s1 + $0x48] sm:$0xff]  ;;  %v4487_v52 = vld [vmem:[%s7121_s1 + $0x78] sm:$0xff] }
  0x13   :  { %125 = vmatpush1.msra.mxu0 %v4373_v33  ;;  %195 = vmatprep.subr.mxu1 %v4391_v36  ;;  %7323 = vst [vmem:[#allocation11_spill] sm:$0xff] %v4481_v51  ;;  %7324 = vst [vmem:[#allocation12_spill] sm:$0xff] %v4487_v52  ;;  %v4493_v53 = vld [vmem:[%s7121_s1 + $0x40] sm:$0xff]  ;;  %v4499_v54 = vld [vmem:[%s7121_s1 + $0x70] sm:$0xff] }
  0x14   :  { %126 = vmatprep.subr.mxu0 %v4385_v35  ;;  %196 = vmatpush1.msra.mxu1 %v4403_v38  ;;  %7325 = vst [vmem:[#allocation13_spill] sm:$0xff] %v4493_v53  ;;  %7326 = vst [vmem:[#allocation14_spill] sm:$0xff] %v4499_v54  ;;  %v4505_v55 = vld [vmem:[%s7121_s1 + $0x28] sm:$0xff]  ;;  %v4511_v56 = vld [vmem:[%s7121_s1 + $0x58] sm:$0xff] }
  0x15   :  { %127 = vmatpush1.msra.mxu0 %v4397_v37  ;;  %197 = vmatprep.subr.mxu1 %v4415_v40  ;;  %7327 = vst [vmem:[#allocation15_spill] sm:$0xff] %v4505_v55  ;;  %7328 = vst [vmem:[#allocation16_spill] sm:$0xff] %v4511_v56  ;;  %v4517_v57 = vld [vmem:[%s7121_s1 + $0x20] sm:$0xff]  ;;  %v4523_v58 = vld [vmem:[%s7121_s1 + $0x50] sm:$0xff] }
  0x16   :  { %128 = vmatprep.subr.mxu0 %v4409_v39  ;;  %198 = vmatpush1.msra.mxu1 %v4427_v42  ;;  %7329 = vst [vmem:[#allocation17_spill] sm:$0xff] %v4517_v57  ;;  %7330 = vst [vmem:[#allocation18_spill] sm:$0xff] %v4523_v58  ;;  %v4529_v59 = vld [vmem:[%s7121_s1 + $0x8] sm:$0xff]  ;;  %v4535_v60 = vld [vmem:[%s7121_s1 + $0x38] sm:$0xff] }
  0x17   :  { %129 = vmatpush1.msra.mxu0 %v4421_v41  ;;  %199 = vmatprep.subr.mxu1 %v4439_v44  ;;  %7331 = vst [vmem:[#allocation19_spill] sm:$0xff] %v4529_v59  ;;  %7332 = vst [vmem:[#allocation20_spill] sm:$0xff] %v4535_v60  ;;  %v4541_v61 = vld [vmem:[%s7121_s1] sm:$0xff]  ;;  %v4547_v62 = vld [vmem:[%s7121_s1 + $0x30] sm:$0xff] }
  0x18   :  { %130 = vmatprep.subr.mxu0 %v4433_v43  ;;  %200 = vmatpush1.msra.mxu1 %v4451_v46  ;;  %7333 = vst [vmem:[#allocation21_spill] sm:$0xff] %v4541_v61  ;;  %7334 = vst [vmem:[#allocation22_spill] sm:$0xff] %v4547_v62  ;;  %v4554_v63 = vld [vmem:[%s7121_s1 + $0x18] sm:$0xff]  ;;  %v4561_v3 = vld [vmem:[%s7121_s1 + $0x10] sm:$0xff] }
  0x19   :  { %131 = vmatpush1.msra.mxu0 %v4445_v45  ;;  %201 = vmatprep.subr.mxu1 %v4463_v48  ;;  %7335 = vst [vmem:[#allocation23_spill] sm:$0xff] %v4554_v63  ;;  %7336 = vst [vmem:[#allocation24_spill] sm:$0xff] %v4561_v3 }
  0x1a   :  { %132 = vmatprep.subr.mxu0 %v4457_v47  ;;  %202 = vmatpush1.msra.mxu1 %v4475_v50 }
  0x1b   :  { %133 = vmatpush1.msra.mxu0 %v4469_v49  ;;  %203 = vmatprep.subr.mxu1 %v4487_v52 }
  0x1c   :  { %134 = vmatprep.subr.mxu0 %v4481_v51  ;;  %204 = vmatpush1.msra.mxu1 %v4499_v54 }
  0x1d   :  { %135 = vmatpush1.msra.mxu0 %v4493_v53  ;;  %205 = vmatprep.subr.mxu1 %v4511_v56 }
  0x1e   :  { %136 = vmatprep.subr.mxu0 %v4505_v55  ;;  %206 = vmatpush1.msra.mxu1 %v4523_v58 }
  0x1f   :  { %137 = vmatpush1.msra.mxu0 %v4517_v57  ;;  %207 = vmatprep.subr.mxu1 %v4535_v60  ;;  %v7337_v57 = vmov 0.0  }
  0x20   :  { %138 = vmatprep.subr.mxu0 %v4529_v59  ;;  %208 = vmatpush1.msra.mxu1 %v4547_v62 }
  0x21   :  { %139 = vmatpush1.msra.mxu0 %v4541_v61  ;;  %209 = vmatprep.subr.mxu1 %v4554_v63 }
  0x22   :  { %173 = vmatmul.mubr.f32.vlgmr.msra.gmra.mxu0 %v7337_v57  ;;  %210 = vmatpush1.msra.mxu1 %v4561_v3 }
  0x23   :  { %344 = vmatprep.subr.mxu0 %v4184_v0  ;;  %244 = vmatmul.mubr.f32.vlgmr.msra.gmra.mxu1 %v7337_v57 }
  0x24   :  { %415 = vmatprep.subr.mxu1 %v4213_v6  ;;  %345 = vmatpush1.msra.mxu0 %v4189_v1 }
  0x25   :  { %416 = vmatpush1.msra.mxu1 %v4225_v8  ;;  %346 = vmatprep.subr.mxu0 %v4194_v2 }
  0x26   :  { %417 = vmatprep.subr.mxu1 %v4230_v9  ;;  %347 = vmatpush1.msra.mxu0 %v4202_v4 }
  0x27   :  { %418 = vmatpush1.msra.mxu1 %v4242_v11  ;;  %348 = vmatprep.subr.mxu0 %v4208_v5 }
  0x28   :  { %419 = vmatprep.subr.mxu1 %v4254_v13  ;;  %349 = vmatpush1.msra.mxu0 %v4219_v7 }
  0x29   :  { %420 = vmatpush1.msra.mxu1 %v4259_v14  ;;  %350 = vmatprep.subr.mxu0 %v4236_v10 }
  0x2a   :  { %421 = vmatprep.subr.mxu1 %v4271_v16  ;;  %351 = vmatpush1.msra.mxu0 %v4248_v12 }
  0x2b   :  { %422 = vmatpush1.msra.mxu1 %v4283_v18  ;;  %352 = vmatprep.subr.mxu0 %v4265_v15 }
  0x2c   :  { %423 = vmatprep.subr.mxu1 %v4295_v20  ;;  %353 = vmatpush1.msra.mxu0 %v4277_v17 }
  0x2d   :  { %424 = vmatpush1.msra.mxu1 %v4307_v22  ;;  %354 = vmatprep.subr.mxu0 %v4289_v19 }
  0x2e   :  { %425 = vmatprep.subr.mxu1 %v4319_v24  ;;  %355 = vmatpush1.msra.mxu0 %v4301_v21 }
  0x2f   :  { %426 = vmatpush1.msra.mxu1 %v4331_v26  ;;  %356 = vmatprep.subr.mxu0 %v4313_v23 }
  0x30   :  { %427 = vmatprep.subr.mxu1 %v4343_v28  ;;  %357 = vmatpush1.msra.mxu0 %v4325_v25 }
  0x31   :  { %428 = vmatpush1.msra.mxu1 %v4355_v30  ;;  %358 = vmatprep.subr.mxu0 %v4337_v27 }
  0x32   :  { %429 = vmatprep.subr.mxu1 %v4367_v32  ;;  %359 = vmatpush1.msra.mxu0 %v4349_v29 }
  0x33   :  { %430 = vmatpush1.msra.mxu1 %v4379_v34  ;;  %360 = vmatprep.subr.mxu0 %v4361_v31 }
  0x34   :  { %431 = vmatprep.subr.mxu1 %v4391_v36  ;;  %361 = vmatpush1.msra.mxu0 %v4373_v33 }
  0x35   :  { %432 = vmatpush1.msra.mxu1 %v4403_v38  ;;  %362 = vmatprep.subr.mxu0 %v4385_v35 }
  0x36   :  { %433 = vmatprep.subr.mxu1 %v4415_v40  ;;  %363 = vmatpush1.msra.mxu0 %v4397_v37 }
  0x37   :  { %434 = vmatpush1.msra.mxu1 %v4427_v42  ;;  %364 = vmatprep.subr.mxu0 %v4409_v39 }
  0x38   :  { %435 = vmatprep.subr.mxu1 %v4439_v44  ;;  %365 = vmatpush1.msra.mxu0 %v4421_v41 }
  0x39   :  { %436 = vmatpush1.msra.mxu1 %v4451_v46  ;;  %366 = vmatprep.subr.mxu0 %v4433_v43 }
  0x3a   :  { %437 = vmatprep.subr.mxu1 %v4463_v48  ;;  %367 = vmatpush1.msra.mxu0 %v4445_v45 }
  0x3b   :  { %438 = vmatpush1.msra.mxu1 %v4475_v50  ;;  %368 = vmatprep.subr.mxu0 %v4457_v47  ;;  %v7338_v50 = vld [vmem:[#allocation17_spill] sm:$0xff] }
  0x3c   :  { %439 = vmatprep.subr.mxu1 %v4487_v52  ;;  %369 = vmatpush1.msra.mxu0 %v4469_v49 }
  0x3d   :  { %440 = vmatpush1.msra.mxu1 %v4499_v54  ;;  %370 = vmatprep.subr.mxu0 %v4481_v51 }
  0x3e   :  { %441 = vmatprep.subr.mxu1 %v4511_v56  ;;  %371 = vmatpush1.msra.mxu0 %v4493_v53 }
  0x3f   :  { %442 = vmatpush1.msra.mxu1 %v4523_v58  ;;  %372 = vmatprep.subr.mxu0 %v4505_v55  ;;  %v43_v58 = vld [vmem:[%s7122_s0 + $0x18] sm:$0xff] }
  0x40   :  { %443 = vmatprep.subr.mxu1 %v4535_v60  ;;  %373 = vmatpush1.msra.mxu0 %v7338_v50 }
  0x41   :  { %444 = vmatpush1.msra.mxu1 %v4547_v62  ;;  %374 = vmatprep.subr.mxu0 %v4529_v59  ;;  %v40_v62 = vld [vmem:[%s7122_s0] sm:$0xff] }
  0x42   :  { %445 = vmatprep.subr.mxu1 %v4554_v63  ;;  %375 = vmatpush1.msra.mxu0 %v4541_v61  ;;  %v41_v63 = vld [vmem:[%s7122_s0 + $0x8] sm:$0xff] }
  0x43   :  { %408 = vmatprep.mubr.f32.mxu0 %v7337_v57  ;;  %446 = vmatpush1.msra.mxu1 %v4561_v3  ;;  %v42_v3 = vld [vmem:[%s7122_s0 + $0x10] sm:$0xff] }
  0x44   :  { %479 = vmatprep.mubr.f32.mxu1 %v7337_v57  ;;  %581 = vmatprep.subr.mxu0 %v4184_v0 }
  0x45   :  { %652 = vmatprep.subr.mxu1 %v4213_v6 }
  0xe2   :  { %v174_v50 = vpop.f32.mrf.mxu0 }
  0xe3   :  { %v250_v61 = vadd.f32 %v174_v50, %v40_v62  ;;  %v245_v57 = vpop.f32.mrf.mxu1 }
  0xe4   :  { %v176_v59 = vpop.f32.mrf.mxu0  ;;  %v252_v55 = vadd.f32 %v245_v57, %v42_v3 }
  0xe5   :  { %v254_v60 = vmul.f32 0.5, %v250_v61  ;;  %v251_v0 = vadd.f32 %v176_v59, %v41_v63  ;;  %v247_v53 = vpop.f32.mrf.mxu1 }
  0xe6   :  { %v253_v56 = vadd.f32 %v247_v53, %v43_v58  ;;  %v7345_v58 = vld [vmem:[#allocation16_spill] sm:$0xff] }
  0xe7   :  { %3915 = vtanh.f32 %v254_v60  ;;  %v258_v6 = vmul.f32 0.5, %v251_v0 }
  0xe8   :  { %v263_v50 = vmul.f32 0.5, %v253_v56  ;;  %v7344_v56 = vld [vmem:[#allocation11_spill] sm:$0xff] }
  0xe9   :  { %3917 = vtanh.f32 %v258_v6 }
  0xea   :  { %3919 = vtanh.f32 %v252_v55 }
  0xeb   :  { %3921 = vtanh.f32 %v263_v50  ;;  %v7346_v50 = vld [vmem:[#allocation13_spill] sm:$0xff] }
  0xf4   :  { %v3916_v62 = vpop.eup %3915 }
  0xf5   :  { %v256_v51 = vmul.f32 0.5, %v3916_v62  ;;  %v7347_v62 = vld [vmem:[#allocation18_spill] sm:$0xff] }
  0xf6   :  { %v3918_v54 = vpop.eup %3917 }
  0xf7   :  { %v257_v49 = vadd.f32 0.5, %v256_v51  ;;  %v260_v52 = vmul.f32 0.5, %v3918_v54  ;;  %v3920_v61 = vpop.eup %3919  ;;  %v7341_v51 = vld [vmem:[#allocation12_spill] sm:$0xff]  ;;  %v7343_v54 = vld [vmem:[#allocation14_spill] sm:$0xff] }
  0xf8   :  { %v3922_v6 = vpop.eup %3921 }
  0xf9   :  { %v261_v59 = vadd.f32 0.5, %v260_v52  ;;  %v268_v0 = vmul.f32 %v3920_v61, %v257_v49  ;;  %v265_v55 = vmul.f32 0.5, %v3922_v6  ;;  %v7340_v49 = vld [vmem:[#allocation10_spill] sm:$0xff]  ;;  %v7342_v52 = vld [vmem:[#allocation9_spill] sm:$0xff]  ;;  %v7348_v61 = vld [vmem:[#allocation15_spill] sm:$0xff] }
  0xfa   :  { %v7352_v6 = vld [vmem:[#allocation19_spill] sm:$0xff] }
  0xfb   :  { %v267_v60 = vmul.f32 0.0, %v261_v59  ;;  %v266_v57 = vadd.f32 0.5, %v265_v55  ;;  %v7349_v59 = vld [vmem:[#allocation20_spill] sm:$0xff]  ;;  %v7353_v55 = vld [vmem:[#allocation23_spill] sm:$0xff] }
  0xfd   :  { %v4649_v3 = vadd.f32 %v268_v0, %v267_v60  ;;  %v7350_v60 = vld [vmem:[#allocation17_spill] sm:$0xff]  ;;  %v7351_v0 = vld [vmem:[#allocation22_spill] sm:$0xff] }
  0xff   :  { %3923 = vtanh.f32 %v4649_v3 }
 0x10c   :  { %v3924_v63 = vpop.eup %3923 }
 0x10d   :  { %v4652_v53 = vmul.f32 %v3924_v63, %v266_v57  ;;  %v7354_v57 = vld [vmem:[#allocation21_spill] sm:$0xff]  ;;  %v7355_v63 = vmov 0.0  }
 0x10f   :  { %7339 = vst [vmem:[#allocation25_spill] sm:$0xff] %v4652_v53  ;;  %409 = vmatmul.mubr.f32.vlgmr.msra.gmra.mxu0 %v4652_v53  ;;  %480 = vmatmul.mubr.f32.vlgmr.msra.gmra.mxu1 %v4652_v53  ;;  %v7356_v53 = vld [vmem:[#allocation24_spill] sm:$0xff] }
 0x110   :  { %582 = vmatpush1.msra.mxu0 %v4189_v1  ;;  %653 = vmatpush1.msra.mxu1 %v4225_v8 }
 0x111   :  { %583 = vmatprep.subr.mxu0 %v4194_v2  ;;  %654 = vmatprep.subr.mxu1 %v4230_v9 }
 0x112   :  { %584 = vmatpush1.msra.mxu0 %v4202_v4  ;;  %655 = vmatpush1.msra.mxu1 %v4242_v11 }
 0x113   :  { %585 = vmatprep.subr.mxu0 %v4208_v5  ;;  %656 = vmatprep.subr.mxu1 %v4254_v13 }
 0x114   :  { %586 = vmatpush1.msra.mxu0 %v4219_v7  ;;  %657 = vmatpush1.msra.mxu1 %v4259_v14 }
 0x115   :  { %587 = vmatprep.subr.mxu0 %v4236_v10  ;;  %658 = vmatprep.subr.mxu1 %v4271_v16 }
 0x116   :  { %588 = vmatpush1.msra.mxu0 %v4248_v12  ;;  %659 = vmatpush1.msra.mxu1 %v4283_v18 }
 0x117   :  { %589 = vmatprep.subr.mxu0 %v4265_v15  ;;  %660 = vmatprep.subr.mxu1 %v4295_v20 }
 0x118   :  { %590 = vmatpush1.msra.mxu0 %v4277_v17  ;;  %661 = vmatpush1.msra.mxu1 %v4307_v22 }
 0x119   :  { %591 = vmatprep.subr.mxu0 %v4289_v19  ;;  %662 = vmatprep.subr.mxu1 %v4319_v24 }
 0x11a   :  { %592 = vmatpush1.msra.mxu0 %v4301_v21  ;;  %663 = vmatpush1.msra.mxu1 %v4331_v26 }
 0x11b   :  { %593 = vmatprep.subr.mxu0 %v4313_v23  ;;  %664 = vmatprep.subr.mxu1 %v4343_v28 }
 0x11c   :  { %594 = vmatpush1.msra.mxu0 %v4325_v25  ;;  %665 = vmatpush1.msra.mxu1 %v4355_v30 }
 0x11d   :  { %595 = vmatprep.subr.mxu0 %v4337_v27  ;;  %666 = vmatprep.subr.mxu1 %v4367_v32 }
 0x11e   :  { %596 = vmatpush1.msra.mxu0 %v4349_v29  ;;  %667 = vmatpush1.msra.mxu1 %v4379_v34 }
 0x11f   :  { %597 = vmatprep.subr.mxu0 %v4361_v31  ;;  %668 = vmatprep.subr.mxu1 %v4391_v36 }
 0x120   :  { %598 = vmatpush1.msra.mxu0 %v4373_v33  ;;  %669 = vmatpush1.msra.mxu1 %v4403_v38 }
 0x121   :  { %599 = vmatprep.subr.mxu0 %v4385_v35  ;;  %670 = vmatprep.subr.mxu1 %v4415_v40 }
 0x122   :  { %600 = vmatpush1.msra.mxu0 %v4397_v37  ;;  %671 = vmatpush1.msra.mxu1 %v4427_v42 }
 0x123   :  { %601 = vmatprep.subr.mxu0 %v4409_v39  ;;  %672 = vmatprep.subr.mxu1 %v4439_v44 }
 0x124   :  { %602 = vmatpush1.msra.mxu0 %v4421_v41  ;;  %673 = vmatpush1.msra.mxu1 %v4451_v46 }
 0x125   :  { %603 = vmatprep.subr.mxu0 %v4433_v43  ;;  %674 = vmatprep.subr.mxu1 %v4463_v48 }
 0x126   :  { %604 = vmatpush1.msra.mxu0 %v4445_v45  ;;  %675 = vmatpush1.msra.mxu1 %v7340_v49 }
 0x127   :  { %605 = vmatprep.subr.mxu0 %v4457_v47  ;;  %676 = vmatprep.subr.mxu1 %v7341_v51 }
 0x128   :  { %606 = vmatpush1.msra.mxu0 %v7342_v52  ;;  %677 = vmatpush1.msra.mxu1 %v7343_v54 }
 0x129   :  { %607 = vmatprep.subr.mxu0 %v7344_v56  ;;  %678 = vmatprep.subr.mxu1 %v7345_v58  ;;  %v3835_v58 = vld [vmem:[%s7122_s0 + $0x38] sm:$0xff] }
 0x12a   :  { %608 = vmatpush1.msra.mxu0 %v7346_v50  ;;  %679 = vmatpush1.msra.mxu1 %v7347_v62  ;;  %v7357_v62 = vld [vmem:[#allocation6_spill] sm:$0xff] }
 0x12b   :  { %609 = vmatprep.subr.mxu0 %v7348_v61  ;;  %680 = vmatprep.subr.mxu1 %v7349_v59  ;;  %v7358_v61 = vld [vmem:[#allocation7_spill] sm:$0xff] }
 0x12c   :  { %610 = vmatpush1.msra.mxu0 %v7350_v60  ;;  %681 = vmatpush1.msra.mxu1 %v7351_v0  ;;  %v3832_v0 = vld [vmem:[%s7122_s0 + $0x20] sm:$0xff] }
 0x12d   :  { %611 = vmatprep.subr.mxu0 %v7352_v6  ;;  %682 = vmatprep.subr.mxu1 %v7353_v55  ;;  %v3833_v55 = vld [vmem:[%s7122_s0 + $0x28] sm:$0xff] }
 0x12e   :  { %612 = vmatpush1.msra.mxu0 %v7354_v57  ;;  %645 = vmatprep.mubr.f32.mxu0 %v7355_v63 }
 0x12f   :  { %683 = vmatpush1.msra.mxu1 %v7356_v53  ;;  %716 = vmatprep.mubr.f32.mxu1 %v7355_v63  ;;  %v3834_v53 = vld [vmem:[%s7122_s0 + $0x30] sm:$0xff] }
 0x130   :  { %818 = vmatprep.subr.mxu0 %v7357_v62  ;;  %889 = vmatprep.subr.mxu1 %v7358_v61 }
 0x1cf   :  { %v410_v60 = vpop.f32.mrf.mxu0  ;;  %v481_v62 = vpop.f32.mrf.mxu1 }
 0x1d0   :  { %v486_v57 = vadd.f32 %v3832_v0, %v410_v60  ;;  %v488_v63 = vadd.f32 %v3834_v53, %v481_v62 }
 0x1d1   :  { %v412_v6 = vpop.f32.mrf.mxu0  ;;  %v483_v56 = vpop.f32.mrf.mxu1 }
 0x1d2   :  { %v490_v59 = vmul.f32 0.5, %v486_v57  ;;  %v487_v50 = vadd.f32 %v3833_v55, %v412_v6  ;;  %v489_v54 = vadd.f32 %v3835_v58, %v483_v56  ;;  %v4848_v58 = vld [vmem:[%s7121_s1 + $0x1f0] sm:$0xff] }
 0x1d4   :  { %3925 = vtanh.f32 %v490_v59  ;;  %v494_v61 = vmul.f32 0.5, %v487_v50  ;;  %v499_v60 = vmul.f32 0.5, %v489_v54 }
 0x1d6   :  { %3927 = vtanh.f32 %v494_v61 }
 0x1d7   :  { %3929 = vtanh.f32 %v488_v63 }
 0x1d8   :  { %3931 = vtanh.f32 %v499_v60  ;;  %v4855_v60 = vld [vmem:[%s7121_s1 + $0x1c8] sm:$0xff] }
 0x1e1   :  { %v3926_v0 = vpop.eup %3925 }
 0x1e2   :  { %v492_v57 = vmul.f32 0.5, %v3926_v0  ;;  %v4860_v0 = vld [vmem:[%s7121_s1 + $0x1d8] sm:$0xff] }
 0x1e3   :  { %v3928_v6 = vpop.eup %3927 }
 0x1e4   :  { %v493_v55 = vadd.f32 0.5, %v492_v57  ;;  %v496_v52 = vmul.f32 0.5, %v3928_v6  ;;  %v3930_v47 = vpop.eup %3929  ;;  %v4867_v57 = vld [vmem:[%s7121_s1 + $0x1c0] sm:$0xff]  ;;  %v4872_v6 = vld [vmem:[%s7121_s1 + $0x1d0] sm:$0xff] }
 0x1e5   :  { %v3932_v62 = vpop.eup %3931 }
 0x1e6   :  { %v497_v51 = vadd.f32 0.5, %v496_v52  ;;  %v504_v53 = vmul.f32 %v3930_v47, %v493_v55  ;;  %v501_v61 = vmul.f32 0.5, %v3932_v62  ;;  %v4843_v52 = vld [vmem:[%s7121_s1 + $0x1e0] sm:$0xff]  ;;  %v4879_v55 = vld [vmem:[%s7121_s1 + $0x1a8] sm:$0xff] }
 0x1e7   :  { %v4903_v62 = vld [vmem:[%s7121_s1 + $0x188] sm:$0xff] }
 0x1e8   :  { %v503_v50 = vmul.f32 %v497_v51, %v4649_v3  ;;  %v502_v63 = vadd.f32 0.5, %v501_v61  ;;  %v4836_v51 = vld [vmem:[%s7121_s1 + $0x1f8] sm:$0xff] }
 0x1e9   :  { %v4908_v61 = vld [vmem:[%s7121_s1 + $0x198] sm:$0xff] }
 0x1ea   :  { %v4735_v59 = vadd.f32 %v504_v53, %v503_v50  ;;  %v4884_v50 = vld [vmem:[%s7121_s1 + $0x1b8] sm:$0xff]  ;;  %v4891_v53 = vld [vmem:[%s7121_s1 + $0x1a0] sm:$0xff] }
 0x1ec   :  { %3933 = vtanh.f32 %v4735_v59 }
 0x1f9   :  { %v3934_v56 = vpop.eup %3933 }
 0x1fa   :  { %v4738_v54 = vmul.f32 %v3934_v56, %v502_v63  ;;  %v4915_v63 = vld [vmem:[%s7121_s1 + $0x180] sm:$0xff]  ;;  %v4920_v56 = vld [vmem:[%s7121_s1 + $0x190] sm:$0xff] }
 0x1fc   :  { %7359 = vst [vmem:[#allocation10_spill] sm:$0xff] %v4738_v54  ;;  %646 = vmatmul.mubr.f32.vlgmr.msra.gmra.mxu0 %v4738_v54  ;;  %717 = vmatmul.mubr.f32.vlgmr.msra.gmra.mxu1 %v4738_v54  ;;  %v5192_v54 = vld [vmem:[%s7121_s1 + $0x18] sm:$0xff] }
 0x1fd   :  { %819 = vmatpush1.msra.mxu0 %v4189_v1  ;;  %890 = vmatpush1.msra.mxu1 %v4225_v8  ;;  %v7360_v1 = vld [vmem:[#allocation8_spill] sm:$0xff] }
 0x1fe   :  { %820 = vmatprep.subr.mxu0 %v4194_v2  ;;  %891 = vmatprep.subr.mxu1 %v4230_v9  ;;  %v7361_v2 = vld [vmem:[#allocation12_spill] sm:$0xff]  ;;  %v7366_v9 = vld [vmem:[#allocation13_spill] sm:$0xff]  ;;  %7379 = vst [vmem:[#allocation8_spill] sm:$0xff] %v4836_v51 }
 0x1ff   :  { %821 = vmatpush1.msra.mxu0 %v4202_v4  ;;  %892 = vmatpush1.msra.mxu1 %v4242_v11  ;;  %v7362_v4 = vld [vmem:[#allocation9_spill] sm:$0xff]  ;;  %v7365_v8 = vld [vmem:[#allocation16_spill] sm:$0xff]  ;;  %v7368_v11 = vld [vmem:[#allocation15_spill] sm:$0xff] }
 0x200   :  { %822 = vmatprep.subr.mxu0 %v4208_v5  ;;  %893 = vmatprep.subr.mxu1 %v4254_v13  ;;  %v7363_v5 = vld [vmem:[#allocation14_spill] sm:$0xff]  ;;  %v7370_v13 = vld [vmem:[#allocation17_spill] sm:$0xff] }
 0x201   :  { %823 = vmatpush1.msra.mxu0 %v4219_v7  ;;  %894 = vmatpush1.msra.mxu1 %v4259_v14  ;;  %v7364_v7 = vld [vmem:[#allocation11_spill] sm:$0xff]  ;;  %v7371_v14 = vld [vmem:[#allocation22_spill] sm:$0xff] }
 0x202   :  { %824 = vmatprep.subr.mxu0 %v4236_v10  ;;  %895 = vmatprep.subr.mxu1 %v4271_v16  ;;  %v7367_v10 = vld [vmem:[#allocation18_spill] sm:$0xff]  ;;  %v7373_v16 = vld [vmem:[#allocation23_spill] sm:$0xff] }
 0x203   :  { %825 = vmatpush1.msra.mxu0 %v4248_v12  ;;  %896 = vmatpush1.msra.mxu1 %v4283_v18  ;;  %v7369_v12 = vld [vmem:[#allocation20_spill] sm:$0xff]  ;;  %v7375_v18 = vmov 0.0  }
 0x204   :  { %826 = vmatprep.subr.mxu0 %v4265_v15  ;;  %897 = vmatprep.subr.mxu1 %v4295_v20  ;;  %v7372_v15 = vld [vmem:[#allocation19_spill] sm:$0xff]  ;;  %v3836_v20 = vld [vmem:[%s7122_s0 + $0x40] sm:$0xff] }
 0x205   :  { %827 = vmatpush1.msra.mxu0 %v4277_v17  ;;  %898 = vmatpush1.msra.mxu1 %v4307_v22  ;;  %v7374_v17 = vld [vmem:[#allocation21_spill] sm:$0xff]  ;;  %v3837_v22 = vld [vmem:[%s7122_s0 + $0x48] sm:$0xff] }
 0x206   :  { %828 = vmatprep.subr.mxu0 %v4289_v19  ;;  %899 = vmatprep.subr.mxu1 %v4319_v24  ;;  %v7376_v19 = vld [vmem:[#allocation24_spill] sm:$0xff]  ;;  %7393 = vst [vmem:[#allocation21_spill] sm:$0xff] %v5192_v54 }
 0x207   :  { %829 = vmatpush1.msra.mxu0 %v4301_v21  ;;  %900 = vmatpush1.msra.mxu1 %v4331_v26 }
 0x208   :  { %830 = vmatprep.subr.mxu0 %v4313_v23  ;;  %901 = vmatprep.subr.mxu1 %v4343_v28 }
 0x209   :  { %831 = vmatpush1.msra.mxu0 %v4325_v25  ;;  %902 = vmatpush1.msra.mxu1 %v4355_v30 }
 0x20a   :  { %832 = vmatprep.subr.mxu0 %v4337_v27  ;;  %903 = vmatprep.subr.mxu1 %v4367_v32  ;;  %v3838_v27 = vld [vmem:[%s7122_s0 + $0x50] sm:$0xff] }
 0x20b   :  { %833 = vmatpush1.msra.mxu0 %v4349_v29  ;;  %904 = vmatpush1.msra.mxu1 %v4379_v34 }
 0x20c   :  { %834 = vmatprep.subr.mxu0 %v4361_v31  ;;  %905 = vmatprep.subr.mxu1 %v4391_v36  ;;  %v3839_v31 = vld [vmem:[%s7122_s0 + $0x58] sm:$0xff] }
 0x20d   :  { %835 = vmatpush1.msra.mxu0 %v4373_v33  ;;  %906 = vmatpush1.msra.mxu1 %v4403_v38 }
 0x20e   :  { %836 = vmatprep.subr.mxu0 %v4385_v35  ;;  %907 = vmatprep.subr.mxu1 %v4415_v40 }
 0x20f   :  { %837 = vmatpush1.msra.mxu0 %v4397_v37  ;;  %908 = vmatpush1.msra.mxu1 %v4427_v42 }
 0x210   :  { %838 = vmatprep.subr.mxu0 %v4409_v39  ;;  %909 = vmatprep.subr.mxu1 %v4439_v44 }
 0x211   :  { %839 = vmatpush1.msra.mxu0 %v4421_v41  ;;  %910 = vmatpush1.msra.mxu1 %v4451_v46 }
 0x212   :  { %840 = vmatprep.subr.mxu0 %v4433_v43  ;;  %911 = vmatprep.subr.mxu1 %v4463_v48 }
 0x213   :  { %841 = vmatpush1.msra.mxu0 %v4445_v45  ;;  %912 = vmatpush1.msra.mxu1 %v7340_v49  ;;  %v4831_v49 = vld [vmem:[%s7121_s1 + $0x1e8] sm:$0xff] }
 0x214   :  { %842 = vmatprep.subr.mxu0 %v7360_v1  ;;  %913 = vmatprep.subr.mxu1 %v7361_v2  ;;  %7378 = vst [vmem:[#allocation7_spill] sm:$0xff] %v4831_v49  ;;  %v4927_v1 = vld [vmem:[%s7121_s1 + $0x168] sm:$0xff]  ;;  %v4932_v2 = vld [vmem:[%s7121_s1 + $0x178] sm:$0xff] }
 0x215   :  { %843 = vmatpush1.msra.mxu0 %v7362_v4  ;;  %914 = vmatpush1.msra.mxu1 %v7363_v5  ;;  %v4939_v4 = vld [vmem:[%s7121_s1 + $0x160] sm:$0xff]  ;;  %v4944_v5 = vld [vmem:[%s7121_s1 + $0x170] sm:$0xff] }
 0x216   :  { %844 = vmatprep.subr.mxu0 %v7364_v7  ;;  %915 = vmatprep.subr.mxu1 %v7365_v8  ;;  %v4951_v7 = vld [vmem:[%s7121_s1 + $0x148] sm:$0xff]  ;;  %v4956_v8 = vld [vmem:[%s7121_s1 + $0x158] sm:$0xff] }
 0x217   :  { %845 = vmatpush1.msra.mxu0 %v7366_v9  ;;  %916 = vmatpush1.msra.mxu1 %v7367_v10  ;;  %v4963_v9 = vld [vmem:[%s7121_s1 + $0x140] sm:$0xff]  ;;  %v4968_v10 = vld [vmem:[%s7121_s1 + $0x150] sm:$0xff] }
 0x218   :  { %846 = vmatprep.subr.mxu0 %v7368_v11  ;;  %917 = vmatprep.subr.mxu1 %v7369_v12  ;;  %v4975_v11 = vld [vmem:[%s7121_s1 + $0x128] sm:$0xff]  ;;  %v4980_v12 = vld [vmem:[%s7121_s1 + $0x138] sm:$0xff] }
 0x219   :  { %847 = vmatpush1.msra.mxu0 %v7370_v13  ;;  %918 = vmatpush1.msra.mxu1 %v7371_v14  ;;  %v4987_v13 = vld [vmem:[%s7121_s1 + $0x120] sm:$0xff]  ;;  %v4992_v14 = vld [vmem:[%s7121_s1 + $0x130] sm:$0xff] }
 0x21a   :  { %848 = vmatprep.subr.mxu0 %v7372_v15  ;;  %919 = vmatprep.subr.mxu1 %v7373_v16  ;;  %v4999_v15 = vld [vmem:[%s7121_s1 + $0x108] sm:$0xff]  ;;  %v5004_v16 = vld [vmem:[%s7121_s1 + $0x118] sm:$0xff] }
 0x21b   :  { %849 = vmatpush1.msra.mxu0 %v7374_v17  ;;  %882 = vmatprep.mubr.f32.mxu0 %v7375_v18  ;;  %v5011_v17 = vld [vmem:[%s7121_s1 + $0x100] sm:$0xff] }
 0x21c   :  { %920 = vmatpush1.msra.mxu1 %v7376_v19  ;;  %953 = vmatprep.mubr.f32.mxu1 %v7375_v18  ;;  %v5016_v19 = vld [vmem:[%s7121_s1 + $0x110] sm:$0xff] }
 0x21d   :  { %1055 = vmatprep.subr.mxu0 %v4831_v49  ;;  %1126 = vmatprep.subr.mxu1 %v4836_v51 }
 0x2bc   :  { %v647_v21 = vpop.f32.mrf.mxu0  ;;  %v718_v28 = vpop.f32.mrf.mxu1 }
 0x2bd   :  { %v723_v23 = vadd.f32 %v3836_v20, %v647_v21  ;;  %v725_v30 = vadd.f32 %v3838_v27, %v718_v28  ;;  %v5023_v20 = vld [vmem:[%s7121_s1 + $0xe8] sm:$0xff]  ;;  %v5028_v21 = vld [vmem:[%s7121_s1 + $0xf8] sm:$0xff]  ;;  %v5062_v27 = vld [vmem:[%s7121_s1 + $0xd0] sm:$0xff] }
 0x2be   :  { %v649_v24 = vpop.f32.mrf.mxu0  ;;  %v720_v32 = vpop.f32.mrf.mxu1  ;;  %v5067_v28 = vld [vmem:[%s7121_s1 + $0xa8] sm:$0xff] }
 0x2bf   :  { %v727_v25 = vmul.f32 0.5, %v723_v23  ;;  %v724_v26 = vadd.f32 %v3837_v22, %v649_v24  ;;  %v726_v33 = vadd.f32 %v3839_v31, %v720_v32  ;;  %v5033_v22 = vld [vmem:[%s7121_s1 + $0xe0] sm:$0xff]  ;;  %v5040_v23 = vld [vmem:[%s7121_s1 + $0xf0] sm:$0xff]  ;;  %v5045_v24 = vld [vmem:[%s7121_s1 + $0xc8] sm:$0xff] }
 0x2c0   :  { %v5084_v31 = vld [vmem:[%s7121_s1 + $0xb0] sm:$0xff]  ;;  %v5091_v32 = vld [vmem:[%s7121_s1 + $0x88] sm:$0xff] }
 0x2c1   :  { %3935 = vtanh.f32 %v727_v25  ;;  %v731_v29 = vmul.f32 0.5, %v724_v26  ;;  %v736_v34 = vmul.f32 0.5, %v726_v33  ;;  %v5050_v25 = vld [vmem:[%s7121_s1 + $0xd8] sm:$0xff]  ;;  %v5057_v26 = vld [vmem:[%s7121_s1 + $0xc0] sm:$0xff] }
 0x2c2   :  { %v5096_v33 = vld [vmem:[%s7121_s1 + $0x98] sm:$0xff] }
 0x2c3   :  { %3937 = vtanh.f32 %v731_v29  ;;  %v5074_v29 = vld [vmem:[%s7121_s1 + $0xb8] sm:$0xff] }
 0x2c4   :  { %3939 = vtanh.f32 %v725_v30  ;;  %v5079_v30 = vld [vmem:[%s7121_s1 + $0xa0] sm:$0xff] }
 0x2c5   :  { %3941 = vtanh.f32 %v736_v34  ;;  %v5103_v34 = vld [vmem:[%s7121_s1 + $0x80] sm:$0xff] }
 0x2ce   :  { %v3936_v35 = vpop.eup %3935 }
 0x2cf   :  { %v729_v36 = vmul.f32 0.5, %v3936_v35  ;;  %v5108_v35 = vld [vmem:[%s7121_s1 + $0x90] sm:$0xff] }
 0x2d0   :  { %v3938_v37 = vpop.eup %3937 }
 0x2d1   :  { %v730_v38 = vadd.f32 0.5, %v729_v36  ;;  %v733_v39 = vmul.f32 0.5, %v3938_v37  ;;  %v3940_v41 = vpop.eup %3939  ;;  %v5115_v36 = vld [vmem:[%s7121_s1 + $0x68] sm:$0xff]  ;;  %v5120_v37 = vld [vmem:[%s7121_s1 + $0x78] sm:$0xff] }
 0x2d2   :  { %v3942_v45 = vpop.eup %3941  ;;  %7380 = vst [vmem:[#allocation12_spill] sm:$0xff] %v5115_v36  ;;  %7381 = vst [vmem:[#allocation9_spill] sm:$0xff] %v5120_v37 }
 0x2d3   :  { %v734_v40 = vadd.f32 0.5, %v733_v39  ;;  %v741_v43 = vmul.f32 %v3940_v41, %v730_v38  ;;  %v738_v46 = vmul.f32 0.5, %v3942_v45  ;;  %v5127_v38 = vld [vmem:[%s7121_s1 + $0x60] sm:$0xff]  ;;  %v5132_v39 = vld [vmem:[%s7121_s1 + $0x70] sm:$0xff]  ;;  %v5144_v41 = vld [vmem:[%s7121_s1 + $0x58] sm:$0xff] }
 0x2d4   :  { %7382 = vst [vmem:[#allocation14_spill] sm:$0xff] %v5127_v38  ;;  %7383 = vst [vmem:[#allocation11_spill] sm:$0xff] %v5132_v39  ;;  %v5163_v45 = vld [vmem:[%s7121_s1 + $0x28] sm:$0xff] }
 0x2d5   :  { %v740_v42 = vmul.f32 %v734_v40, %v4735_v59  ;;  %v739_v47 = vadd.f32 0.5, %v738_v46  ;;  %v4896_v59 = vld [vmem:[%s7121_s1 + $0x1b0] sm:$0xff]  ;;  %v5139_v40 = vld [vmem:[%s7121_s1 + $0x48] sm:$0xff]  ;;  %7385 = vst [vmem:[#allocation13_spill] sm:$0xff] %v5144_v41  ;;  %7388 = vst [vmem:[#allocation20_spill] sm:$0xff] %v5163_v45 }
 0x2d6   :  { %7384 = vst [vmem:[#allocation16_spill] sm:$0xff] %v5139_v40  ;;  %v5168_v46 = vld [vmem:[%s7121_s1 + $0x38] sm:$0xff] }
 0x2d7   :  { %v4819_v44 = vadd.f32 %v741_v43, %v740_v42  ;;  %v5151_v42 = vld [vmem:[%s7121_s1 + $0x40] sm:$0xff]  ;;  %v5156_v43 = vld [vmem:[%s7121_s1 + $0x50] sm:$0xff]  ;;  %7389 = vst [vmem:[#allocation17_spill] sm:$0xff] %v5168_v46 }
 0x2d8   :  { %7386 = vst [vmem:[#allocation18_spill] sm:$0xff] %v5151_v42  ;;  %7387 = vst [vmem:[#allocation15_spill] sm:$0xff] %v5156_v43 }
 0x2d9   :  { %3943 = vtanh.f32 %v4819_v44 }
 0x2e6   :  { %v3944_v48 = vpop.eup %3943 }
 0x2e7   :  { %v4822_v3 = vmul.f32 %v3944_v48, %v739_v47  ;;  %v5175_v47 = vld [vmem:[%s7121_s1 + $0x20] sm:$0xff]  ;;  %v5180_v48 = vld [vmem:[%s7121_s1 + $0x30] sm:$0xff] }
 0x2e8   :  { %7390 = vst [vmem:[#allocation22_spill] sm:$0xff] %v5175_v47  ;;  %7391 = vst [vmem:[#allocation19_spill] sm:$0xff] %v5180_v48 }
 0x2e9   :  { %7377 = vst [vmem:[#allocation6_spill] sm:$0xff] %v4822_v3  ;;  %883 = vmatmul.mubr.f32.vlgmr.msra.gmra.mxu0 %v4822_v3  ;;  %954 = vmatmul.mubr.f32.vlgmr.msra.gmra.mxu1 %v4822_v3  ;;  %v5187_v3 = vld [vmem:[%s7121_s1 + $0x8] sm:$0xff] }
 0x2ea   :  { %1119 = vmatprep.mubr.f32.mxu0 %v7375_v18  ;;  %1190 = vmatprep.mubr.f32.mxu1 %v7375_v18  ;;  %7392 = vst [vmem:[#allocation23_spill] sm:$0xff] %v5187_v3  ;;  %v5199_v18 = vld [vmem:[%s7121_s1] sm:$0xff] }
 0x2eb   :  { %1056 = vmatpush1.msra.mxu0 %v4843_v52  ;;  %1127 = vmatpush1.msra.mxu1 %v4848_v58  ;;  %7394 = vst [vmem:[#allocation24_spill] sm:$0xff] %v5199_v18 }
 0x2ec   :  { %1057 = vmatprep.subr.mxu0 %v4855_v60  ;;  %1128 = vmatprep.subr.mxu1 %v4860_v0 }
 0x2ed   :  { %1058 = vmatpush1.msra.mxu0 %v4867_v57  ;;  %1129 = vmatpush1.msra.mxu1 %v4872_v6 }
 0x2ee   :  { %1059 = vmatprep.subr.mxu0 %v4879_v55  ;;  %1130 = vmatprep.subr.mxu1 %v4884_v50 }
 0x2ef   :  { %1060 = vmatpush1.msra.mxu0 %v4891_v53  ;;  %1131 = vmatpush1.msra.mxu1 %v4896_v59 }
 0x2f0   :  { %1061 = vmatprep.subr.mxu0 %v4903_v62  ;;  %1132 = vmatprep.subr.mxu1 %v4908_v61 }
 0x2f1   :  { %1062 = vmatpush1.msra.mxu0 %v4915_v63  ;;  %1133 = vmatpush1.msra.mxu1 %v4920_v56 }
 0x2f2   :  { %1063 = vmatprep.subr.mxu0 %v4927_v1  ;;  %1134 = vmatprep.subr.mxu1 %v4932_v2 }
 0x2f3   :  { %1064 = vmatpush1.msra.mxu0 %v4939_v4  ;;  %1135 = vmatpush1.msra.mxu1 %v4944_v5 }
 0x2f4   :  { %1065 = vmatprep.subr.mxu0 %v4951_v7  ;;  %1136 = vmatprep.subr.mxu1 %v4956_v8 }
 0x2f5   :  { %1066 = vmatpush1.msra.mxu0 %v4963_v9  ;;  %1137 = vmatpush1.msra.mxu1 %v4968_v10 }
 0x2f6   :  { %1067 = vmatprep.subr.mxu0 %v4975_v11  ;;  %1138 = vmatprep.subr.mxu1 %v4980_v12 }
 0x2f7   :  { %1068 = vmatpush1.msra.mxu0 %v4987_v13  ;;  %1139 = vmatpush1.msra.mxu1 %v4992_v14 }
 0x2f8   :  { %1069 = vmatprep.subr.mxu0 %v4999_v15  ;;  %1140 = vmatprep.subr.mxu1 %v5004_v16 }
 0x2f9   :  { %1070 = vmatpush1.msra.mxu0 %v5011_v17  ;;  %1141 = vmatpush1.msra.mxu1 %v5016_v19 }
 0x2fa   :  { %1071 = vmatprep.subr.mxu0 %v5023_v20  ;;  %1142 = vmatprep.subr.mxu1 %v5028_v21 }
 0x2fb   :  { %1072 = vmatpush1.msra.mxu0 %v5033_v22  ;;  %1143 = vmatpush1.msra.mxu1 %v5040_v23 }
 0x2fc   :  { %1073 = vmatprep.subr.mxu0 %v5045_v24  ;;  %1144 = vmatprep.subr.mxu1 %v5050_v25 }
 0x2fd   :  { %1074 = vmatpush1.msra.mxu0 %v5057_v26  ;;  %1145 = vmatpush1.msra.mxu1 %v5062_v27 }
 0x2fe   :  { %1075 = vmatprep.subr.mxu0 %v5067_v28  ;;  %1146 = vmatprep.subr.mxu1 %v5074_v29 }
 0x2ff   :  { %1076 = vmatpush1.msra.mxu0 %v5079_v30  ;;  %1147 = vmatpush1.msra.mxu1 %v5084_v31 }
 0x300   :  { %1077 = vmatprep.subr.mxu0 %v5091_v32  ;;  %1148 = vmatprep.subr.mxu1 %v5096_v33 }
 0x301   :  { %1078 = vmatpush1.msra.mxu0 %v5103_v34  ;;  %1149 = vmatpush1.msra.mxu1 %v5108_v35 }
 0x302   :  { %1079 = vmatprep.subr.mxu0 %v5115_v36  ;;  %1150 = vmatprep.subr.mxu1 %v5120_v37 }
 0x303   :  { %1080 = vmatpush1.msra.mxu0 %v5127_v38  ;;  %1151 = vmatpush1.msra.mxu1 %v5132_v39 }
 0x304   :  { %1081 = vmatprep.subr.mxu0 %v5139_v40  ;;  %1152 = vmatprep.subr.mxu1 %v5144_v41  ;;  %v3843_v41 = vld [vmem:[%s7122_s0 + $0x78] sm:$0xff] }
 0x305   :  { %1082 = vmatpush1.msra.mxu0 %v5151_v42  ;;  %1153 = vmatpush1.msra.mxu1 %v5156_v43  ;;  %v5204_v43 = vld [vmem:[%s7121_s1 + $0x10] sm:$0xff] }
 0x306   :  { %1083 = vmatprep.subr.mxu0 %v5163_v45  ;;  %1154 = vmatprep.subr.mxu1 %v5168_v46  ;;  %7395 = vst [vmem:[#allocation26_spill] sm:$0xff] %v5204_v43  ;;  %v3840_v46 = vld [vmem:[%s7122_s0 + $0x60] sm:$0xff] }
 0x307   :  { %1084 = vmatpush1.msra.mxu0 %v5175_v47  ;;  %1155 = vmatpush1.msra.mxu1 %v5180_v48  ;;  %v3841_v48 = vld [vmem:[%s7122_s0 + $0x68] sm:$0xff] }
 0x308   :  { %1085 = vmatprep.subr.mxu0 %v5187_v3  ;;  %1156 = vmatprep.subr.mxu1 %v5192_v54 }
 0x309   :  { %1086 = vmatpush1.msra.mxu0 %v5199_v18  ;;  %1157 = vmatpush1.msra.mxu1 %v5204_v43  ;;  %v3842_v43 = vld [vmem:[%s7122_s0 + $0x70] sm:$0xff] }
 0x30a   :  { %1292 = vmatprep.subr.mxu0 %v4831_v49  ;;  %1363 = vmatprep.subr.mxu1 %v4836_v51 }
 0x3a9   :  { %v884_v45 = vpop.f32.mrf.mxu0  ;;  %v955_v49 = vpop.f32.mrf.mxu1 }
 0x3aa   :  { %v960_v3 = vadd.f32 %v3840_v46, %v884_v45  ;;  %v962_v18 = vadd.f32 %v3842_v43, %v955_v49 }
 0x3ab   :  { %v886_v47 = vpop.f32.mrf.mxu0  ;;  %v957_v40 = vpop.f32.mrf.mxu1 }
 0x3ac   :  { %v964_v54 = vmul.f32 0.5, %v960_v3  ;;  %v961_v42 = vadd.f32 %v3841_v48, %v886_v47  ;;  %v963_v39 = vadd.f32 %v3843_v41, %v957_v40  ;;  %v7401_v41 = vld [vmem:[#allocation16_spill] sm:$0xff] }
 0x3ae   :  { %3945 = vtanh.f32 %v964_v54  ;;  %v968_v51 = vmul.f32 0.5, %v961_v42  ;;  %v973_v45 = vmul.f32 0.5, %v963_v39 }
 0x3b0   :  { %3947 = vtanh.f32 %v968_v51 }
 0x3b1   :  { %3949 = vtanh.f32 %v962_v18 }
 0x3b2   :  { %3951 = vtanh.f32 %v973_v45  ;;  %v7402_v45 = vld [vmem:[#allocation13_spill] sm:$0xff] }
 0x3bb   :  { %v3946_v46 = vpop.eup %3945 }
 0x3bc   :  { %v966_v3 = vmul.f32 0.5, %v3946_v46  ;;  %v7403_v46 = vld [vmem:[#allocation18_spill] sm:$0xff] }
 0x3bd   :  { %v3948_v47 = vpop.eup %3947 }
 0x3be   :  { %v967_v48 = vadd.f32 0.5, %v966_v3  ;;  %v970_v38 = vmul.f32 0.5, %v3948_v47  ;;  %v3950_v36 = vpop.eup %3949  ;;  %v7404_v3 = vld [vmem:[#allocation15_spill] sm:$0xff]  ;;  %v7405_v47 = vld [vmem:[#allocation20_spill] sm:$0xff] }
 0x3bf   :  { %v3952_v42 = vpop.eup %3951 }
 0x3c0   :  { %v971_v37 = vadd.f32 0.5, %v970_v38  ;;  %v978_v49 = vmul.f32 %v3950_v36, %v967_v48  ;;  %v975_v43 = vmul.f32 0.5, %v3952_v42  ;;  %v7398_v36 = vld [vmem:[#allocation9_spill] sm:$0xff]  ;;  %v7400_v38 = vld [vmem:[#allocation11_spill] sm:$0xff] }
 0x3c1   :  { %v7406_v48 = vld [vmem:[#allocation17_spill] sm:$0xff]  ;;  %v7409_v42 = vld [vmem:[#allocation23_spill] sm:$0xff] }
 0x3c2   :  { %v977_v54 = vmul.f32 %v971_v37, %v4819_v44  ;;  %v976_v18 = vadd.f32 0.5, %v975_v43  ;;  %v7397_v44 = vld [vmem:[#allocation12_spill] sm:$0xff]  ;;  %v7399_v37 = vld [vmem:[#allocation14_spill] sm:$0xff]  ;;  %v7410_v43 = vld [vmem:[#allocation21_spill] sm:$0xff] }
 0x3c4   :  { %v5227_v51 = vadd.f32 %v978_v49, %v977_v54  ;;  %v7407_v54 = vld [vmem:[#allocation22_spill] sm:$0xff]  ;;  %v7408_v49 = vld [vmem:[#allocation19_spill] sm:$0xff] }
 0x3c6   :  { %3953 = vtanh.f32 %v5227_v51 }
 0x3d3   :  { %v3954_v40 = vpop.eup %3953 }
 0x3d4   :  { %v5230_v39 = vmul.f32 %v3954_v40, %v976_v18  ;;  %v7411_v18 = vld [vmem:[#allocation24_spill] sm:$0xff]  ;;  %v7412_v40 = vmov 0.0  }
 0x3d6   :  { %7396 = vst [vmem:[#allocation27_spill] sm:$0xff] %v5230_v39  ;;  %1120 = vmatmul.mubr.f32.vlgmr.msra.gmra.mxu0 %v5230_v39  ;;  %1191 = vmatmul.mubr.f32.vlgmr.msra.gmra.mxu1 %v5230_v39  ;;  %v7413_v39 = vld [vmem:[#allocation26_spill] sm:$0xff] }
 0x3d7   :  { %1293 = vmatpush1.msra.mxu0 %v4843_v52  ;;  %1364 = vmatpush1.msra.mxu1 %v4848_v58 }
 0x3d8   :  { %1294 = vmatprep.subr.mxu0 %v4855_v60  ;;  %1365 = vmatprep.subr.mxu1 %v4860_v0 }
 0x3d9   :  { %1295 = vmatpush1.msra.mxu0 %v4867_v57  ;;  %1366 = vmatpush1.msra.mxu1 %v4872_v6 }
 0x3da   :  { %1296 = vmatprep.subr.mxu0 %v4879_v55  ;;  %1367 = vmatprep.subr.mxu1 %v4884_v50 }
 0x3db   :  { %1297 = vmatpush1.msra.mxu0 %v4891_v53  ;;  %1368 = vmatpush1.msra.mxu1 %v4896_v59 }
 0x3dc   :  { %1298 = vmatprep.subr.mxu0 %v4903_v62  ;;  %1369 = vmatprep.subr.mxu1 %v4908_v61 }
 0x3dd   :  { %1299 = vmatpush1.msra.mxu0 %v4915_v63  ;;  %1370 = vmatpush1.msra.mxu1 %v4920_v56 }
 0x3de   :  { %1300 = vmatprep.subr.mxu0 %v4927_v1  ;;  %1371 = vmatprep.subr.mxu1 %v4932_v2 }
 0x3df   :  { %1301 = vmatpush1.msra.mxu0 %v4939_v4  ;;  %1372 = vmatpush1.msra.mxu1 %v4944_v5 }
 0x3e0   :  { %1302 = vmatprep.subr.mxu0 %v4951_v7  ;;  %1373 = vmatprep.subr.mxu1 %v4956_v8 }
 0x3e1   :  { %1303 = vmatpush1.msra.mxu0 %v4963_v9  ;;  %1374 = vmatpush1.msra.mxu1 %v4968_v10 }
 0x3e2   :  { %1304 = vmatprep.subr.mxu0 %v4975_v11  ;;  %1375 = vmatprep.subr.mxu1 %v4980_v12 }
 0x3e3   :  { %1305 = vmatpush1.msra.mxu0 %v4987_v13  ;;  %1376 = vmatpush1.msra.mxu1 %v4992_v14 }
 0x3e4   :  { %1306 = vmatprep.subr.mxu0 %v4999_v15  ;;  %1377 = vmatprep.subr.mxu1 %v5004_v16 }
 0x3e5   :  { %1307 = vmatpush1.msra.mxu0 %v5011_v17  ;;  %1378 = vmatpush1.msra.mxu1 %v5016_v19 }
 0x3e6   :  { %1308 = vmatprep.subr.mxu0 %v5023_v20  ;;  %1379 = vmatprep.subr.mxu1 %v5028_v21 }
 0x3e7   :  { %1309 = vmatpush1.msra.mxu0 %v5033_v22  ;;  %1380 = vmatpush1.msra.mxu1 %v5040_v23 }
 0x3e8   :  { %1310 = vmatprep.subr.mxu0 %v5045_v24  ;;  %1381 = vmatprep.subr.mxu1 %v5050_v25 }
 0x3e9   :  { %1311 = vmatpush1.msra.mxu0 %v5057_v26  ;;  %1382 = vmatpush1.msra.mxu1 %v5062_v27 }
 0x3ea   :  { %1312 = vmatprep.subr.mxu0 %v5067_v28  ;;  %1383 = vmatprep.subr.mxu1 %v5074_v29 }
 0x3eb   :  { %1313 = vmatpush1.msra.mxu0 %v5079_v30  ;;  %1384 = vmatpush1.msra.mxu1 %v5084_v31 }
 0x3ec   :  { %1314 = vmatprep.subr.mxu0 %v5091_v32  ;;  %1385 = vmatprep.subr.mxu1 %v5096_v33 }
 0x3ed   :  { %1315 = vmatpush1.msra.mxu0 %v5103_v34  ;;  %1386 = vmatpush1.msra.mxu1 %v5108_v35 }
 0x3ee   :  { %1316 = vmatprep.subr.mxu0 %v7397_v44  ;;  %1387 = vmatprep.subr.mxu1 %v7398_v36 }
 0x3ef   :  { %1317 = vmatpush1.msra.mxu0 %v7399_v37  ;;  %1388 = vmatpush1.msra.mxu1 %v7400_v38 }
 0x3f0   :  { %1318 = vmatprep.subr.mxu0 %v7401_v41  ;;  %1389 = vmatprep.subr.mxu1 %v7402_v45  ;;  %v3847_v45 = vld [vmem:[%s7122_s0 + $0x98] sm:$0xff] }
 0x3f1   :  { %1319 = vmatpush1.msra.mxu0 %v7403_v46  ;;  %1390 = vmatpush1.msra.mxu1 %v7404_v3  ;;  %v7414_v3 = vld [vmem:[#allocation7_spill] sm:$0xff] }
 0x3f2   :  { %1320 = vmatprep.subr.mxu0 %v7405_v47  ;;  %1391 = vmatprep.subr.mxu1 %v7406_v48  ;;  %v7415_v47 = vld [vmem:[#allocation8_spill] sm:$0xff] }
 0x3f3   :  { %1321 = vmatpush1.msra.mxu0 %v7407_v54  ;;  %1392 = vmatpush1.msra.mxu1 %v7408_v49  ;;  %v3844_v49 = vld [vmem:[%s7122_s0 + $0x80] sm:$0xff] }
 0x3f4   :  { %1322 = vmatprep.subr.mxu0 %v7409_v42  ;;  %1393 = vmatprep.subr.mxu1 %v7410_v43  ;;  %v3845_v43 = vld [vmem:[%s7122_s0 + $0x88] sm:$0xff] }
 0x3f5   :  { %1323 = vmatpush1.msra.mxu0 %v7411_v18  ;;  %1356 = vmatprep.mubr.f32.mxu0 %v7412_v40 }
 0x3f6   :  { %1394 = vmatpush1.msra.mxu1 %v7413_v39  ;;  %1427 = vmatprep.mubr.f32.mxu1 %v7412_v40  ;;  %v3846_v39 = vld [vmem:[%s7122_s0 + $0x90] sm:$0xff] }
 0x3f7   :  { %1529 = vmatprep.subr.mxu0 %v7414_v3  ;;  %1600 = vmatprep.subr.mxu1 %v7415_v47 }
 0x496   :  { %v1121_v54 = vpop.f32.mrf.mxu0  ;;  %v1192_v3 = vpop.f32.mrf.mxu1 }
 0x497   :  { %v1197_v18 = vadd.f32 %v3844_v49, %v1121_v54  ;;  %v1199_v40 = vadd.f32 %v3846_v39, %v1192_v3 }
 0x498   :  { %v1123_v42 = vpop.f32.mrf.mxu0  ;;  %v1194_v41 = vpop.f32.mrf.mxu1 }
 0x499   :  { %v1201_v48 = vmul.f32 0.5, %v1197_v18  ;;  %v1198_v46 = vadd.f32 %v3845_v43, %v1123_v42  ;;  %v1200_v38 = vadd.f32 %v3847_v45, %v1194_v41  ;;  %v7421_v45 = vld [vmem:[#allocation16_spill] sm:$0xff] }
 0x49b   :  { %3955 = vtanh.f32 %v1201_v48  ;;  %v1205_v47 = vmul.f32 0.5, %v1198_v46  ;;  %v1210_v54 = vmul.f32 0.5, %v1200_v38 }
 0x49d   :  { %3957 = vtanh.f32 %v1205_v47 }
 0x49e   :  { %3959 = vtanh.f32 %v1199_v40 }
 0x49f   :  { %3961 = vtanh.f32 %v1210_v54  ;;  %v7422_v54 = vld [vmem:[#allocation13_spill] sm:$0xff] }
 0x4a8   :  { %v3956_v49 = vpop.eup %3955 }
 0x4a9   :  { %v1203_v18 = vmul.f32 0.5, %v3956_v49  ;;  %v7423_v49 = vld [vmem:[#allocation18_spill] sm:$0xff] }
 0x4aa   :  { %v3958_v42 = vpop.eup %3957 }
 0x4ab   :  { %v1204_v43 = vadd.f32 0.5, %v1203_v18  ;;  %v1207_v37 = vmul.f32 0.5, %v3958_v42  ;;  %v3960_v44 = vpop.eup %3959  ;;  %v7424_v18 = vld [vmem:[#allocation15_spill] sm:$0xff]  ;;  %v7425_v42 = vld [vmem:[#allocation20_spill] sm:$0xff] }
 0x4ac   :  { %v3962_v47 = vpop.eup %3961 }
 0x4ad   :  { %v1208_v36 = vadd.f32 0.5, %v1207_v37  ;;  %v1215_v39 = vmul.f32 %v3960_v44, %v1204_v43  ;;  %v1212_v48 = vmul.f32 0.5, %v3962_v47  ;;  %v7418_v44 = vld [vmem:[#allocation9_spill] sm:$0xff]  ;;  %v7420_v37 = vld [vmem:[#allocation11_spill] sm:$0xff] }
 0x4ae   :  { %v7426_v43 = vld [vmem:[#allocation17_spill] sm:$0xff]  ;;  %v7429_v47 = vld [vmem:[#allocation23_spill] sm:$0xff] }
 0x4af   :  { %v1214_v46 = vmul.f32 %v1208_v36, %v5227_v51  ;;  %v1213_v40 = vadd.f32 0.5, %v1212_v48  ;;  %v7417_v51 = vld [vmem:[#allocation12_spill] sm:$0xff]  ;;  %v7419_v36 = vld [vmem:[#allocation14_spill] sm:$0xff]  ;;  %v7430_v48 = vld [vmem:[#allocation21_spill] sm:$0xff] }
 0x4b1   :  { %v5313_v3 = vadd.f32 %v1215_v39, %v1214_v46  ;;  %v7427_v46 = vld [vmem:[#allocation22_spill] sm:$0xff]  ;;  %v7428_v39 = vld [vmem:[#allocation19_spill] sm:$0xff] }
 0x4b3   :  { %3963 = vtanh.f32 %v5313_v3 }
 0x4c0   :  { %v3964_v41 = vpop.eup %3963 }
 0x4c1   :  { %v5316_v38 = vmul.f32 %v3964_v41, %v1213_v40  ;;  %v7431_v40 = vld [vmem:[#allocation24_spill] sm:$0xff]  ;;  %v7432_v41 = vmov 0.0  }
 0x4c3   :  { %7416 = vst [vmem:[#allocation28_spill] sm:$0xff] %v5316_v38  ;;  %1357 = vmatmul.mubr.f32.vlgmr.msra.gmra.mxu0 %v5316_v38  ;;  %1428 = vmatmul.mubr.f32.vlgmr.msra.gmra.mxu1 %v5316_v38  ;;  %v7433_v38 = vld [vmem:[#allocation26_spill] sm:$0xff] }
 0x4c4   :  { %1530 = vmatpush1.msra.mxu0 %v4843_v52  ;;  %1601 = vmatpush1.msra.mxu1 %v4848_v58 }
 0x4c5   :  { %1531 = vmatprep.subr.mxu0 %v4855_v60  ;;  %1602 = vmatprep.subr.mxu1 %v4860_v0 }
 0x4c6   :  { %1532 = vmatpush1.msra.mxu0 %v4867_v57  ;;  %1603 = vmatpush1.msra.mxu1 %v4872_v6 }
 0x4c7   :  { %1533 = vmatprep.subr.mxu0 %v4879_v55  ;;  %1604 = vmatprep.subr.mxu1 %v4884_v50 }
 0x4c8   :  { %1534 = vmatpush1.msra.mxu0 %v4891_v53  ;;  %1605 = vmatpush1.msra.mxu1 %v4896_v59 }
 0x4c9   :  { %1535 = vmatprep.subr.mxu0 %v4903_v62  ;;  %1606 = vmatprep.subr.mxu1 %v4908_v61 }
 0x4ca   :  { %1536 = vmatpush1.msra.mxu0 %v4915_v63  ;;  %1607 = vmatpush1.msra.mxu1 %v4920_v56 }
 0x4cb   :  { %1537 = vmatprep.subr.mxu0 %v4927_v1  ;;  %1608 = vmatprep.subr.mxu1 %v4932_v2 }
 0x4cc   :  { %1538 = vmatpush1.msra.mxu0 %v4939_v4  ;;  %1609 = vmatpush1.msra.mxu1 %v4944_v5 }
 0x4cd   :  { %1539 = vmatprep.subr.mxu0 %v4951_v7  ;;  %1610 = vmatprep.subr.mxu1 %v4956_v8 }
 0x4ce   :  { %1540 = vmatpush1.msra.mxu0 %v4963_v9  ;;  %1611 = vmatpush1.msra.mxu1 %v4968_v10 }
 0x4cf   :  { %1541 = vmatprep.subr.mxu0 %v4975_v11  ;;  %1612 = vmatprep.subr.mxu1 %v4980_v12 }
 0x4d0   :  { %1542 = vmatpush1.msra.mxu0 %v4987_v13  ;;  %1613 = vmatpush1.msra.mxu1 %v4992_v14 }
 0x4d1   :  { %1543 = vmatprep.subr.mxu0 %v4999_v15  ;;  %1614 = vmatprep.subr.mxu1 %v5004_v16 }
 0x4d2   :  { %1544 = vmatpush1.msra.mxu0 %v5011_v17  ;;  %1615 = vmatpush1.msra.mxu1 %v5016_v19 }
 0x4d3   :  { %1545 = vmatprep.subr.mxu0 %v5023_v20  ;;  %1616 = vmatprep.subr.mxu1 %v5028_v21 }
 0x4d4   :  { %1546 = vmatpush1.msra.mxu0 %v5033_v22  ;;  %1617 = vmatpush1.msra.mxu1 %v5040_v23 }
 0x4d5   :  { %1547 = vmatprep.subr.mxu0 %v5045_v24  ;;  %1618 = vmatprep.subr.mxu1 %v5050_v25 }
 0x4d6   :  { %1548 = vmatpush1.msra.mxu0 %v5057_v26  ;;  %1619 = vmatpush1.msra.mxu1 %v5062_v27 }
 0x4d7   :  { %1549 = vmatprep.subr.mxu0 %v5067_v28  ;;  %1620 = vmatprep.subr.mxu1 %v5074_v29 }
 0x4d8   :  { %1550 = vmatpush1.msra.mxu0 %v5079_v30  ;;  %1621 = vmatpush1.msra.mxu1 %v5084_v31 }
 0x4d9   :  { %1551 = vmatprep.subr.mxu0 %v5091_v32  ;;  %1622 = vmatprep.subr.mxu1 %v5096_v33 }
 0x4da   :  { %1552 = vmatpush1.msra.mxu0 %v5103_v34  ;;  %1623 = vmatpush1.msra.mxu1 %v5108_v35 }
 0x4db   :  { %1553 = vmatprep.subr.mxu0 %v7417_v51  ;;  %1624 = vmatprep.subr.mxu1 %v7418_v44 }
 0x4dc   :  { %1554 = vmatpush1.msra.mxu0 %v7419_v36  ;;  %1625 = vmatpush1.msra.mxu1 %v7420_v37 }
 0x4dd   :  { %1555 = vmatprep.subr.mxu0 %v7421_v45  ;;  %1626 = vmatprep.subr.mxu1 %v7422_v54  ;;  %v3851_v54 = vld [vmem:[%s7122_s0 + $0xb8] sm:$0xff] }
 0x4de   :  { %1556 = vmatpush1.msra.mxu0 %v7423_v49  ;;  %1627 = vmatpush1.msra.mxu1 %v7424_v18  ;;  %v7434_v18 = vld [vmem:[#allocation7_spill] sm:$0xff] }
 0x4df   :  { %1557 = vmatprep.subr.mxu0 %v7425_v42  ;;  %1628 = vmatprep.subr.mxu1 %v7426_v43  ;;  %v7435_v42 = vld [vmem:[#allocation8_spill] sm:$0xff] }
 0x4e0   :  { %1558 = vmatpush1.msra.mxu0 %v7427_v46  ;;  %1629 = vmatpush1.msra.mxu1 %v7428_v39  ;;  %v3848_v39 = vld [vmem:[%s7122_s0 + $0xa0] sm:$0xff] }
 0x4e1   :  { %1559 = vmatprep.subr.mxu0 %v7429_v47  ;;  %1630 = vmatprep.subr.mxu1 %v7430_v48  ;;  %v3849_v48 = vld [vmem:[%s7122_s0 + $0xa8] sm:$0xff] }
 0x4e2   :  { %1560 = vmatpush1.msra.mxu0 %v7431_v40  ;;  %1593 = vmatprep.mubr.f32.mxu0 %v7432_v41 }
 0x4e3   :  { %1631 = vmatpush1.msra.mxu1 %v7433_v38  ;;  %1664 = vmatprep.mubr.f32.mxu1 %v7432_v41  ;;  %v3850_v41 = vld [vmem:[%s7122_s0 + $0xb0] sm:$0xff] }
 0x4e4   :  { %1766 = vmatprep.subr.mxu0 %v7434_v18  ;;  %1837 = vmatprep.subr.mxu1 %v7435_v42 }
 0x583   :  { %v1358_v46 = vpop.f32.mrf.mxu0  ;;  %v1429_v18 = vpop.f32.mrf.mxu1 }
 0x584   :  { %v1434_v40 = vadd.f32 %v3848_v39, %v1358_v46  ;;  %v1436_v38 = vadd.f32 %v3850_v41, %v1429_v18 }
 0x585   :  { %v1360_v47 = vpop.f32.mrf.mxu0  ;;  %v1431_v45 = vpop.f32.mrf.mxu1 }
 0x586   :  { %v1438_v43 = vmul.f32 0.5, %v1434_v40  ;;  %v1435_v49 = vadd.f32 %v3849_v48, %v1360_v47  ;;  %v1437_v37 = vadd.f32 %v3851_v54, %v1431_v45  ;;  %v1996_v54 = vld [vmem:[%s7123_s3 + $0x1f0] sm:$0xff] }
 0x588   :  { %3965 = vtanh.f32 %v1438_v43  ;;  %v1442_v42 = vmul.f32 0.5, %v1435_v49  ;;  %v1447_v46 = vmul.f32 0.5, %v1437_v37 }
 0x58a   :  { %3967 = vtanh.f32 %v1442_v42 }
 0x58b   :  { %3969 = vtanh.f32 %v1436_v38 }
 0x58c   :  { %3971 = vtanh.f32 %v1447_v46  ;;  %v1991_v46 = vld [vmem:[%s7123_s3 + $0x1c8] sm:$0xff] }
 0x595   :  { %v3966_v39 = vpop.eup %3965 }
 0x596   :  { %v1440_v40 = vmul.f32 0.5, %v3966_v39  ;;  %v1993_v39 = vld [vmem:[%s7123_s3 + $0x1d8] sm:$0xff] }
 0x597   :  { %v3968_v47 = vpop.eup %3967 }
 0x598   :  { %v1441_v48 = vadd.f32 0.5, %v1440_v40  ;;  %v1444_v36 = vmul.f32 0.5, %v3968_v47  ;;  %v3970_v51 = vpop.eup %3969  ;;  %v1990_v40 = vld [vmem:[%s7123_s3 + $0x1c0] sm:$0xff]  ;;  %v1992_v47 = vld [vmem:[%s7123_s3 + $0x1d0] sm:$0xff] }
 0x599   :  { %v3972_v18 = vpop.eup %3971 }
 0x59a   :  { %v1445_v44 = vadd.f32 0.5, %v1444_v36  ;;  %v1452_v43 = vmul.f32 %v3970_v51, %v1441_v48  ;;  %v1449_v42 = vmul.f32 0.5, %v3972_v18  ;;  %v1994_v36 = vld [vmem:[%s7123_s3 + $0x1e0] sm:$0xff]  ;;  %v1987_v48 = vld [vmem:[%s7123_s3 + $0x1a8] sm:$0xff] }
 0x59b   :  { %v1983_v18 = vld [vmem:[%s7123_s3 + $0x188] sm:$0xff] }
 0x59c   :  { %v1451_v49 = vmul.f32 %v1445_v44, %v5313_v3  ;;  %v1450_v38 = vadd.f32 0.5, %v1449_v42  ;;  %v1985_v42 = vld [vmem:[%s7123_s3 + $0x198] sm:$0xff] }
 0x59e   :  { %v5399_v41 = vadd.f32 %v1452_v43, %v1451_v49  ;;  %v1989_v49 = vld [vmem:[%s7123_s3 + $0x1b8] sm:$0xff]  ;;  %v1986_v43 = vld [vmem:[%s7123_s3 + $0x1a0] sm:$0xff] }
 0x5a0   :  { %3973 = vtanh.f32 %v5399_v41 }
 0x5ad   :  { %v3974_v45 = vpop.eup %3973 }
 0x5ae   :  { %v5402_v37 = vmul.f32 %v3974_v45, %v1450_v38  ;;  %v1982_v38 = vld [vmem:[%s7123_s3 + $0x180] sm:$0xff]  ;;  %v1984_v45 = vld [vmem:[%s7123_s3 + $0x190] sm:$0xff] }
 0x5b0   :  { %1594 = vmatmul.mubr.f32.vlgmr.msra.gmra.mxu0 %v5402_v37  ;;  %1665 = vmatmul.mubr.f32.vlgmr.msra.gmra.mxu1 %v5402_v37 }
 0x5b1   :  { %1767 = vmatpush1.msra.mxu0 %v4843_v52  ;;  %1838 = vmatpush1.msra.mxu1 %v4848_v58  ;;  %v7436_v52 = vld [vmem:[#allocation12_spill] sm:$0xff]  ;;  %v7437_v58 = vld [vmem:[#allocation9_spill] sm:$0xff] }
 0x5b2   :  { %1768 = vmatprep.subr.mxu0 %v4855_v60  ;;  %1839 = vmatprep.subr.mxu1 %v4860_v0  ;;  %v7438_v60 = vld [vmem:[#allocation14_spill] sm:$0xff]  ;;  %v7439_v0 = vld [vmem:[#allocation11_spill] sm:$0xff] }
 0x5b3   :  { %1769 = vmatpush1.msra.mxu0 %v4867_v57  ;;  %1840 = vmatpush1.msra.mxu1 %v4872_v6  ;;  %v7440_v57 = vld [vmem:[#allocation16_spill] sm:$0xff]  ;;  %v7441_v6 = vld [vmem:[#allocation13_spill] sm:$0xff] }
 0x5b4   :  { %1770 = vmatprep.subr.mxu0 %v4879_v55  ;;  %1841 = vmatprep.subr.mxu1 %v4884_v50  ;;  %v7442_v55 = vld [vmem:[#allocation18_spill] sm:$0xff]  ;;  %v7443_v50 = vld [vmem:[#allocation15_spill] sm:$0xff] }
 0x5b5   :  { %1771 = vmatpush1.msra.mxu0 %v4891_v53  ;;  %1842 = vmatpush1.msra.mxu1 %v4896_v59  ;;  %v7444_v53 = vld [vmem:[#allocation20_spill] sm:$0xff]  ;;  %v7445_v59 = vld [vmem:[#allocation17_spill] sm:$0xff] }
 0x5b6   :  { %1772 = vmatprep.subr.mxu0 %v4903_v62  ;;  %1843 = vmatprep.subr.mxu1 %v4908_v61  ;;  %v7446_v62 = vld [vmem:[#allocation22_spill] sm:$0xff]  ;;  %v7447_v61 = vld [vmem:[#allocation19_spill] sm:$0xff] }
 0x5b7   :  { %1773 = vmatpush1.msra.mxu0 %v4915_v63  ;;  %1844 = vmatpush1.msra.mxu1 %v4920_v56  ;;  %v7448_v63 = vld [vmem:[#allocation23_spill] sm:$0xff]  ;;  %v7449_v56 = vld [vmem:[#allocation21_spill] sm:$0xff] }
 0x5b8   :  { %1774 = vmatprep.subr.mxu0 %v4927_v1  ;;  %1845 = vmatprep.subr.mxu1 %v4932_v2  ;;  %v7450_v1 = vld [vmem:[#allocation24_spill] sm:$0xff]  ;;  %v7451_v2 = vld [vmem:[#allocation26_spill] sm:$0xff] }
 0x5b9   :  { %1775 = vmatpush1.msra.mxu0 %v4939_v4  ;;  %1846 = vmatpush1.msra.mxu1 %v4944_v5  ;;  %v7452_v4 = vmov 0.0   ;;  %v1995_v5 = vld [vmem:[%s7123_s3 + $0x1e8] sm:$0xff] }
 0x5ba   :  { %1776 = vmatprep.subr.mxu0 %v4951_v7  ;;  %1847 = vmatprep.subr.mxu1 %v4956_v8  ;;  %v1997_v7 = vld [vmem:[%s7123_s3 + $0x1f8] sm:$0xff]  ;;  %v3852_v8 = vld [vmem:[%s7122_s0 + $0xc0] sm:$0xff] }
 0x5bb   :  { %1777 = vmatpush1.msra.mxu0 %v4963_v9  ;;  %1848 = vmatpush1.msra.mxu1 %v4968_v10  ;;  %v3853_v10 = vld [vmem:[%s7122_s0 + $0xc8] sm:$0xff] }
 0x5bc   :  { %1778 = vmatprep.subr.mxu0 %v4975_v11  ;;  %1849 = vmatprep.subr.mxu1 %v4980_v12 }
 0x5bd   :  { %1779 = vmatpush1.msra.mxu0 %v4987_v13  ;;  %1850 = vmatpush1.msra.mxu1 %v4992_v14 }
 0x5be   :  { %1780 = vmatprep.subr.mxu0 %v4999_v15  ;;  %1851 = vmatprep.subr.mxu1 %v5004_v16  ;;  %v3854_v15 = vld [vmem:[%s7122_s0 + $0xd0] sm:$0xff] }
 0x5bf   :  { %1781 = vmatpush1.msra.mxu0 %v5011_v17  ;;  %1852 = vmatpush1.msra.mxu1 %v5016_v19 }
 0x5c0   :  { %1782 = vmatprep.subr.mxu0 %v5023_v20  ;;  %1853 = vmatprep.subr.mxu1 %v5028_v21  ;;  %v3855_v20 = vld [vmem:[%s7122_s0 + $0xd8] sm:$0xff] }
 0x5c1   :  { %1783 = vmatpush1.msra.mxu0 %v5033_v22  ;;  %1854 = vmatpush1.msra.mxu1 %v5040_v23 }
 0x5c2   :  { %1784 = vmatprep.subr.mxu0 %v5045_v24  ;;  %1855 = vmatprep.subr.mxu1 %v5050_v25 }
 0x5c3   :  { %1785 = vmatpush1.msra.mxu0 %v5057_v26  ;;  %1856 = vmatpush1.msra.mxu1 %v5062_v27 }
 0x5c4   :  { %1786 = vmatprep.subr.mxu0 %v5067_v28  ;;  %1857 = vmatprep.subr.mxu1 %v5074_v29 }
 0x5c5   :  { %1787 = vmatpush1.msra.mxu0 %v5079_v30  ;;  %1858 = vmatpush1.msra.mxu1 %v5084_v31 }
 0x5c6   :  { %1788 = vmatprep.subr.mxu0 %v5091_v32  ;;  %1859 = vmatprep.subr.mxu1 %v5096_v33 }
 0x5c7   :  { %1789 = vmatpush1.msra.mxu0 %v5103_v34  ;;  %1860 = vmatpush1.msra.mxu1 %v5108_v35 }
 0x5c8   :  { %1790 = vmatprep.subr.mxu0 %v7436_v52  ;;  %1861 = vmatprep.subr.mxu1 %v7437_v58  ;;  %v1979_v52 = vld [vmem:[%s7123_s3 + $0x168] sm:$0xff]  ;;  %v1981_v58 = vld [vmem:[%s7123_s3 + $0x178] sm:$0xff] }
 0x5c9   :  { %1791 = vmatpush1.msra.mxu0 %v7438_v60  ;;  %1862 = vmatpush1.msra.mxu1 %v7439_v0  ;;  %v1978_v60 = vld [vmem:[%s7123_s3 + $0x160] sm:$0xff]  ;;  %v1980_v0 = vld [vmem:[%s7123_s3 + $0x170] sm:$0xff] }
 0x5ca   :  { %1792 = vmatprep.subr.mxu0 %v7440_v57  ;;  %1863 = vmatprep.subr.mxu1 %v7441_v6  ;;  %v1975_v57 = vld [vmem:[%s7123_s3 + $0x148] sm:$0xff]  ;;  %v1977_v6 = vld [vmem:[%s7123_s3 + $0x158] sm:$0xff] }
 0x5cb   :  { %1793 = vmatpush1.msra.mxu0 %v7442_v55  ;;  %1864 = vmatpush1.msra.mxu1 %v7443_v50  ;;  %v1974_v55 = vld [vmem:[%s7123_s3 + $0x140] sm:$0xff]  ;;  %v1976_v50 = vld [vmem:[%s7123_s3 + $0x150] sm:$0xff] }
 0x5cc   :  { %1794 = vmatprep.subr.mxu0 %v7444_v53  ;;  %1865 = vmatprep.subr.mxu1 %v7445_v59  ;;  %v1971_v53 = vld [vmem:[%s7123_s3 + $0x128] sm:$0xff]  ;;  %v1973_v59 = vld [vmem:[%s7123_s3 + $0x138] sm:$0xff] }
 0x5cd   :  { %1795 = vmatpush1.msra.mxu0 %v7446_v62  ;;  %1866 = vmatpush1.msra.mxu1 %v7447_v61  ;;  %v1970_v62 = vld [vmem:[%s7123_s3 + $0x120] sm:$0xff]  ;;  %v1972_v61 = vld [vmem:[%s7123_s3 + $0x130] sm:$0xff] }
 0x5ce   :  { %1796 = vmatprep.subr.mxu0 %v7448_v63  ;;  %1867 = vmatprep.subr.mxu1 %v7449_v56  ;;  %v1967_v63 = vld [vmem:[%s7123_s3 + $0x108] sm:$0xff]  ;;  %v1969_v56 = vld [vmem:[%s7123_s3 + $0x118] sm:$0xff] }
 0x5cf   :  { %1797 = vmatpush1.msra.mxu0 %v7450_v1  ;;  %1868 = vmatpush1.msra.mxu1 %v7451_v2  ;;  %v1966_v1 = vld [vmem:[%s7123_s3 + $0x100] sm:$0xff]  ;;  %v1968_v2 = vld [vmem:[%s7123_s3 + $0x110] sm:$0xff] }
 0x5d0   :  { %1830 = vmatprep.mubr.f32.mxu0 %v7452_v4  ;;  %1901 = vmatprep.mubr.f32.mxu1 %v7452_v4 }
 0x5d1   :  { %2028 = vmatprep.subr.mxu0 %v1995_v5  ;;  %2141 = vmatprep.subr.mxu1 %v1997_v7  ;;  %v1963_v5 = vld [vmem:[%s7123_s3 + $0xe8] sm:$0xff]  ;;  %v1965_v7 = vld [vmem:[%s7123_s3 + $0xf8] sm:$0xff] }
 0x670   :  { %v1595_v9 = vpop.f32.mrf.mxu0  ;;  %v1666_v16 = vpop.f32.mrf.mxu1 }
 0x671   :  { %v1671_v11 = vadd.f32 %v3852_v8, %v1595_v9  ;;  %v1673_v19 = vadd.f32 %v3854_v15, %v1666_v16  ;;  %v1962_v8 = vld [vmem:[%s7123_s3 + $0xe0] sm:$0xff]  ;;  %v1964_v9 = vld [vmem:[%s7123_s3 + $0xf0] sm:$0xff]  ;;  %v1957_v15 = vld [vmem:[%s7123_s3 + $0xb8] sm:$0xff] }
 0x672   :  { %v1597_v12 = vpop.f32.mrf.mxu0  ;;  %v1668_v21 = vpop.f32.mrf.mxu1  ;;  %v1954_v16 = vld [vmem:[%s7123_s3 + $0xa0] sm:$0xff] }
 0x673   :  { %v1675_v13 = vmul.f32 0.5, %v1671_v11  ;;  %v1672_v14 = vadd.f32 %v3853_v10, %v1597_v12  ;;  %v1674_v22 = vadd.f32 %v3855_v20, %v1668_v21  ;;  %v1959_v10 = vld [vmem:[%s7123_s3 + $0xc8] sm:$0xff]  ;;  %v1961_v11 = vld [vmem:[%s7123_s3 + $0xd8] sm:$0xff]  ;;  %v1958_v12 = vld [vmem:[%s7123_s3 + $0xc0] sm:$0xff] }
 0x674   :  { %v1953_v20 = vld [vmem:[%s7123_s3 + $0x98] sm:$0xff]  ;;  %v1950_v21 = vld [vmem:[%s7123_s3 + $0x80] sm:$0xff] }
 0x675   :  { %3975 = vtanh.f32 %v1675_v13  ;;  %v1679_v17 = vmul.f32 0.5, %v1672_v14  ;;  %v1684_v23 = vmul.f32 0.5, %v1674_v22  ;;  %v1960_v13 = vld [vmem:[%s7123_s3 + $0xd0] sm:$0xff]  ;;  %v1955_v14 = vld [vmem:[%s7123_s3 + $0xa8] sm:$0xff] }
 0x676   :  { %v1952_v22 = vld [vmem:[%s7123_s3 + $0x90] sm:$0xff] }
 0x677   :  { %3977 = vtanh.f32 %v1679_v17  ;;  %v1956_v17 = vld [vmem:[%s7123_s3 + $0xb0] sm:$0xff] }
 0x678   :  { %3979 = vtanh.f32 %v1673_v19  ;;  %v1951_v19 = vld [vmem:[%s7123_s3 + $0x88] sm:$0xff] }
 0x679   :  { %3981 = vtanh.f32 %v1684_v23  ;;  %v1947_v23 = vld [vmem:[%s7123_s3 + $0x68] sm:$0xff] }
 0x682   :  { %v3976_v24 = vpop.eup %3975 }
 0x683   :  { %v1677_v25 = vmul.f32 0.5, %v3976_v24  ;;  %v1949_v24 = vld [vmem:[%s7123_s3 + $0x78] sm:$0xff] }
 0x684   :  { %v3978_v26 = vpop.eup %3977 }
 0x685   :  { %v1678_v27 = vadd.f32 0.5, %v1677_v25  ;;  %v1681_v28 = vmul.f32 0.5, %v3978_v26  ;;  %v3980_v30 = vpop.eup %3979  ;;  %v1946_v25 = vld [vmem:[%s7123_s3 + $0x60] sm:$0xff]  ;;  %v1948_v26 = vld [vmem:[%s7123_s3 + $0x70] sm:$0xff] }
 0x686   :  { %v3982_v34 = vpop.eup %3981 }
 0x687   :  { %v1682_v29 = vadd.f32 0.5, %v1681_v28  ;;  %v1689_v32 = vmul.f32 %v3980_v30, %v1678_v27  ;;  %v1686_v35 = vmul.f32 0.5, %v3982_v34  ;;  %v1943_v27 = vld [vmem:[%s7123_s3 + $0x48] sm:$0xff]  ;;  %v1945_v28 = vld [vmem:[%s7123_s3 + $0x58] sm:$0xff]  ;;  %v1944_v30 = vld [vmem:[%s7123_s3 + $0x50] sm:$0xff] }
 0x688   :  { %v1938_v34 = vld [vmem:[%s7123_s3 + $0x20] sm:$0xff] }
 0x689   :  { %v1688_v31 = vmul.f32 %v1682_v29, %v5399_v41  ;;  %v1687_v3 = vadd.f32 0.5, %v1686_v35  ;;  %v1988_v41 = vld [vmem:[%s7123_s3 + $0x1b0] sm:$0xff]  ;;  %v1942_v29 = vld [vmem:[%s7123_s3 + $0x40] sm:$0xff] }
 0x68a   :  { %v1940_v35 = vld [vmem:[%s7123_s3 + $0x30] sm:$0xff] }
 0x68b   :  { %v5489_v33 = vadd.f32 %v1689_v32, %v1688_v31  ;;  %v1939_v31 = vld [vmem:[%s7123_s3 + $0x28] sm:$0xff]  ;;  %v1941_v32 = vld [vmem:[%s7123_s3 + $0x38] sm:$0xff] }
 0x68d   :  { %3983 = vtanh.f32 %v5489_v33 }
 0x69a   :  { %v3984_v51 = vpop.eup %3983 }
 0x69b   :  { %v5492_v44 = vmul.f32 %v3984_v51, %v1687_v3  ;;  %v1935_v3 = vld [vmem:[%s7123_s3 + $0x8] sm:$0xff]  ;;  %v1937_v51 = vld [vmem:[%s7123_s3 + $0x18] sm:$0xff] }
 0x69d   :  { %1831 = vmatmul.mubr.f32.vlgmr.msra.gmra.mxu0 %v5492_v44  ;;  %1902 = vmatmul.mubr.f32.vlgmr.msra.gmra.mxu1 %v5492_v44 }
 0x69e   :  { %2029 = vmatpush1.msra.mxu0 %v1994_v36  ;;  %2142 = vmatpush1.msra.mxu1 %v1996_v54  ;;  %v1934_v36 = vld [vmem:[%s7123_s3] sm:$0xff]  ;;  %v1936_v54 = vld [vmem:[%s7123_s3 + $0x10] sm:$0xff] }
 0x69f   :  { %2030 = vmatprep.subr.mxu0 %v1991_v46  ;;  %2143 = vmatprep.subr.mxu1 %v1993_v39  ;;  %v7453_v46 = vld [vmem:[#allocation25_spill] sm:$0xff]  ;;  %v7454_v39 = vld [vmem:[#allocation10_spill] sm:$0xff] }
 0x6a0   :  { %2031 = vmatpush1.msra.mxu0 %v1990_v40  ;;  %2144 = vmatpush1.msra.mxu1 %v1992_v47  ;;  %v7455_v40 = vld [vmem:[#allocation6_spill] sm:$0xff]  ;;  %v7456_v47 = vld [vmem:[#allocation27_spill] sm:$0xff] }
 0x6a1   :  { %2032 = vmatprep.subr.mxu0 %v1987_v48  ;;  %2145 = vmatprep.subr.mxu1 %v1989_v49  ;;  %v7457_v48 = vld [vmem:[#allocation28_spill] sm:$0xff]  ;;  %v5715_v49 = vld [vmem:[%s7124_s2 + $0x1e8] sm:$0xff] }
 0x6a2   :  { %2033 = vmatpush1.msra.mxu0 %v1986_v43  ;;  %2146 = vmatpush1.msra.mxu1 %v1988_v41  ;;  %7458 = vst [vmem:[#allocation7_spill] sm:$0xff] %v5715_v49  ;;  %v5732_v43 = vld [vmem:[%s7124_s2 + $0x1f0] sm:$0xff]  ;;  %v5738_v41 = vld [vmem:[%s7124_s2 + $0x1c8] sm:$0xff] }
 0x6a3   :  { %2034 = vmatprep.subr.mxu0 %v1983_v18  ;;  %2147 = vmatprep.subr.mxu1 %v1985_v42  ;;  %v5744_v18 = vld [vmem:[%s7124_s2 + $0x1d8] sm:$0xff]  ;;  %v5750_v42 = vld [vmem:[%s7124_s2 + $0x1c0] sm:$0xff] }
 0x6a4   :  { %2035 = vmatpush1.msra.mxu0 %v1982_v38  ;;  %2148 = vmatpush1.msra.mxu1 %v1984_v45  ;;  %v5756_v38 = vld [vmem:[%s7124_s2 + $0x1d0] sm:$0xff]  ;;  %v5762_v45 = vld [vmem:[%s7124_s2 + $0x1a8] sm:$0xff] }
 0x6a5   :  { %2036 = vmatprep.subr.mxu0 %v1979_v52  ;;  %2149 = vmatprep.subr.mxu1 %v1981_v58  ;;  %v5768_v52 = vld [vmem:[%s7124_s2 + $0x1b8] sm:$0xff]  ;;  %v5774_v58 = vld [vmem:[%s7124_s2 + $0x1a0] sm:$0xff] }
 0x6a6   :  { %2037 = vmatpush1.msra.mxu0 %v1978_v60  ;;  %2150 = vmatpush1.msra.mxu1 %v1980_v0  ;;  %v5780_v60 = vld [vmem:[%s7124_s2 + $0x1b0] sm:$0xff]  ;;  %v5786_v0 = vld [vmem:[%s7124_s2 + $0x188] sm:$0xff] }
 0x6a7   :  { %2038 = vmatprep.subr.mxu0 %v1975_v57  ;;  %2151 = vmatprep.subr.mxu1 %v1977_v6  ;;  %v5792_v57 = vld [vmem:[%s7124_s2 + $0x198] sm:$0xff]  ;;  %v5798_v6 = vld [vmem:[%s7124_s2 + $0x180] sm:$0xff] }
 0x6a8   :  { %2039 = vmatpush1.msra.mxu0 %v1974_v55  ;;  %2152 = vmatpush1.msra.mxu1 %v1976_v50  ;;  %v5804_v55 = vld [vmem:[%s7124_s2 + $0x190] sm:$0xff]  ;;  %v5810_v50 = vld [vmem:[%s7124_s2 + $0x168] sm:$0xff] }
 0x6a9   :  { %2040 = vmatprep.subr.mxu0 %v1971_v53  ;;  %2153 = vmatprep.subr.mxu1 %v1973_v59  ;;  %v5816_v53 = vld [vmem:[%s7124_s2 + $0x178] sm:$0xff]  ;;  %v5822_v59 = vld [vmem:[%s7124_s2 + $0x160] sm:$0xff] }
 0x6aa   :  { %2041 = vmatpush1.msra.mxu0 %v1970_v62  ;;  %2154 = vmatpush1.msra.mxu1 %v1972_v61  ;;  %v5828_v62 = vld [vmem:[%s7124_s2 + $0x170] sm:$0xff]  ;;  %v5834_v61 = vld [vmem:[%s7124_s2 + $0x148] sm:$0xff] }
 0x6ab   :  { %2042 = vmatprep.subr.mxu0 %v1967_v63  ;;  %2155 = vmatprep.subr.mxu1 %v1969_v56  ;;  %v5840_v63 = vld [vmem:[%s7124_s2 + $0x158] sm:$0xff]  ;;  %v5846_v56 = vld [vmem:[%s7124_s2 + $0x140] sm:$0xff] }
 0x6ac   :  { %2043 = vmatpush1.msra.mxu0 %v1966_v1  ;;  %2156 = vmatpush1.msra.mxu1 %v1968_v2  ;;  %v5852_v1 = vld [vmem:[%s7124_s2 + $0x128] sm:$0xff]  ;;  %v5857_v2 = vld [vmem:[%s7124_s2 + $0x150] sm:$0xff] }
 0x6ad   :  { %2044 = vmatprep.subr.mxu0 %v1963_v5  ;;  %2157 = vmatprep.subr.mxu1 %v1965_v7  ;;  %v5864_v5 = vld [vmem:[%s7124_s2 + $0x120] sm:$0xff]  ;;  %v5869_v7 = vld [vmem:[%s7124_s2 + $0x138] sm:$0xff] }
 0x6ae   :  { %2045 = vmatpush1.msra.mxu0 %v1962_v8  ;;  %2158 = vmatpush1.msra.mxu1 %v1964_v9  ;;  %v5874_v8 = vld [vmem:[%s7124_s2 + $0x108] sm:$0xff]  ;;  %v5881_v9 = vld [vmem:[%s7124_s2 + $0x130] sm:$0xff] }
 0x6af   :  { %2046 = vmatprep.subr.mxu0 %v1959_v10  ;;  %2159 = vmatprep.subr.mxu1 %v1961_v11  ;;  %v5888_v10 = vld [vmem:[%s7124_s2 + $0x118] sm:$0xff]  ;;  %v5894_v11 = vld [vmem:[%s7124_s2 + $0x100] sm:$0xff] }
 0x6b0   :  { %2047 = vmatpush1.msra.mxu0 %v1958_v12  ;;  %2160 = vmatpush1.msra.mxu1 %v1960_v13  ;;  %v5900_v12 = vld [vmem:[%s7124_s2 + $0x110] sm:$0xff]  ;;  %v5906_v13 = vld [vmem:[%s7124_s2 + $0xe8] sm:$0xff] }
 0x6b1   :  { %2048 = vmatprep.subr.mxu0 %v1955_v14  ;;  %2161 = vmatprep.subr.mxu1 %v1957_v15  ;;  %v5912_v14 = vld [vmem:[%s7124_s2 + $0xf8] sm:$0xff]  ;;  %v5918_v15 = vld [vmem:[%s7124_s2 + $0xe0] sm:$0xff] }
 0x6b2   :  { %2049 = vmatpush1.msra.mxu0 %v1954_v16  ;;  %2162 = vmatpush1.msra.mxu1 %v1956_v17  ;;  %v5924_v16 = vld [vmem:[%s7124_s2 + $0xf0] sm:$0xff]  ;;  %v5930_v17 = vld [vmem:[%s7124_s2 + $0xc8] sm:$0xff] }
 0x6b3   :  { %2050 = vmatprep.subr.mxu0 %v1951_v19  ;;  %2163 = vmatprep.subr.mxu1 %v1953_v20  ;;  %v5936_v19 = vld [vmem:[%s7124_s2 + $0xd8] sm:$0xff]  ;;  %v5942_v20 = vld [vmem:[%s7124_s2 + $0xc0] sm:$0xff] }
 0x6b4   :  { %2051 = vmatpush1.msra.mxu0 %v1950_v21  ;;  %2164 = vmatpush1.msra.mxu1 %v1952_v22  ;;  %v5948_v21 = vld [vmem:[%s7124_s2 + $0xd0] sm:$0xff]  ;;  %v5954_v22 = vld [vmem:[%s7124_s2 + $0xa8] sm:$0xff] }
 0x6b5   :  { %2052 = vmatprep.subr.mxu0 %v1947_v23  ;;  %2165 = vmatprep.subr.mxu1 %v1949_v24  ;;  %v5960_v23 = vld [vmem:[%s7124_s2 + $0xb8] sm:$0xff]  ;;  %v5966_v24 = vld [vmem:[%s7124_s2 + $0xa0] sm:$0xff] }
 0x6b6   :  { %2053 = vmatpush1.msra.mxu0 %v1946_v25  ;;  %2166 = vmatpush1.msra.mxu1 %v1948_v26  ;;  %v5972_v25 = vld [vmem:[%s7124_s2 + $0xb0] sm:$0xff]  ;;  %v5978_v26 = vld [vmem:[%s7124_s2 + $0x88] sm:$0xff] }
 0x6b7   :  { %2054 = vmatprep.subr.mxu0 %v1943_v27  ;;  %2167 = vmatprep.subr.mxu1 %v1945_v28  ;;  %7460 = vst [vmem:[#allocation12_spill] sm:$0xff] %v5972_v25  ;;  %7461 = vst [vmem:[#allocation9_spill] sm:$0xff] %v5978_v26  ;;  %v5984_v27 = vld [vmem:[%s7124_s2 + $0x98] sm:$0xff]  ;;  %v5990_v28 = vld [vmem:[%s7124_s2 + $0x80] sm:$0xff] }
 0x6b8   :  { %2055 = vmatpush1.msra.mxu0 %v1942_v29  ;;  %2168 = vmatpush1.msra.mxu1 %v1944_v30  ;;  %7462 = vst [vmem:[#allocation14_spill] sm:$0xff] %v5984_v27  ;;  %7463 = vst [vmem:[#allocation11_spill] sm:$0xff] %v5990_v28  ;;  %v5996_v29 = vld [vmem:[%s7124_s2 + $0x90] sm:$0xff]  ;;  %v6002_v30 = vld [vmem:[%s7124_s2 + $0x68] sm:$0xff] }
 0x6b9   :  { %2056 = vmatprep.subr.mxu0 %v1939_v31  ;;  %2169 = vmatprep.subr.mxu1 %v1941_v32  ;;  %7464 = vst [vmem:[#allocation16_spill] sm:$0xff] %v5996_v29  ;;  %7465 = vst [vmem:[#allocation13_spill] sm:$0xff] %v6002_v30  ;;  %v6008_v31 = vld [vmem:[%s7124_s2 + $0x78] sm:$0xff]  ;;  %v6014_v32 = vld [vmem:[%s7124_s2 + $0x60] sm:$0xff] }
 0x6ba   :  { %2057 = vmatpush1.msra.mxu0 %v1938_v34  ;;  %2170 = vmatpush1.msra.mxu1 %v1940_v35  ;;  %7466 = vst [vmem:[#allocation18_spill] sm:$0xff] %v6008_v31  ;;  %7467 = vst [vmem:[#allocation15_spill] sm:$0xff] %v6014_v32  ;;  %v6020_v34 = vld [vmem:[%s7124_s2 + $0x70] sm:$0xff]  ;;  %v6026_v35 = vld [vmem:[%s7124_s2 + $0x48] sm:$0xff] }
 0x6bb   :  { %2058 = vmatprep.subr.mxu0 %v1935_v3  ;;  %2171 = vmatprep.subr.mxu1 %v1937_v51  ;;  %7468 = vst [vmem:[#allocation20_spill] sm:$0xff] %v6020_v34  ;;  %7469 = vst [vmem:[#allocation17_spill] sm:$0xff] %v6026_v35  ;;  %v6032_v3 = vld [vmem:[%s7124_s2 + $0x58] sm:$0xff]  ;;  %v6038_v51 = vld [vmem:[%s7124_s2 + $0x40] sm:$0xff] }
 0x6bc   :  { %2059 = vmatpush1.msra.mxu0 %v1934_v36  ;;  %2092 = vmatprep.mubr.f32.mxu0 %v7452_v4  ;;  %7470 = vst [vmem:[#allocation22_spill] sm:$0xff] %v6032_v3  ;;  %7471 = vst [vmem:[#allocation19_spill] sm:$0xff] %v6038_v51  ;;  %v6044_v36 = vld [vmem:[%s7124_s2 + $0x50] sm:$0xff] }
 0x6bd   :  { %2172 = vmatpush1.msra.mxu1 %v1936_v54  ;;  %2205 = vmatprep.mubr.f32.mxu1 %v7452_v4  ;;  %7472 = vst [vmem:[#allocation23_spill] sm:$0xff] %v6044_v36  ;;  %v6050_v54 = vld [vmem:[%s7124_s2 + $0x28] sm:$0xff] }
 0x6be   :  { %2093 = vmatmul.mubr.f32.vlgmr.msra.gmra.mxu0 %v7453_v46  ;;  %2206 = vmatmul.mubr.f32.vlgmr.msra.gmra.mxu1 %v7453_v46  ;;  %7473 = vst [vmem:[#allocation21_spill] sm:$0xff] %v6050_v54  ;;  %v6056_v46 = vld [vmem:[%s7124_s2 + $0x38] sm:$0xff] }
 0x6bf   :  { %2098 = vmatprep.mubr.f32.mxu0 %v7452_v4  ;;  %2211 = vmatprep.mubr.f32.mxu1 %v7452_v4  ;;  %7474 = vst [vmem:[#allocation24_spill] sm:$0xff] %v6056_v46 }
 0x6c0   :  { %2360 = vmatprep.subr.mxu0 %v5715_v49 }
 0x6c2   :  { %2099 = vmatmul.mubr.f32.gmra.mxu0 %v7454_v39  ;;  %2212 = vmatmul.mubr.f32.gmra.mxu1 %v7454_v39  ;;  %v6062_v39 = vld [vmem:[%s7124_s2 + $0x20] sm:$0xff] }
 0x6c3   :  { %2104 = vmatprep.mubr.f32.mxu0 %v7452_v4  ;;  %2217 = vmatprep.mubr.f32.mxu1 %v7452_v4  ;;  %7475 = vst [vmem:[#allocation26_spill] sm:$0xff] %v6062_v39 }
 0x6c6   :  { %2105 = vmatmul.mubr.f32.gmra.mxu0 %v7455_v40  ;;  %2218 = vmatmul.mubr.f32.gmra.mxu1 %v7455_v40  ;;  %v6068_v40 = vld [vmem:[%s7124_s2 + $0x30] sm:$0xff] }
 0x6c7   :  { %2110 = vmatprep.mubr.f32.mxu0 %v7452_v4  ;;  %2223 = vmatprep.mubr.f32.mxu1 %v7452_v4  ;;  %7476 = vst [vmem:[#allocation25_spill] sm:$0xff] %v6068_v40 }
 0x6ca   :  { %2111 = vmatmul.mubr.f32.gmra.mxu0 %v7456_v47  ;;  %2224 = vmatmul.mubr.f32.gmra.mxu1 %v7456_v47  ;;  %v6074_v47 = vld [vmem:[%s7124_s2 + $0x8] sm:$0xff] }
 0x6cb   :  { %2116 = vmatprep.mubr.f32.mxu0 %v7452_v4  ;;  %2229 = vmatprep.mubr.f32.mxu1 %v7452_v4  ;;  %7477 = vst [vmem:[#allocation10_spill] sm:$0xff] %v6074_v47 }
 0x6ce   :  { %2117 = vmatmul.mubr.f32.gmra.mxu0 %v7457_v48  ;;  %2230 = vmatmul.mubr.f32.gmra.mxu1 %v7457_v48  ;;  %v6080_v48 = vld [vmem:[%s7124_s2 + $0x18] sm:$0xff] }
 0x6cf   :  { %2122 = vmatprep.mubr.f32.mxu0 %v7452_v4  ;;  %2235 = vmatprep.mubr.f32.mxu1 %v7452_v4  ;;  %7478 = vst [vmem:[#allocation6_spill] sm:$0xff] %v6080_v48 }
 0x6d2   :  { %2123 = vmatmul.mubr.f32.gmra.mxu0 %v5402_v37  ;;  %2236 = vmatmul.mubr.f32.gmra.mxu1 %v5402_v37  ;;  %v5720_v37 = vld [vmem:[%s7124_s2 + $0x1f8] sm:$0xff] }
 0x6d3   :  { %2128 = vmatprep.mubr.f32.mxu0 %v7452_v4  ;;  %2241 = vmatprep.mubr.f32.mxu1 %v7452_v4  ;;  %7459 = vst [vmem:[#allocation8_spill] sm:$0xff] %v5720_v37 }
 0x6d4   :  { %2431 = vmatprep.subr.mxu1 %v5720_v37 }
 0x6d5   :  { %2432 = vmatpush1.msra.mxu1 %v5732_v43 }
 0x6d6   :  { %2129 = vmatmul.mubr.f32.gmra.mxu0 %v5492_v44  ;;  %2242 = vmatmul.mubr.f32.gmra.mxu1 %v5492_v44  ;;  %v5726_v44 = vld [vmem:[%s7124_s2 + $0x1e0] sm:$0xff] }
 0x6d7   :  { %2134 = vmatprep.mubr.f32.mxu0 %v7452_v4  ;;  %2247 = vmatprep.mubr.f32.mxu1 %v7452_v4 }
 0x6d8   :  { %2361 = vmatpush1.msra.mxu0 %v5726_v44  ;;  %2433 = vmatprep.subr.mxu1 %v5744_v18 }
 0x6d9   :  { %2362 = vmatprep.subr.mxu0 %v5738_v41  ;;  %2434 = vmatpush1.msra.mxu1 %v5756_v38 }
 0x6da   :  { %2363 = vmatpush1.msra.mxu0 %v5750_v42  ;;  %2435 = vmatprep.subr.mxu1 %v5768_v52 }
 0x6db   :  { %2364 = vmatprep.subr.mxu0 %v5762_v45  ;;  %2436 = vmatpush1.msra.mxu1 %v5780_v60 }
 0x6dc   :  { %2365 = vmatpush1.msra.mxu0 %v5774_v58  ;;  %2437 = vmatprep.subr.mxu1 %v5792_v57 }
 0x6dd   :  { %2366 = vmatprep.subr.mxu0 %v5786_v0  ;;  %2438 = vmatpush1.msra.mxu1 %v5804_v55 }
 0x6de   :  { %2367 = vmatpush1.msra.mxu0 %v5798_v6  ;;  %2439 = vmatprep.subr.mxu1 %v5816_v53 }
 0x6df   :  { %2368 = vmatprep.subr.mxu0 %v5810_v50  ;;  %2440 = vmatpush1.msra.mxu1 %v5828_v62 }
 0x6e0   :  { %2369 = vmatpush1.msra.mxu0 %v5822_v59  ;;  %2441 = vmatprep.subr.mxu1 %v5840_v63 }
 0x6e1   :  { %2370 = vmatprep.subr.mxu0 %v5834_v61  ;;  %2442 = vmatpush1.msra.mxu1 %v5857_v2 }
 0x6e2   :  { %2371 = vmatpush1.msra.mxu0 %v5846_v56  ;;  %2443 = vmatprep.subr.mxu1 %v5869_v7 }
 0x6e3   :  { %2372 = vmatprep.subr.mxu0 %v5852_v1  ;;  %2444 = vmatpush1.msra.mxu1 %v5881_v9 }
 0x6e4   :  { %2373 = vmatpush1.msra.mxu0 %v5864_v5  ;;  %2445 = vmatprep.subr.mxu1 %v5888_v10 }
 0x6e5   :  { %2374 = vmatprep.subr.mxu0 %v5874_v8  ;;  %2446 = vmatpush1.msra.mxu1 %v5900_v12 }
 0x6e6   :  { %2375 = vmatpush1.msra.mxu0 %v5894_v11  ;;  %2447 = vmatprep.subr.mxu1 %v5912_v14 }
 0x6e7   :  { %2376 = vmatprep.subr.mxu0 %v5906_v13  ;;  %2448 = vmatpush1.msra.mxu1 %v5924_v16 }
 0x6e8   :  { %2377 = vmatpush1.msra.mxu0 %v5918_v15  ;;  %2449 = vmatprep.subr.mxu1 %v5936_v19 }
 0x6e9   :  { %2378 = vmatprep.subr.mxu0 %v5930_v17  ;;  %2450 = vmatpush1.msra.mxu1 %v5948_v21 }
 0x6ea   :  { %2379 = vmatpush1.msra.mxu0 %v5942_v20  ;;  %2451 = vmatprep.subr.mxu1 %v5960_v23 }
 0x6eb   :  { %2380 = vmatprep.subr.mxu0 %v5954_v22  ;;  %2452 = vmatpush1.msra.mxu1 %v5972_v25 }
 0x6ec   :  { %2381 = vmatpush1.msra.mxu0 %v5966_v24  ;;  %2453 = vmatprep.subr.mxu1 %v5984_v27 }
 0x6ed   :  { %2382 = vmatprep.subr.mxu0 %v5978_v26  ;;  %2454 = vmatpush1.msra.mxu1 %v5996_v29 }
 0x6ee   :  { %2383 = vmatpush1.msra.mxu0 %v5990_v28  ;;  %2455 = vmatprep.subr.mxu1 %v6008_v31 }
 0x6ef   :  { %2384 = vmatprep.subr.mxu0 %v6002_v30  ;;  %2456 = vmatpush1.msra.mxu1 %v6020_v34 }
 0x6f0   :  { %2385 = vmatpush1.msra.mxu0 %v6014_v32  ;;  %2457 = vmatprep.subr.mxu1 %v6032_v3 }
 0x6f1   :  { %2386 = vmatprep.subr.mxu0 %v6026_v35  ;;  %2458 = vmatpush1.msra.mxu1 %v6044_v36  ;;  %v3859_v35 = vld [vmem:[%s7122_s0 + $0xf8] sm:$0xff] }
 0x6f2   :  { %2387 = vmatpush1.msra.mxu0 %v6038_v51  ;;  %2459 = vmatprep.subr.mxu1 %v6056_v46  ;;  %v6086_v46 = vld [vmem:[%s7124_s2] sm:$0xff] }
 0x6f3   :  { %2388 = vmatprep.subr.mxu0 %v6050_v54  ;;  %2460 = vmatpush1.msra.mxu1 %v6068_v40  ;;  %7479 = vst [vmem:[#allocation27_spill] sm:$0xff] %v6086_v46 }
 0x6f4   :  { %2389 = vmatpush1.msra.mxu0 %v6062_v39  ;;  %2461 = vmatprep.subr.mxu1 %v6080_v48  ;;  %v6092_v39 = vld [vmem:[%s7124_s2 + $0x10] sm:$0xff]  ;;  %v3857_v48 = vld [vmem:[%s7122_s0 + $0xe8] sm:$0xff] }
 0x6f5   :  { %2390 = vmatprep.subr.mxu0 %v6074_v47  ;;  %7480 = vst [vmem:[#allocation28_spill] sm:$0xff] %v6092_v39  ;;  %2462 = vmatpush1.msra.mxu1 %v6092_v39  ;;  %v3856_v47 = vld [vmem:[%s7122_s0 + $0xe0] sm:$0xff]  ;;  %v3858_v39 = vld [vmem:[%s7122_s0 + $0xf0] sm:$0xff] }
 0x6f6   :  { %2391 = vmatpush1.msra.mxu0 %v6086_v46  ;;  %2601 = vmatprep.subr.mxu1 %v5720_v37 }
 0x6f7   :  { %2530 = vmatprep.subr.mxu0 %v5715_v49 }
 0x75d   :  { %v1832_v40 = vpop.f32.mrf.mxu0  ;;  %v1903_v49 = vpop.f32.mrf.mxu1 }
 0x75e   :  { %v1908_v54 = vadd.f32 %v3856_v47, %v1832_v40  ;;  %v1910_v46 = vadd.f32 %v3858_v39, %v1903_v49 }
 0x75f   :  { %v1834_v36 = vpop.f32.mrf.mxu0  ;;  %v1905_v34 = vpop.f32.mrf.mxu1 }
 0x760   :  { %v1912_v51 = vmul.f32 0.5, %v1908_v54  ;;  %v1909_v3 = vadd.f32 %v3857_v48, %v1834_v36  ;;  %v1911_v32 = vadd.f32 %v3859_v35, %v1905_v34  ;;  %v7488_v34 = vld [vmem:[#allocation17_spill] sm:$0xff]  ;;  %v7489_v35 = vld [vmem:[#allocation22_spill] sm:$0xff] }
 0x762   :  { %3985 = vtanh.f32 %v1912_v51  ;;  %v1916_v37 = vmul.f32 0.5, %v1909_v3  ;;  %v1921_v40 = vmul.f32 0.5, %v1911_v32  ;;  %v7487_v32 = vld [vmem:[#allocation20_spill] sm:$0xff] }
 0x764   :  { %3987 = vtanh.f32 %v1916_v37 }
 0x765   :  { %3989 = vtanh.f32 %v1910_v46 }
 0x766   :  { %3991 = vtanh.f32 %v1921_v40  ;;  %v7490_v40 = vld [vmem:[#allocation19_spill] sm:$0xff] }
 0x76f   :  { %v3986_v47 = vpop.eup %3985 }
 0x770   :  { %v1914_v54 = vmul.f32 0.5, %v3986_v47  ;;  %v7491_v47 = vld [vmem:[#allocation23_spill] sm:$0xff] }
 0x771   :  { %v3988_v36 = vpop.eup %3987 }
 0x772   :  { %v1915_v48 = vadd.f32 0.5, %v1914_v54  ;;  %v1918_v31 = vmul.f32 0.5, %v3988_v36  ;;  %v3990_v29 = vpop.eup %3989  ;;  %v7492_v54 = vld [vmem:[#allocation21_spill] sm:$0xff]  ;;  %v7493_v36 = vld [vmem:[#allocation24_spill] sm:$0xff] }
 0x773   :  { %v3992_v51 = vpop.eup %3991 }
 0x774   :  { %v1919_v30 = vadd.f32 0.5, %v1918_v31  ;;  %v1926_v49 = vmul.f32 %v3990_v29, %v1915_v48  ;;  %v1923_v39 = vmul.f32 0.5, %v3992_v51  ;;  %v7484_v29 = vld [vmem:[#allocation13_spill] sm:$0xff]  ;;  %v7486_v31 = vld [vmem:[#allocation15_spill] sm:$0xff]  ;;  %v7494_v48 = vld [vmem:[#allocation26_spill] sm:$0xff] }
 0x775   :  { %v7498_v51 = vld [vmem:[#allocation27_spill] sm:$0xff] }
 0x776   :  { %v1925_v3 = vmul.f32 %v1919_v30, %v5489_v33  ;;  %v1924_v28 = vadd.f32 0.5, %v1923_v39  ;;  %v7481_v33 = vld [vmem:[#allocation14_spill] sm:$0xff]  ;;  %v7499_v39 = vld [vmem:[#allocation28_spill] sm:$0xff] }
 0x777   :  { %v7485_v30 = vld [vmem:[#allocation18_spill] sm:$0xff] }
 0x778   :  { %v1927_v37 = vadd.f32 %v1926_v49, %v1925_v3  ;;  %v7495_v3 = vld [vmem:[#allocation25_spill] sm:$0xff]  ;;  %v7496_v49 = vld [vmem:[#allocation10_spill] sm:$0xff] }
 0x77a   :  { %3993 = vtanh.f32 %v1927_v37  ;;  %v7497_v37 = vld [vmem:[#allocation6_spill] sm:$0xff] }
 0x787   :  { %v3994_v27 = vpop.eup %3993 }
 0x788   :  { %v1929_v46 = vmul.f32 %v3994_v27, %v1924_v28  ;;  %v7482_v27 = vld [vmem:[#allocation11_spill] sm:$0xff]  ;;  %v7483_v28 = vld [vmem:[#allocation16_spill] sm:$0xff] }
 0x78a   :  { %2135 = vmatmul.mubr.f32.gmra.mxu0 %v1929_v46  ;;  %2248 = vmatmul.mubr.f32.gmra.mxu1 %v1929_v46  ;;  %v7500_v46 = vld [vmem:[#allocation7_spill] sm:$0xff] }
 0x78b   :  { %2424 = vmatprep.mubr.f32.mxu0 %v7452_v4  ;;  %2495 = vmatprep.mubr.f32.mxu1 %v7452_v4 }
 0x78e   :  { %2425 = vmatmul.mubr.f32.vlgmr.msra.gmra.mxu0 %v7452_v4  ;;  %2496 = vmatmul.mubr.f32.vlgmr.msra.gmra.mxu1 %v7452_v4 }
 0x78f   :  { %2531 = vmatpush1.msra.mxu0 %v5726_v44  ;;  %2602 = vmatpush1.msra.mxu1 %v5732_v43 }
 0x790   :  { %2532 = vmatprep.subr.mxu0 %v5738_v41  ;;  %2603 = vmatprep.subr.mxu1 %v5744_v18 }
 0x791   :  { %2533 = vmatpush1.msra.mxu0 %v5750_v42  ;;  %2604 = vmatpush1.msra.mxu1 %v5756_v38 }
 0x792   :  { %2534 = vmatprep.subr.mxu0 %v5762_v45  ;;  %2605 = vmatprep.subr.mxu1 %v5768_v52 }
 0x793   :  { %2535 = vmatpush1.msra.mxu0 %v5774_v58  ;;  %2606 = vmatpush1.msra.mxu1 %v5780_v60 }
 0x794   :  { %2536 = vmatprep.subr.mxu0 %v5786_v0  ;;  %2607 = vmatprep.subr.mxu1 %v5792_v57 }
 0x795   :  { %2537 = vmatpush1.msra.mxu0 %v5798_v6  ;;  %2608 = vmatpush1.msra.mxu1 %v5804_v55 }
 0x796   :  { %2538 = vmatprep.subr.mxu0 %v5810_v50  ;;  %2609 = vmatprep.subr.mxu1 %v5816_v53 }
 0x797   :  { %2539 = vmatpush1.msra.mxu0 %v5822_v59  ;;  %2610 = vmatpush1.msra.mxu1 %v5828_v62 }
 0x798   :  { %2540 = vmatprep.subr.mxu0 %v5834_v61  ;;  %2611 = vmatprep.subr.mxu1 %v5840_v63 }
 0x799   :  { %2541 = vmatpush1.msra.mxu0 %v5846_v56  ;;  %2612 = vmatpush1.msra.mxu1 %v5857_v2 }
 0x79a   :  { %2542 = vmatprep.subr.mxu0 %v5852_v1  ;;  %2613 = vmatprep.subr.mxu1 %v5869_v7 }
 0x79b   :  { %2543 = vmatpush1.msra.mxu0 %v5864_v5  ;;  %2614 = vmatpush1.msra.mxu1 %v5881_v9 }
 0x79c   :  { %2544 = vmatprep.subr.mxu0 %v5874_v8  ;;  %2615 = vmatprep.subr.mxu1 %v5888_v10 }
 0x79d   :  { %2545 = vmatpush1.msra.mxu0 %v5894_v11  ;;  %2616 = vmatpush1.msra.mxu1 %v5900_v12 }
 0x79e   :  { %2546 = vmatprep.subr.mxu0 %v5906_v13  ;;  %2617 = vmatprep.subr.mxu1 %v5912_v14 }
 0x79f   :  { %2547 = vmatpush1.msra.mxu0 %v5918_v15  ;;  %2618 = vmatpush1.msra.mxu1 %v5924_v16 }
 0x7a0   :  { %2548 = vmatprep.subr.mxu0 %v5930_v17  ;;  %2619 = vmatprep.subr.mxu1 %v5936_v19 }
 0x7a1   :  { %2549 = vmatpush1.msra.mxu0 %v5942_v20  ;;  %2620 = vmatpush1.msra.mxu1 %v5948_v21 }
 0x7a2   :  { %2550 = vmatprep.subr.mxu0 %v5954_v22  ;;  %2621 = vmatprep.subr.mxu1 %v5960_v23 }
 0x7a3   :  { %2551 = vmatpush1.msra.mxu0 %v5966_v24  ;;  %2622 = vmatpush1.msra.mxu1 %v5972_v25 }
 0x7a4   :  { %2552 = vmatprep.subr.mxu0 %v5978_v26  ;;  %2623 = vmatprep.subr.mxu1 %v7481_v33 }
 0x7a5   :  { %2553 = vmatpush1.msra.mxu0 %v7482_v27  ;;  %2624 = vmatpush1.msra.mxu1 %v7483_v28 }
 0x7a6   :  { %2554 = vmatprep.subr.mxu0 %v7484_v29  ;;  %2625 = vmatprep.subr.mxu1 %v7485_v30 }
 0x7a7   :  { %2555 = vmatpush1.msra.mxu0 %v7486_v31  ;;  %2626 = vmatpush1.msra.mxu1 %v7487_v32 }
 0x7a8   :  { %2556 = vmatprep.subr.mxu0 %v7488_v34  ;;  %2627 = vmatprep.subr.mxu1 %v7489_v35 }
 0x7a9   :  { %2557 = vmatpush1.msra.mxu0 %v7490_v40  ;;  %2628 = vmatpush1.msra.mxu1 %v7491_v47 }
 0x7aa   :  { %2558 = vmatprep.subr.mxu0 %v7492_v54  ;;  %2629 = vmatprep.subr.mxu1 %v7493_v36  ;;  %v7501_v54 = vld [vmem:[#allocation8_spill] sm:$0xff]  ;;  %v2094_v36 = vpop.f32.mrf.mxu0 }
 0x7ab   :  { %2559 = vmatpush1.msra.mxu0 %v7494_v48  ;;  %2630 = vmatpush1.msra.mxu1 %v7495_v3  ;;  %v2207_v48 = vpop.f32.mrf.mxu1 }
 0x7ac   :  { %2560 = vmatprep.subr.mxu0 %v7496_v49  ;;  %2631 = vmatprep.subr.mxu1 %v7497_v37  ;;  %v2096_v47 = vpop.f32.mrf.mxu0 }
 0x7ad   :  { %2561 = vmatpush1.msra.mxu0 %v7498_v51  ;;  %2594 = vmatprep.mubr.f32.mxu0 %v7452_v4  ;;  %v2209_v3 = vpop.f32.mrf.mxu1 }
 0x7ae   :  { %2632 = vmatpush1.msra.mxu1 %v7499_v39  ;;  %2665 = vmatprep.mubr.f32.mxu1 %v7452_v4  ;;  %v6181_v40 = vpop.f32.mrf.mxu0 }
 0x7af   :  { %2700 = vmatprep.subr.mxu0 %v7500_v46  ;;  %2771 = vmatprep.subr.mxu1 %v7501_v54  ;;  %7502 = vst [vmem:[#allocation29_spill] sm:$0xff] %v6181_v40  ;;  %v6183_v49 = vpop.f32.mrf.mxu1 }
 0x7b0   :  { %7503 = vst [vmem:[#allocation30_spill] sm:$0xff] %v6183_v49  ;;  %v6185_v37 = vpop.f32.mrf.mxu0 }
 0x7b1   :  { %7504 = vst [vmem:[#allocation31_spill] sm:$0xff] %v6185_v37  ;;  %v6187_v51 = vpop.f32.mrf.mxu1 }
 0x7b2   :  { %7505 = vst [vmem:[#allocation32_spill] sm:$0xff] %v6187_v51  ;;  %v6189_v35 = vpop.f32.mrf.mxu0 }
 0x7b3   :  { %7506 = vst [vmem:[#allocation33_spill] sm:$0xff] %v6189_v35  ;;  %v6191_v39 = vpop.f32.mrf.mxu1 }
 0x7b4   :  { %7507 = vst [vmem:[#allocation34_spill] sm:$0xff] %v6191_v39  ;;  %v6193_v4 = vpop.f32.mrf.mxu0 }
 0x7b5   :  { %7508 = vst [vmem:[#allocation35_spill] sm:$0xff] %v6193_v4  ;;  %v6195_v46 = vpop.f32.mrf.mxu1 }
 0x7b6   :  { %7509 = vst [vmem:[#allocation36_spill] sm:$0xff] %v6195_v46  ;;  %v6197_v54 = vpop.f32.mrf.mxu0  ;;  %v2008_v46 = vlaneseq }
 0x7b7   :  { %7510 = vst [vmem:[#allocation37_spill] sm:$0xff] %v6197_v54  ;;  %v6199_v34 = vpop.f32.mrf.mxu1 }
 0x7b8   :  { %7511 = vst [vmem:[#allocation38_spill] sm:$0xff] %v6199_v34  ;;  %v6201_v32 = vpop.f32.mrf.mxu0 }
 0x7b9   :  { %7512 = vst [vmem:[#allocation39_spill] sm:$0xff] %v6201_v32  ;;  %v6203_v40 = vpop.f32.mrf.mxu1  ;;  %v2009_v32 = vshrl.u32 %v2008_v46, 7 }
 0x7ba   :  { %7513 = vst [vmem:[#allocation40_spill] sm:$0xff] %v6203_v40  ;;  %v6205_v49 = vpop.f32.mrf.mxu0 }
 0x7bb   :  { %7514 = vst [vmem:[#allocation41_spill] sm:$0xff] %v6205_v49  ;;  %v6207_v37 = vpop.f32.mrf.mxu1  ;;  %v2010_v49 = vsub.s32 0, %v2009_v32  ;;  %v2018_v46 = vsub.s32 2, %v2009_v32  ;;  %v2022_v33 = vsub.s32 3, %v2009_v32 }
 0x7bc   :  { %7515 = vst [vmem:[#allocation42_spill] sm:$0xff] %v6207_v37  ;;  %v6209_v51 = vpop.f32.mrf.mxu0  ;;  %v1998_v37 = vld [vmem:[%s7125_s4] sm:$0xf] }
 0x7bd   :  { %7516 = vst [vmem:[#allocation43_spill] sm:$0xff] %v6209_v51  ;;  %v6211_v35 = vpop.f32.mrf.mxu1  ;;  %v6245_v27 = vrot.slane %v1998_v37, %v2018_v46 }
 0x7be   :  { %7517 = vst [vmem:[#allocation44_spill] sm:$0xff] %v6211_v35  ;;  %v6213_v39 = vpop.f32.mrf.mxu0  ;;  %v2014_v35 = vsub.s32 1, %v2009_v32 }
 0x7bf   :  { %7518 = vst [vmem:[#allocation45_spill] sm:$0xff] %v6213_v39  ;;  %v6215_v4 = vpop.f32.mrf.mxu1 }
 0x7c0   :  { %7519 = vst [vmem:[#allocation46_spill] sm:$0xff] %v6215_v4  ;;  %v6217_v54 = vpop.f32.mrf.mxu0  ;;  %v6232_v4 = vrot.slane %v1998_v37, %v2010_v49 }
 0x7c1   :  { %7520 = vst [vmem:[#allocation47_spill] sm:$0xff] %v6217_v54  ;;  %v6219_v34 = vpop.f32.mrf.mxu1 }
 0x7c2   :  { %7521 = vst [vmem:[#allocation48_spill] sm:$0xff] %v6219_v34  ;;  %v6221_v31 = vpop.f32.mrf.mxu0  ;;  %7526 = vst [vmem:[#allocation53_spill] sm:$0xff] %v6232_v4  ;;  %v2095_v30 = vadd.f32 %v2094_v36, %v6232_v4 }
 0x7c3   :  { %7522 = vst [vmem:[#allocation49_spill] sm:$0xff] %v6221_v31  ;;  %v6223_v40 = vpop.f32.mrf.mxu1  ;;  %v6238_v31 = vrot.slane %v1998_v37, %v2014_v35  ;;  %v2208_v35 = vadd.f32 %v2207_v48, %v6245_v27 }
 0x7c4   :  { %7523 = vst [vmem:[#allocation50_spill] sm:$0xff] %v6223_v40  ;;  %v6228_v51 = vpop.f32.mrf.mxu0 }
 0x7c5   :  { %7524 = vst [vmem:[#allocation51_spill] sm:$0xff] %v6228_v51  ;;  %v6230_v39 = vpop.f32.mrf.mxu1  ;;  %7529 = vst [vmem:[#allocation56_spill] sm:$0xff] %v6238_v31 }
 0x7c6   :  { %7525 = vst [vmem:[#allocation52_spill] sm:$0xff] %v6230_v39  ;;  %v2097_v39 = vadd.f32 %v2096_v47, %v6238_v31 }
 0x84a   :  { %v6234_v54 = vpop.f32.mrf.mxu0  ;;  %v6236_v34 = vpop.f32.mrf.mxu1 }
 0x84b   :  { %7527 = vst [vmem:[#allocation54_spill] sm:$0xff] %v6234_v54  ;;  %7528 = vst [vmem:[#allocation55_spill] sm:$0xff] %v6236_v34 }
 0x84c   :  { %v6240_v40 = vpop.f32.mrf.mxu0  ;;  %v6243_v29 = vpop.f32.mrf.mxu1 }
 0x84d   :  { %7530 = vst [vmem:[#allocation57_spill] sm:$0xff] %v6240_v40  ;;  %7531 = vst [vmem:[#allocation58_spill] sm:$0xff] %v6243_v29  ;;  %v6249_v40 = vrot.slane %v1998_v37, %v2022_v33 }
 0x84e   :  { %v2426_v28 = vpop.f32.mrf.mxu0  ;;  %v2497_v34 = vpop.f32.mrf.mxu1 }
 0x84f   :  { %v2502_v49 = vadd.f32 %v2426_v28, %v2095_v30  ;;  %v2504_v36 = vadd.f32 %v2497_v34, %v2208_v35  ;;  %v2210_v46 = vadd.f32 %v2209_v3, %v6249_v40  ;;  %v7533_v35 = vld [vmem:[#allocation9_spill] sm:$0xff] }
 0x850   :  { %v2428_v51 = vpop.f32.mrf.mxu0  ;;  %v2499_v29 = vpop.f32.mrf.mxu1 }
 0x851   :  { %v2506_v54 = vmul.f32 0.5, %v2502_v49  ;;  %v2503_v26 = vadd.f32 %v2428_v51, %v2097_v39  ;;  %v2505_v4 = vadd.f32 %v2499_v29, %v2210_v46  ;;  %v7535_v46 = vld [vmem:[#allocation11_spill] sm:$0xff] }
 0x853   :  { %3995 = vtanh.f32 %v2506_v54  ;;  %v2510_v25 = vmul.f32 0.5, %v2503_v26  ;;  %v2515_v47 = vmul.f32 0.5, %v2505_v4  ;;  %v7532_v4 = vld [vmem:[#allocation12_spill] sm:$0xff] }
 0x855   :  { %3997 = vtanh.f32 %v2510_v25 }
 0x856   :  { %3999 = vtanh.f32 %v2504_v36  ;;  %v7534_v36 = vld [vmem:[#allocation14_spill] sm:$0xff] }
 0x857   :  { %4001 = vtanh.f32 %v2515_v47  ;;  %v7536_v47 = vld [vmem:[#allocation16_spill] sm:$0xff] }
 0x860   :  { %v3996_v28 = vpop.eup %3995 }
 0x861   :  { %v2508_v30 = vmul.f32 0.5, %v3996_v28  ;;  %v7537_v28 = vld [vmem:[#allocation13_spill] sm:$0xff] }
 0x862   :  { %v3998_v32 = vpop.eup %3997 }
 0x863   :  { %v2509_v49 = vadd.f32 0.5, %v2508_v30  ;;  %v2512_v51 = vmul.f32 0.5, %v3998_v32  ;;  %v4000_v48 = vpop.eup %3999  ;;  %v7538_v30 = vld [vmem:[#allocation18_spill] sm:$0xff]  ;;  %v7539_v32 = vld [vmem:[#allocation15_spill] sm:$0xff] }
 0x864   :  { %v4002_v25 = vpop.eup %4001 }
 0x865   :  { %v2513_v39 = vadd.f32 0.5, %v2512_v51  ;;  %v2520_v26 = vmul.f32 %v4000_v48, %v2509_v49  ;;  %v2517_v34 = vmul.f32 0.5, %v4002_v25  ;;  %v7540_v49 = vld [vmem:[#allocation20_spill] sm:$0xff]  ;;  %v7541_v51 = vld [vmem:[#allocation17_spill] sm:$0xff]  ;;  %v7543_v48 = vld [vmem:[#allocation19_spill] sm:$0xff] }
 0x866   :  { %v7546_v25 = vld [vmem:[#allocation24_spill] sm:$0xff] }
 0x867   :  { %v2519_v54 = vmul.f32 0.0, %v2513_v39  ;;  %v2518_v3 = vadd.f32 0.5, %v2517_v34  ;;  %v7542_v39 = vld [vmem:[#allocation22_spill] sm:$0xff] }
 0x868   :  { %v7547_v34 = vld [vmem:[#allocation26_spill] sm:$0xff] }
 0x869   :  { %v6252_v33 = vadd.f32 %v2520_v26, %v2519_v54  ;;  %v7544_v54 = vld [vmem:[#allocation23_spill] sm:$0xff]  ;;  %v7545_v26 = vld [vmem:[#allocation21_spill] sm:$0xff] }
 0x86b   :  { %4003 = vtanh.f32 %v6252_v33 }
 0x878   :  { %v4004_v37 = vpop.eup %4003 }
 0x879   :  { %v2523_v29 = vmul.f32 %v4004_v37, %v2518_v3  ;;  %v7548_v3 = vld [vmem:[#allocation25_spill] sm:$0xff]  ;;  %v7549_v37 = vld [vmem:[#allocation10_spill] sm:$0xff] }
 0x87b   :  { %2595 = vmatmul.mubr.f32.vlgmr.msra.gmra.mxu0 %v2523_v29  ;;  %2666 = vmatmul.mubr.f32.vlgmr.msra.gmra.mxu1 %v2523_v29  ;;  %v7550_v29 = vld [vmem:[#allocation6_spill] sm:$0xff] }
 0x87c   :  { %2701 = vmatpush1.msra.mxu0 %v5726_v44  ;;  %2772 = vmatpush1.msra.mxu1 %v5732_v43 }
 0x87d   :  { %2702 = vmatprep.subr.mxu0 %v5738_v41  ;;  %2773 = vmatprep.subr.mxu1 %v5744_v18 }
 0x87e   :  { %2703 = vmatpush1.msra.mxu0 %v5750_v42  ;;  %2774 = vmatpush1.msra.mxu1 %v5756_v38 }
 0x87f   :  { %2704 = vmatprep.subr.mxu0 %v5762_v45  ;;  %2775 = vmatprep.subr.mxu1 %v5768_v52 }
 0x880   :  { %2705 = vmatpush1.msra.mxu0 %v5774_v58  ;;  %2776 = vmatpush1.msra.mxu1 %v5780_v60 }
 0x881   :  { %2706 = vmatprep.subr.mxu0 %v5786_v0  ;;  %2777 = vmatprep.subr.mxu1 %v5792_v57 }
 0x882   :  { %2707 = vmatpush1.msra.mxu0 %v5798_v6  ;;  %2778 = vmatpush1.msra.mxu1 %v5804_v55 }
 0x883   :  { %2708 = vmatprep.subr.mxu0 %v5810_v50  ;;  %2779 = vmatprep.subr.mxu1 %v5816_v53 }
 0x884   :  { %2709 = vmatpush1.msra.mxu0 %v5822_v59  ;;  %2780 = vmatpush1.msra.mxu1 %v5828_v62 }
 0x885   :  { %2710 = vmatprep.subr.mxu0 %v5834_v61  ;;  %2781 = vmatprep.subr.mxu1 %v5840_v63 }
 0x886   :  { %2711 = vmatpush1.msra.mxu0 %v5846_v56  ;;  %2782 = vmatpush1.msra.mxu1 %v5857_v2 }
 0x887   :  { %2712 = vmatprep.subr.mxu0 %v5852_v1  ;;  %2783 = vmatprep.subr.mxu1 %v5869_v7 }
 0x888   :  { %2713 = vmatpush1.msra.mxu0 %v5864_v5  ;;  %2784 = vmatpush1.msra.mxu1 %v5881_v9 }
 0x889   :  { %2714 = vmatprep.subr.mxu0 %v5874_v8  ;;  %2785 = vmatprep.subr.mxu1 %v5888_v10 }
 0x88a   :  { %2715 = vmatpush1.msra.mxu0 %v5894_v11  ;;  %2786 = vmatpush1.msra.mxu1 %v5900_v12 }
 0x88b   :  { %2716 = vmatprep.subr.mxu0 %v5906_v13  ;;  %2787 = vmatprep.subr.mxu1 %v5912_v14 }
 0x88c   :  { %2717 = vmatpush1.msra.mxu0 %v5918_v15  ;;  %2788 = vmatpush1.msra.mxu1 %v5924_v16 }
 0x88d   :  { %2718 = vmatprep.subr.mxu0 %v5930_v17  ;;  %2789 = vmatprep.subr.mxu1 %v5936_v19 }
 0x88e   :  { %2719 = vmatpush1.msra.mxu0 %v5942_v20  ;;  %2790 = vmatpush1.msra.mxu1 %v5948_v21 }
 0x88f   :  { %2720 = vmatprep.subr.mxu0 %v5954_v22  ;;  %2791 = vmatprep.subr.mxu1 %v5960_v23 }
 0x890   :  { %2721 = vmatpush1.msra.mxu0 %v5966_v24  ;;  %2792 = vmatpush1.msra.mxu1 %v7532_v4 }
 0x891   :  { %2722 = vmatprep.subr.mxu0 %v7533_v35  ;;  %2793 = vmatprep.subr.mxu1 %v7534_v36 }
 0x892   :  { %2723 = vmatpush1.msra.mxu0 %v7535_v46  ;;  %2794 = vmatpush1.msra.mxu1 %v7536_v47 }
 0x893   :  { %2724 = vmatprep.subr.mxu0 %v7537_v28  ;;  %2795 = vmatprep.subr.mxu1 %v7538_v30  ;;  %v7559_v28 = vld [vmem:[#allocation30_spill] sm:$0xff] }
 0x894   :  { %2725 = vmatpush1.msra.mxu0 %v7539_v32  ;;  %2796 = vmatpush1.msra.mxu1 %v7540_v49  ;;  %v7551_v49 = vld [vmem:[#allocation27_spill] sm:$0xff]  ;;  %v2214_v47 = vadd.f32 %v7559_v28, %v6245_v27 }
 0x895   :  { %2726 = vmatprep.subr.mxu0 %v7541_v51  ;;  %2797 = vmatprep.subr.mxu1 %v7542_v39  ;;  %v7552_v51 = vmov 0.0   ;;  %v7553_v39 = vld [vmem:[#allocation28_spill] sm:$0xff] }
 0x896   :  { %2727 = vmatpush1.msra.mxu0 %v7543_v48  ;;  %2798 = vmatpush1.msra.mxu1 %v7544_v54  ;;  %v7554_v54 = vld [vmem:[#allocation7_spill] sm:$0xff] }
 0x897   :  { %2728 = vmatprep.subr.mxu0 %v7545_v26  ;;  %2799 = vmatprep.subr.mxu1 %v7546_v25  ;;  %v7555_v26 = vld [vmem:[#allocation8_spill] sm:$0xff]  ;;  %v7556_v25 = vld [vmem:[#allocation53_spill] sm:$0xff] }
 0x898   :  { %2729 = vmatpush1.msra.mxu0 %v7547_v34  ;;  %2800 = vmatpush1.msra.mxu1 %v7548_v3  ;;  %v7557_v34 = vld [vmem:[#allocation29_spill] sm:$0xff] }
 0x899   :  { %2730 = vmatprep.subr.mxu0 %v7549_v37  ;;  %2801 = vmatprep.subr.mxu1 %v7550_v29  ;;  %v2101_v48 = vadd.f32 %v7557_v34, %v7556_v25  ;;  %v7558_v37 = vld [vmem:[#allocation31_spill] sm:$0xff]  ;;  %v7560_v34 = vld [vmem:[#allocation32_spill] sm:$0xff] }
 0x89a   :  { %2731 = vmatpush1.msra.mxu0 %v7551_v49  ;;  %2764 = vmatprep.mubr.f32.mxu0 %v7552_v51  ;;  %v2103_v32 = vadd.f32 %v7558_v37, %v6238_v31  ;;  %v2216_v25 = vadd.f32 %v7560_v34, %v6249_v40  ;;  %v7578_v34 = vld [vmem:[#allocation10_spill] sm:$0xff] }
 0x89b   :  { %2802 = vmatpush1.msra.mxu1 %v7553_v39  ;;  %2835 = vmatprep.mubr.f32.mxu1 %v7552_v51 }
 0x89c   :  { %2870 = vmatprep.subr.mxu0 %v7554_v54  ;;  %2941 = vmatprep.subr.mxu1 %v7555_v26 }
 0x93b   :  { %v2596_v3 = vpop.f32.mrf.mxu0  ;;  %v2667_v30 = vpop.f32.mrf.mxu1 }
 0x93c   :  { %v2672_v29 = vadd.f32 %v2596_v3, %v2101_v48  ;;  %v2674_v51 = vadd.f32 %v2667_v30, %v2214_v47 }
 0x93d   :  { %v2598_v49 = vpop.f32.mrf.mxu0  ;;  %v2669_v26 = vpop.f32.mrf.mxu1 }
 0x93e   :  { %v2676_v39 = vmul.f32 0.5, %v2672_v29  ;;  %v2673_v46 = vadd.f32 %v2598_v49, %v2103_v32  ;;  %v2675_v36 = vadd.f32 %v2669_v26, %v2216_v25  ;;  %v7576_v26 = vld [vmem:[#allocation26_spill] sm:$0xff]  ;;  %v7577_v25 = vld [vmem:[#allocation25_spill] sm:$0xff] }
 0x940   :  { %4005 = vtanh.f32 %v2676_v39  ;;  %v2680_v54 = vmul.f32 0.5, %v2673_v46  ;;  %v2685_v35 = vmul.f32 0.5, %v2675_v36 }
 0x942   :  { %4007 = vtanh.f32 %v2680_v54  ;;  %v7575_v54 = vld [vmem:[#allocation24_spill] sm:$0xff] }
 0x943   :  { %4009 = vtanh.f32 %v2674_v51 }
 0x944   :  { %4011 = vtanh.f32 %v2685_v35  ;;  %v7574_v35 = vld [vmem:[#allocation21_spill] sm:$0xff] }
 0x94d   :  { %v4006_v37 = vpop.eup %4005 }
 0x94e   :  { %v2678_v48 = vmul.f32 0.5, %v4006_v37  ;;  %v7579_v37 = vld [vmem:[#allocation6_spill] sm:$0xff] }
 0x94f   :  { %v4008_v3 = vpop.eup %4007 }
 0x950   :  { %v2679_v31 = vadd.f32 0.5, %v2678_v48  ;;  %v2682_v4 = vmul.f32 0.5, %v4008_v3  ;;  %v4010_v28 = vpop.eup %4009  ;;  %v7580_v48 = vld [vmem:[#allocation27_spill] sm:$0xff]  ;;  %v7581_v3 = vmov 0.0  }
 0x951   :  { %v4012_v30 = vpop.eup %4011 }
 0x952   :  { %v2683_v29 = vadd.f32 0.5, %v2682_v4  ;;  %v2690_v32 = vmul.f32 %v4010_v28, %v2679_v31  ;;  %v2687_v49 = vmul.f32 0.5, %v4012_v30  ;;  %v7571_v31 = vld [vmem:[#allocation22_spill] sm:$0xff]  ;;  %v7573_v4 = vld [vmem:[#allocation23_spill] sm:$0xff]  ;;  %v7582_v28 = vld [vmem:[#allocation28_spill] sm:$0xff] }
 0x953   :  { %v7586_v30 = vld [vmem:[#allocation33_spill] sm:$0xff] }
 0x954   :  { %v2689_v47 = vmul.f32 %v2683_v29, %v6252_v33  ;;  %v2688_v51 = vadd.f32 0.5, %v2687_v49  ;;  %v7572_v33 = vld [vmem:[#allocation19_spill] sm:$0xff] }
 0x955   :  { %v7583_v29 = vld [vmem:[#allocation7_spill] sm:$0xff] }
 0x956   :  { %v6330_v46 = vadd.f32 %v2690_v32, %v2689_v47  ;;  %v7584_v32 = vld [vmem:[#allocation8_spill] sm:$0xff]  ;;  %v7585_v47 = vld [vmem:[#allocation53_spill] sm:$0xff] }
 0x957   :  { %v2107_v49 = vadd.f32 %v7586_v30, %v7585_v47  ;;  %v7590_v30 = vld [vmem:[#allocation36_spill] sm:$0xff] }
 0x958   :  { %4013 = vtanh.f32 %v6330_v46  ;;  %v2222_v47 = vadd.f32 %v7590_v30, %v6249_v40  ;;  %v6456_v30 = vld [vmem:[%s7124_s2 + $0x1b8] sm:$0xff] }
 0x965   :  { %v4014_v39 = vpop.eup %4013 }
 0x966   :  { %v2693_v36 = vmul.f32 %v4014_v39, %v2688_v51  ;;  %v7587_v39 = vld [vmem:[#allocation56_spill] sm:$0xff] }
 0x968   :  { %2765 = vmatmul.mubr.f32.vlgmr.msra.gmra.mxu0 %v2693_v36  ;;  %2836 = vmatmul.mubr.f32.vlgmr.msra.gmra.mxu1 %v2693_v36  ;;  %v7588_v36 = vld [vmem:[#allocation35_spill] sm:$0xff] }
 0x969   :  { %2871 = vmatpush1.msra.mxu0 %v5726_v44  ;;  %2942 = vmatpush1.msra.mxu1 %v5732_v43  ;;  %v7561_v44 = vld [vmem:[#allocation12_spill] sm:$0xff]  ;;  %v7562_v43 = vld [vmem:[#allocation9_spill] sm:$0xff] }
 0x96a   :  { %2872 = vmatprep.subr.mxu0 %v5738_v41  ;;  %2943 = vmatprep.subr.mxu1 %v5744_v18  ;;  %v7563_v41 = vld [vmem:[#allocation14_spill] sm:$0xff]  ;;  %v7564_v18 = vld [vmem:[#allocation11_spill] sm:$0xff] }
 0x96b   :  { %2873 = vmatpush1.msra.mxu0 %v5750_v42  ;;  %2944 = vmatpush1.msra.mxu1 %v5756_v38  ;;  %v7565_v42 = vld [vmem:[#allocation16_spill] sm:$0xff]  ;;  %v7566_v38 = vld [vmem:[#allocation13_spill] sm:$0xff] }
 0x96c   :  { %2874 = vmatprep.subr.mxu0 %v5762_v45  ;;  %2945 = vmatprep.subr.mxu1 %v5768_v52  ;;  %v7567_v45 = vld [vmem:[#allocation18_spill] sm:$0xff]  ;;  %v7568_v52 = vld [vmem:[#allocation15_spill] sm:$0xff] }
 0x96d   :  { %2875 = vmatpush1.msra.mxu0 %v5774_v58  ;;  %2946 = vmatpush1.msra.mxu1 %v5780_v60  ;;  %v7569_v58 = vld [vmem:[#allocation20_spill] sm:$0xff]  ;;  %v7570_v60 = vld [vmem:[#allocation17_spill] sm:$0xff] }
 0x96e   :  { %2876 = vmatprep.subr.mxu0 %v5786_v0  ;;  %2947 = vmatprep.subr.mxu1 %v5792_v57 }
 0x96f   :  { %2877 = vmatpush1.msra.mxu0 %v5798_v6  ;;  %2948 = vmatpush1.msra.mxu1 %v5804_v55 }
 0x970   :  { %2878 = vmatprep.subr.mxu0 %v5810_v50  ;;  %2949 = vmatprep.subr.mxu1 %v5816_v53 }
 0x971   :  { %2879 = vmatpush1.msra.mxu0 %v5822_v59  ;;  %2950 = vmatpush1.msra.mxu1 %v5828_v62 }
 0x972   :  { %2880 = vmatprep.subr.mxu0 %v5834_v61  ;;  %2951 = vmatprep.subr.mxu1 %v5840_v63 }
 0x973   :  { %2881 = vmatpush1.msra.mxu0 %v5846_v56  ;;  %2952 = vmatpush1.msra.mxu1 %v5857_v2 }
 0x974   :  { %2882 = vmatprep.subr.mxu0 %v5852_v1  ;;  %2953 = vmatprep.subr.mxu1 %v5869_v7 }
 0x975   :  { %2883 = vmatpush1.msra.mxu0 %v5864_v5  ;;  %2954 = vmatpush1.msra.mxu1 %v5881_v9 }
 0x976   :  { %2884 = vmatprep.subr.mxu0 %v5874_v8  ;;  %2955 = vmatprep.subr.mxu1 %v5888_v10 }
 0x977   :  { %2885 = vmatpush1.msra.mxu0 %v5894_v11  ;;  %2956 = vmatpush1.msra.mxu1 %v5900_v12 }
 0x978   :  { %2886 = vmatprep.subr.mxu0 %v5906_v13  ;;  %2957 = vmatprep.subr.mxu1 %v5912_v14 }
 0x979   :  { %2887 = vmatpush1.msra.mxu0 %v5918_v15  ;;  %2958 = vmatpush1.msra.mxu1 %v5924_v16 }
 0x97a   :  { %2888 = vmatprep.subr.mxu0 %v5930_v17  ;;  %2959 = vmatprep.subr.mxu1 %v5936_v19 }
 0x97b   :  { %2889 = vmatpush1.msra.mxu0 %v5942_v20  ;;  %2960 = vmatpush1.msra.mxu1 %v5948_v21 }
 0x97c   :  { %2890 = vmatprep.subr.mxu0 %v5954_v22  ;;  %2961 = vmatprep.subr.mxu1 %v5960_v23 }
 0x97d   :  { %2891 = vmatpush1.msra.mxu0 %v5966_v24  ;;  %2962 = vmatpush1.msra.mxu1 %v7561_v44 }
 0x97e   :  { %2892 = vmatprep.subr.mxu0 %v7562_v43  ;;  %2963 = vmatprep.subr.mxu1 %v7563_v41 }
 0x97f   :  { %2893 = vmatpush1.msra.mxu0 %v7564_v18  ;;  %2964 = vmatpush1.msra.mxu1 %v7565_v42 }
 0x980   :  { %2894 = vmatprep.subr.mxu0 %v7566_v38  ;;  %2965 = vmatprep.subr.mxu1 %v7567_v45 }
 0x981   :  { %2895 = vmatpush1.msra.mxu0 %v7568_v52  ;;  %2966 = vmatpush1.msra.mxu1 %v7569_v58 }
 0x982   :  { %2896 = vmatprep.subr.mxu0 %v7570_v60  ;;  %2967 = vmatprep.subr.mxu1 %v7571_v31 }
 0x983   :  { %2897 = vmatpush1.msra.mxu0 %v7572_v33  ;;  %2968 = vmatpush1.msra.mxu1 %v7573_v4 }
 0x984   :  { %2898 = vmatprep.subr.mxu0 %v7574_v35  ;;  %2969 = vmatprep.subr.mxu1 %v7575_v54 }
 0x985   :  { %2899 = vmatpush1.msra.mxu0 %v7576_v26  ;;  %2970 = vmatpush1.msra.mxu1 %v7577_v25  ;;  %v7589_v26 = vld [vmem:[#allocation34_spill] sm:$0xff] }
 0x986   :  { %2900 = vmatprep.subr.mxu0 %v7578_v34  ;;  %2971 = vmatprep.subr.mxu1 %v7579_v37  ;;  %v2109_v34 = vadd.f32 %v7588_v36, %v7587_v39  ;;  %v2220_v54 = vadd.f32 %v7589_v26, %v6245_v27 }
 0x987   :  { %2901 = vmatpush1.msra.mxu0 %v7580_v48  ;;  %2934 = vmatprep.mubr.f32.mxu0 %v7581_v3 }
 0x988   :  { %2972 = vmatpush1.msra.mxu1 %v7582_v28  ;;  %3005 = vmatprep.mubr.f32.mxu1 %v7581_v3 }
 0x989   :  { %3040 = vmatprep.subr.mxu0 %v7583_v29  ;;  %3111 = vmatprep.subr.mxu1 %v7584_v32 }
 0xa28   :  { %v2766_v51 = vpop.f32.mrf.mxu0  ;;  %v2837_v25 = vpop.f32.mrf.mxu1 }
 0xa29   :  { %v2842_v37 = vadd.f32 %v2766_v51, %v2107_v49  ;;  %v2844_v3 = vadd.f32 %v2837_v25, %v2220_v54 }
 0xa2a   :  { %v2768_v48 = vpop.f32.mrf.mxu0  ;;  %v2839_v32 = vpop.f32.mrf.mxu1 }
 0xa2b   :  { %v2846_v28 = vmul.f32 0.5, %v2842_v37  ;;  %v2843_v35 = vadd.f32 %v2768_v48, %v2109_v34  ;;  %v2845_v4 = vadd.f32 %v2839_v32, %v2222_v47  ;;  %v6432_v47 = vld [vmem:[%s7124_s2 + $0x1d8] sm:$0xff]  ;;  %v6450_v32 = vld [vmem:[%s7124_s2 + $0x1a8] sm:$0xff] }
 0xa2d   :  { %4015 = vtanh.f32 %v2846_v28  ;;  %v2850_v29 = vmul.f32 0.5, %v2843_v35  ;;  %v2855_v33 = vmul.f32 0.5, %v2845_v4 }
 0xa2f   :  { %4017 = vtanh.f32 %v2850_v29  ;;  %v6444_v29 = vld [vmem:[%s7124_s2 + $0x1d0] sm:$0xff] }
 0xa30   :  { %4019 = vtanh.f32 %v2844_v3 }
 0xa31   :  { %4021 = vtanh.f32 %v2855_v33  ;;  %v6414_v33 = vld [vmem:[%s7124_s2 + $0x1e0] sm:$0xff] }
 0xa3a   :  { %v4016_v36 = vpop.eup %4015 }
 0xa3b   :  { %v2848_v49 = vmul.f32 0.5, %v4016_v36  ;;  %v6462_v36 = vld [vmem:[%s7124_s2 + $0x1a0] sm:$0xff] }
 0xa3c   :  { %v4018_v51 = vpop.eup %4017 }
 0xa3d   :  { %v2849_v39 = vadd.f32 0.5, %v2848_v49  ;;  %v2852_v31 = vmul.f32 0.5, %v4018_v51  ;;  %v4020_v26 = vpop.eup %4019  ;;  %v6468_v49 = vld [vmem:[%s7124_s2 + $0x1b0] sm:$0xff] }
 0xa3e   :  { %v4022_v25 = vpop.eup %4021 }
 0xa3f   :  { %v2853_v37 = vadd.f32 0.5, %v2852_v31  ;;  %v2860_v34 = vmul.f32 %v4020_v26, %v2849_v39  ;;  %v2857_v48 = vmul.f32 0.5, %v4022_v25  ;;  %v6426_v31 = vld [vmem:[%s7124_s2 + $0x1c8] sm:$0xff]  ;;  %v6438_v39 = vld [vmem:[%s7124_s2 + $0x1c0] sm:$0xff] }
 0xa41   :  { %v2859_v54 = vmul.f32 %v2853_v37, %v6330_v46  ;;  %v2858_v3 = vadd.f32 0.5, %v2857_v48  ;;  %v6420_v46 = vld [vmem:[%s7124_s2 + $0x1f0] sm:$0xff] }
 0xa43   :  { %v6408_v35 = vadd.f32 %v2860_v34, %v2859_v54 }
 0xa45   :  { %4023 = vtanh.f32 %v6408_v35 }
 0xa52   :  { %v4024_v28 = vpop.eup %4023 }
 0xa53   :  { %v2863_v4 = vmul.f32 %v4024_v28, %v2858_v3 }
 0xa55   :  { %2935 = vmatmul.mubr.f32.vlgmr.msra.gmra.mxu0 %v2863_v4  ;;  %3006 = vmatmul.mubr.f32.vlgmr.msra.gmra.mxu1 %v2863_v4  ;;  %v6568_v4 = vld [vmem:[%s7124_s2 + $0x198] sm:$0xff] }
 0xa56   :  { %3041 = vmatpush1.msra.mxu0 %v6414_v33  ;;  %3112 = vmatpush1.msra.mxu1 %v6420_v46 }
 0xa57   :  { %3042 = vmatprep.subr.mxu0 %v6426_v31  ;;  %3113 = vmatprep.subr.mxu1 %v6432_v47 }
 0xa58   :  { %3043 = vmatpush1.msra.mxu0 %v6438_v39  ;;  %3114 = vmatpush1.msra.mxu1 %v6444_v29 }
 0xa59   :  { %3044 = vmatprep.subr.mxu0 %v6450_v32  ;;  %3115 = vmatprep.subr.mxu1 %v6456_v30 }
 0xa5a   :  { %3045 = vmatpush1.msra.mxu0 %v6462_v36  ;;  %3116 = vmatpush1.msra.mxu1 %v6468_v49 }
 0xa5b   :  { %3046 = vmatprep.subr.mxu0 %v5786_v0  ;;  %3117 = vmatprep.subr.mxu1 %v5792_v57  ;;  %v7591_v0 = vld [vmem:[#allocation22_spill] sm:$0xff]  ;;  %v7592_v57 = vld [vmem:[#allocation19_spill] sm:$0xff] }
 0xa5c   :  { %3047 = vmatpush1.msra.mxu0 %v5798_v6  ;;  %3118 = vmatpush1.msra.mxu1 %v5804_v55  ;;  %v7593_v6 = vld [vmem:[#allocation23_spill] sm:$0xff]  ;;  %v7594_v55 = vld [vmem:[#allocation21_spill] sm:$0xff] }
 0xa5d   :  { %3048 = vmatprep.subr.mxu0 %v5810_v50  ;;  %3119 = vmatprep.subr.mxu1 %v5816_v53  ;;  %v7595_v50 = vld [vmem:[#allocation24_spill] sm:$0xff]  ;;  %v7596_v53 = vld [vmem:[#allocation26_spill] sm:$0xff] }
 0xa5e   :  { %3049 = vmatpush1.msra.mxu0 %v5822_v59  ;;  %3120 = vmatpush1.msra.mxu1 %v5828_v62  ;;  %v7597_v59 = vld [vmem:[#allocation25_spill] sm:$0xff]  ;;  %v7598_v62 = vld [vmem:[#allocation10_spill] sm:$0xff] }
 0xa5f   :  { %3050 = vmatprep.subr.mxu0 %v5834_v61  ;;  %3121 = vmatprep.subr.mxu1 %v5840_v63  ;;  %v7599_v61 = vld [vmem:[#allocation6_spill] sm:$0xff]  ;;  %v7600_v63 = vld [vmem:[#allocation27_spill] sm:$0xff] }
 0xa60   :  { %3051 = vmatpush1.msra.mxu0 %v5846_v56  ;;  %3122 = vmatpush1.msra.mxu1 %v5857_v2  ;;  %v7601_v56 = vmov 0.0   ;;  %v6528_v2 = vld [vmem:[%s7124_s2 + $0x1e8] sm:$0xff] }
 0xa61   :  { %3052 = vmatprep.subr.mxu0 %v5852_v1  ;;  %3123 = vmatprep.subr.mxu1 %v5869_v7  ;;  %v7602_v1 = vld [vmem:[#allocation28_spill] sm:$0xff]  ;;  %7603 = vst [vmem:[#allocation29_spill] sm:$0xff] %v6528_v2  ;;  %v7605_v7 = vld [vmem:[#allocation53_spill] sm:$0xff] }
 0xa62   :  { %3053 = vmatpush1.msra.mxu0 %v5864_v5  ;;  %3124 = vmatpush1.msra.mxu1 %v5881_v9  ;;  %v6534_v5 = vld [vmem:[%s7124_s2 + $0x1f8] sm:$0xff] }
 0xa63   :  { %3054 = vmatprep.subr.mxu0 %v5874_v8  ;;  %3125 = vmatprep.subr.mxu1 %v5888_v10  ;;  %7604 = vst [vmem:[#allocation31_spill] sm:$0xff] %v6534_v5  ;;  %v7606_v8 = vld [vmem:[#allocation37_spill] sm:$0xff] }
 0xa64   :  { %3055 = vmatpush1.msra.mxu0 %v5894_v11  ;;  %3126 = vmatpush1.msra.mxu1 %v5900_v12  ;;  %v2113_v9 = vadd.f32 %v7606_v8, %v7605_v7  ;;  %v7607_v11 = vld [vmem:[#allocation56_spill] sm:$0xff]  ;;  %v7608_v12 = vld [vmem:[#allocation39_spill] sm:$0xff]  ;;  %v6640_v8 = vld [vmem:[%s7124_s2 + $0x138] sm:$0xff] }
 0xa65   :  { %3056 = vmatprep.subr.mxu0 %v5906_v13  ;;  %3127 = vmatprep.subr.mxu1 %v5912_v14  ;;  %v2115_v13 = vadd.f32 %v7608_v12, %v7607_v11  ;;  %v6658_v12 = vld [vmem:[%s7124_s2 + $0x108] sm:$0xff] }
 0xa66   :  { %3057 = vmatpush1.msra.mxu0 %v5918_v15  ;;  %3128 = vmatpush1.msra.mxu1 %v5924_v16 }
 0xa67   :  { %3058 = vmatprep.subr.mxu0 %v5930_v17  ;;  %3129 = vmatprep.subr.mxu1 %v5936_v19  ;;  %v7609_v17 = vld [vmem:[#allocation38_spill] sm:$0xff] }
 0xa68   :  { %3059 = vmatpush1.msra.mxu0 %v5942_v20  ;;  %3130 = vmatpush1.msra.mxu1 %v5948_v21  ;;  %v2226_v19 = vadd.f32 %v7609_v17, %v6245_v27  ;;  %v6688_v17 = vld [vmem:[%s7124_s2 + $0xf8] sm:$0xff] }
 0xa69   :  { %3060 = vmatprep.subr.mxu0 %v5954_v22  ;;  %3131 = vmatprep.subr.mxu1 %v5960_v23 }
 0xa6a   :  { %3061 = vmatpush1.msra.mxu0 %v5966_v24  ;;  %3132 = vmatpush1.msra.mxu1 %v7561_v44  ;;  %v7610_v44 = vld [vmem:[#allocation40_spill] sm:$0xff] }
 0xa6b   :  { %3062 = vmatprep.subr.mxu0 %v7562_v43  ;;  %3133 = vmatprep.subr.mxu1 %v7563_v41  ;;  %v2228_v43 = vadd.f32 %v7610_v44, %v6249_v40  ;;  %v6730_v44 = vld [vmem:[%s7124_s2 + $0xa8] sm:$0xff] }
 0xa6c   :  { %3063 = vmatpush1.msra.mxu0 %v7564_v18  ;;  %3134 = vmatpush1.msra.mxu1 %v7565_v42 }
 0xa6d   :  { %3064 = vmatprep.subr.mxu0 %v7566_v38  ;;  %3135 = vmatprep.subr.mxu1 %v7567_v45 }
 0xa6e   :  { %3065 = vmatpush1.msra.mxu0 %v7568_v52  ;;  %3136 = vmatpush1.msra.mxu1 %v7569_v58 }
 0xa6f   :  { %3066 = vmatprep.subr.mxu0 %v7570_v60  ;;  %3137 = vmatprep.subr.mxu1 %v7591_v0  ;;  %v6574_v0 = vld [vmem:[%s7124_s2 + $0x180] sm:$0xff] }
 0xa70   :  { %3067 = vmatpush1.msra.mxu0 %v7592_v57  ;;  %3138 = vmatpush1.msra.mxu1 %v7593_v6  ;;  %v6580_v57 = vld [vmem:[%s7124_s2 + $0x190] sm:$0xff]  ;;  %v6586_v6 = vld [vmem:[%s7124_s2 + $0x168] sm:$0xff] }
 0xa71   :  { %3068 = vmatprep.subr.mxu0 %v7594_v55  ;;  %3139 = vmatprep.subr.mxu1 %v7595_v50  ;;  %v6592_v55 = vld [vmem:[%s7124_s2 + $0x178] sm:$0xff]  ;;  %v6598_v50 = vld [vmem:[%s7124_s2 + $0x160] sm:$0xff] }
 0xa72   :  { %3069 = vmatpush1.msra.mxu0 %v7596_v53  ;;  %3140 = vmatpush1.msra.mxu1 %v7597_v59  ;;  %v6604_v53 = vld [vmem:[%s7124_s2 + $0x170] sm:$0xff]  ;;  %v6610_v59 = vld [vmem:[%s7124_s2 + $0x148] sm:$0xff] }
 0xa73   :  { %3070 = vmatprep.subr.mxu0 %v7598_v62  ;;  %3141 = vmatprep.subr.mxu1 %v7599_v61  ;;  %v6616_v62 = vld [vmem:[%s7124_s2 + $0x158] sm:$0xff]  ;;  %v6622_v61 = vld [vmem:[%s7124_s2 + $0x140] sm:$0xff] }
 0xa74   :  { %3071 = vmatpush1.msra.mxu0 %v7600_v63  ;;  %3104 = vmatprep.mubr.f32.mxu0 %v7601_v56  ;;  %v6628_v63 = vld [vmem:[%s7124_s2 + $0x150] sm:$0xff] }
 0xa75   :  { %3142 = vmatpush1.msra.mxu1 %v7602_v1  ;;  %3175 = vmatprep.mubr.f32.mxu1 %v7601_v56  ;;  %v6634_v1 = vld [vmem:[%s7124_s2 + $0x128] sm:$0xff] }
 0xa76   :  { %3210 = vmatprep.subr.mxu0 %v6528_v2  ;;  %3281 = vmatprep.subr.mxu1 %v6534_v5 }
 0xb15   :  { %v2936_v10 = vpop.f32.mrf.mxu0  ;;  %v3007_v15 = vpop.f32.mrf.mxu1 }
 0xb16   :  { %v3012_v14 = vadd.f32 %v2936_v10, %v2113_v9  ;;  %v3014_v22 = vadd.f32 %v3007_v15, %v2226_v19  ;;  %v6646_v9 = vld [vmem:[%s7124_s2 + $0x120] sm:$0xff]  ;;  %v6652_v10 = vld [vmem:[%s7124_s2 + $0x130] sm:$0xff] }
 0xb17   :  { %v2938_v16 = vpop.f32.mrf.mxu0  ;;  %v3009_v24 = vpop.f32.mrf.mxu1  ;;  %v6676_v15 = vld [vmem:[%s7124_s2 + $0x110] sm:$0xff]  ;;  %v6694_v19 = vld [vmem:[%s7124_s2 + $0xe0] sm:$0xff] }
 0xb18   :  { %v3016_v20 = vmul.f32 0.5, %v3012_v14  ;;  %v3013_v21 = vadd.f32 %v2938_v16, %v2115_v13  ;;  %v3015_v41 = vadd.f32 %v3009_v24, %v2228_v43  ;;  %v6664_v13 = vld [vmem:[%s7124_s2 + $0x118] sm:$0xff]  ;;  %v6670_v14 = vld [vmem:[%s7124_s2 + $0x100] sm:$0xff]  ;;  %v6682_v16 = vld [vmem:[%s7124_s2 + $0xe8] sm:$0xff] }
 0xb19   :  { %v6724_v24 = vld [vmem:[%s7124_s2 + $0xd0] sm:$0xff]  ;;  %v6736_v43 = vld [vmem:[%s7124_s2 + $0xb8] sm:$0xff] }
 0xb1a   :  { %4025 = vtanh.f32 %v3016_v20  ;;  %v3020_v23 = vmul.f32 0.5, %v3013_v21  ;;  %v3025_v18 = vmul.f32 0.5, %v3015_v41  ;;  %v6700_v20 = vld [vmem:[%s7124_s2 + $0xf0] sm:$0xff]  ;;  %v6706_v21 = vld [vmem:[%s7124_s2 + $0xc8] sm:$0xff]  ;;  %v6742_v41 = vld [vmem:[%s7124_s2 + $0xa0] sm:$0xff] }
 0xb1c   :  { %4027 = vtanh.f32 %v3020_v23  ;;  %v6718_v23 = vld [vmem:[%s7124_s2 + $0xc0] sm:$0xff] }
 0xb1d   :  { %4029 = vtanh.f32 %v3014_v22  ;;  %v6712_v22 = vld [vmem:[%s7124_s2 + $0xd8] sm:$0xff] }
 0xb1e   :  { %4031 = vtanh.f32 %v3025_v18  ;;  %v6748_v18 = vld [vmem:[%s7124_s2 + $0xb0] sm:$0xff] }
 0xb1f   :  { %7611 = vst [vmem:[#allocation30_spill] sm:$0xff] %v6748_v18 }
 0xb27   :  { %v4026_v42 = vpop.eup %4025 }
 0xb28   :  { %v3018_v38 = vmul.f32 0.5, %v4026_v42  ;;  %v6754_v42 = vld [vmem:[%s7124_s2 + $0x88] sm:$0xff] }
 0xb29   :  { %v4028_v45 = vpop.eup %4027  ;;  %7612 = vst [vmem:[#allocation32_spill] sm:$0xff] %v6754_v42 }
 0xb2a   :  { %v3019_v52 = vadd.f32 0.5, %v3018_v38  ;;  %v3022_v58 = vmul.f32 0.5, %v4028_v45  ;;  %v4030_v60 = vpop.eup %4029  ;;  %v6760_v38 = vld [vmem:[%s7124_s2 + $0x98] sm:$0xff]  ;;  %v6766_v45 = vld [vmem:[%s7124_s2 + $0x80] sm:$0xff] }
 0xb2b   :  { %v4032_v54 = vpop.eup %4031  ;;  %7613 = vst [vmem:[#allocation12_spill] sm:$0xff] %v6760_v38  ;;  %7614 = vst [vmem:[#allocation9_spill] sm:$0xff] %v6766_v45 }
 0xb2c   :  { %v3023_v51 = vadd.f32 0.5, %v3022_v58  ;;  %v3030_v26 = vmul.f32 %v4030_v60, %v3019_v52  ;;  %v3027_v25 = vmul.f32 0.5, %v4032_v54  ;;  %v6772_v52 = vld [vmem:[%s7124_s2 + $0x90] sm:$0xff]  ;;  %v6778_v58 = vld [vmem:[%s7124_s2 + $0x68] sm:$0xff]  ;;  %v6784_v60 = vld [vmem:[%s7124_s2 + $0x78] sm:$0xff] }
 0xb2d   :  { %7615 = vst [vmem:[#allocation14_spill] sm:$0xff] %v6772_v52  ;;  %7616 = vst [vmem:[#allocation11_spill] sm:$0xff] %v6778_v58  ;;  %v6808_v54 = vld [vmem:[%s7124_s2 + $0x58] sm:$0xff] }
 0xb2e   :  { %v3029_v37 = vmul.f32 %v3023_v51, %v6408_v35  ;;  %v3028_v48 = vadd.f32 0.5, %v3027_v25  ;;  %v6562_v35 = vld [vmem:[%s7124_s2 + $0x188] sm:$0xff]  ;;  %7617 = vst [vmem:[#allocation16_spill] sm:$0xff] %v6784_v60  ;;  %v6790_v51 = vld [vmem:[%s7124_s2 + $0x60] sm:$0xff]  ;;  %7621 = vst [vmem:[#allocation20_spill] sm:$0xff] %v6808_v54 }
 0xb2f   :  { %7618 = vst [vmem:[#allocation13_spill] sm:$0xff] %v6790_v51  ;;  %v6814_v25 = vld [vmem:[%s7124_s2 + $0x40] sm:$0xff] }
 0xb30   :  { %v6546_v34 = vadd.f32 %v3030_v26, %v3029_v37  ;;  %v6796_v26 = vld [vmem:[%s7124_s2 + $0x70] sm:$0xff]  ;;  %v6802_v37 = vld [vmem:[%s7124_s2 + $0x48] sm:$0xff]  ;;  %7622 = vst [vmem:[#allocation17_spill] sm:$0xff] %v6814_v25 }
 0xb31   :  { %7619 = vst [vmem:[#allocation18_spill] sm:$0xff] %v6796_v26  ;;  %7620 = vst [vmem:[#allocation15_spill] sm:$0xff] %v6802_v37 }
 0xb32   :  { %4033 = vtanh.f32 %v6546_v34 }
 0xb3f   :  { %v4034_v3 = vpop.eup %4033 }
 0xb40   :  { %v3033_v28 = vmul.f32 %v4034_v3, %v3028_v48  ;;  %v6820_v48 = vld [vmem:[%s7124_s2 + $0x50] sm:$0xff]  ;;  %v6826_v3 = vld [vmem:[%s7124_s2 + $0x28] sm:$0xff] }
 0xb41   :  { %7623 = vst [vmem:[#allocation7_spill] sm:$0xff] %v6820_v48  ;;  %7624 = vst [vmem:[#allocation8_spill] sm:$0xff] %v6826_v3 }
 0xb42   :  { %3105 = vmatmul.mubr.f32.vlgmr.msra.gmra.mxu0 %v3033_v28  ;;  %3176 = vmatmul.mubr.f32.vlgmr.msra.gmra.mxu1 %v3033_v28  ;;  %v6832_v28 = vld [vmem:[%s7124_s2 + $0x38] sm:$0xff] }
 0xb43   :  { %3211 = vmatpush1.msra.mxu0 %v6414_v33  ;;  %3282 = vmatpush1.msra.mxu1 %v6420_v46  ;;  %7625 = vst [vmem:[#allocation33_spill] sm:$0xff] %v6832_v28 }
 0xb44   :  { %3212 = vmatprep.subr.mxu0 %v6426_v31  ;;  %3283 = vmatprep.subr.mxu1 %v6432_v47 }
 0xb45   :  { %3213 = vmatpush1.msra.mxu0 %v6438_v39  ;;  %3284 = vmatpush1.msra.mxu1 %v6444_v29 }
 0xb46   :  { %3214 = vmatprep.subr.mxu0 %v6450_v32  ;;  %3285 = vmatprep.subr.mxu1 %v6456_v30 }
 0xb47   :  { %3215 = vmatpush1.msra.mxu0 %v6462_v36  ;;  %3286 = vmatpush1.msra.mxu1 %v6468_v49 }
 0xb48   :  { %3216 = vmatprep.subr.mxu0 %v6562_v35  ;;  %3287 = vmatprep.subr.mxu1 %v6568_v4 }
 0xb49   :  { %3217 = vmatpush1.msra.mxu0 %v6574_v0  ;;  %3288 = vmatpush1.msra.mxu1 %v6580_v57 }
 0xb4a   :  { %3218 = vmatprep.subr.mxu0 %v6586_v6  ;;  %3289 = vmatprep.subr.mxu1 %v6592_v55 }
 0xb4b   :  { %3219 = vmatpush1.msra.mxu0 %v6598_v50  ;;  %3290 = vmatpush1.msra.mxu1 %v6604_v53 }
 0xb4c   :  { %3220 = vmatprep.subr.mxu0 %v6610_v59  ;;  %3291 = vmatprep.subr.mxu1 %v6616_v62 }
 0xb4d   :  { %3221 = vmatpush1.msra.mxu0 %v6622_v61  ;;  %3292 = vmatpush1.msra.mxu1 %v6628_v63 }
 0xb4e   :  { %3222 = vmatprep.subr.mxu0 %v6634_v1  ;;  %3293 = vmatprep.subr.mxu1 %v6640_v8 }
 0xb4f   :  { %3223 = vmatpush1.msra.mxu0 %v6646_v9  ;;  %3294 = vmatpush1.msra.mxu1 %v6652_v10 }
 0xb50   :  { %3224 = vmatprep.subr.mxu0 %v6658_v12  ;;  %3295 = vmatprep.subr.mxu1 %v6664_v13 }
 0xb51   :  { %3225 = vmatpush1.msra.mxu0 %v6670_v14  ;;  %3296 = vmatpush1.msra.mxu1 %v6676_v15 }
 0xb52   :  { %3226 = vmatprep.subr.mxu0 %v6682_v16  ;;  %3297 = vmatprep.subr.mxu1 %v6688_v17 }
 0xb53   :  { %3227 = vmatpush1.msra.mxu0 %v6694_v19  ;;  %3298 = vmatpush1.msra.mxu1 %v6700_v20 }
 0xb54   :  { %3228 = vmatprep.subr.mxu0 %v6706_v21  ;;  %3299 = vmatprep.subr.mxu1 %v6712_v22 }
 0xb55   :  { %3229 = vmatpush1.msra.mxu0 %v6718_v23  ;;  %3300 = vmatpush1.msra.mxu1 %v6724_v24 }
 0xb56   :  { %3230 = vmatprep.subr.mxu0 %v6730_v44  ;;  %3301 = vmatprep.subr.mxu1 %v6736_v43 }
 0xb57   :  { %3231 = vmatpush1.msra.mxu0 %v6742_v41  ;;  %3302 = vmatpush1.msra.mxu1 %v6748_v18 }
 0xb58   :  { %3232 = vmatprep.subr.mxu0 %v6754_v42  ;;  %3303 = vmatprep.subr.mxu1 %v6760_v38 }
 0xb59   :  { %3233 = vmatpush1.msra.mxu0 %v6766_v45  ;;  %3304 = vmatpush1.msra.mxu1 %v6772_v52 }
 0xb5a   :  { %3234 = vmatprep.subr.mxu0 %v6778_v58  ;;  %3305 = vmatprep.subr.mxu1 %v6784_v60  ;;  %v7634_v58 = vld [vmem:[#allocation42_spill] sm:$0xff] }
 0xb5b   :  { %3235 = vmatpush1.msra.mxu0 %v6790_v51  ;;  %3306 = vmatpush1.msra.mxu1 %v6796_v26  ;;  %v2232_v52 = vadd.f32 %v7634_v58, %v6245_v27 }
 0xb5c   :  { %3236 = vmatprep.subr.mxu0 %v6802_v37  ;;  %3307 = vmatprep.subr.mxu1 %v6808_v54 }
 0xb5d   :  { %3237 = vmatpush1.msra.mxu0 %v6814_v25  ;;  %3308 = vmatpush1.msra.mxu1 %v6820_v48  ;;  %v6838_v25 = vld [vmem:[%s7124_s2 + $0x20] sm:$0xff]  ;;  %v6844_v48 = vld [vmem:[%s7124_s2 + $0x30] sm:$0xff] }
 0xb5e   :  { %3238 = vmatprep.subr.mxu0 %v6826_v3  ;;  %3309 = vmatprep.subr.mxu1 %v6832_v28  ;;  %7626 = vst [vmem:[#allocation35_spill] sm:$0xff] %v6838_v25  ;;  %7627 = vst [vmem:[#allocation34_spill] sm:$0xff] %v6844_v48  ;;  %v6850_v3 = vld [vmem:[%s7124_s2 + $0x8] sm:$0xff]  ;;  %v6856_v28 = vld [vmem:[%s7124_s2 + $0x18] sm:$0xff] }
 0xb5f   :  { %3239 = vmatpush1.msra.mxu0 %v6838_v25  ;;  %3310 = vmatpush1.msra.mxu1 %v6844_v48  ;;  %7628 = vst [vmem:[#allocation36_spill] sm:$0xff] %v6850_v3  ;;  %7629 = vst [vmem:[#allocation22_spill] sm:$0xff] %v6856_v28  ;;  %v6862_v25 = vld [vmem:[%s7124_s2] sm:$0xff] }
 0xb60   :  { %3240 = vmatprep.subr.mxu0 %v6850_v3  ;;  %3311 = vmatprep.subr.mxu1 %v6856_v28  ;;  %7630 = vst [vmem:[#allocation19_spill] sm:$0xff] %v6862_v25  ;;  %v6869_v3 = vld [vmem:[%s7124_s2 + $0x10] sm:$0xff]  ;;  %v7632_v28 = vld [vmem:[#allocation41_spill] sm:$0xff] }
 0xb61   :  { %3241 = vmatpush1.msra.mxu0 %v6862_v25  ;;  %3274 = vmatprep.mubr.f32.mxu0 %v7601_v56  ;;  %7631 = vst [vmem:[#allocation23_spill] sm:$0xff] %v6869_v3  ;;  %v2119_v48 = vadd.f32 %v7632_v28, %v7605_v7  ;;  %v7633_v25 = vld [vmem:[#allocation43_spill] sm:$0xff]  ;;  %v7635_v28 = vld [vmem:[#allocation44_spill] sm:$0xff] }
 0xb62   :  { %3312 = vmatpush1.msra.mxu1 %v6869_v3  ;;  %3345 = vmatprep.mubr.f32.mxu1 %v7601_v56  ;;  %v2121_v37 = vadd.f32 %v7633_v25, %v7607_v11  ;;  %v2234_v7 = vadd.f32 %v7635_v28, %v6249_v40  ;;  %v7643_v28 = vld [vmem:[#allocation13_spill] sm:$0xff] }
 0xb63   :  { %3380 = vmatprep.subr.mxu0 %v6528_v2  ;;  %3451 = vmatprep.subr.mxu1 %v6534_v5 }
 0xc02   :  { %v3106_v54 = vpop.f32.mrf.mxu0  ;;  %v3177_v51 = vpop.f32.mrf.mxu1 }
 0xc03   :  { %v3182_v26 = vadd.f32 %v3106_v54, %v2119_v48  ;;  %v3184_v56 = vadd.f32 %v3177_v51, %v2232_v52 }
 0xc04   :  { %v3108_v60 = vpop.f32.mrf.mxu0  ;;  %v3179_v5 = vpop.f32.mrf.mxu1 }
 0xc05   :  { %v3186_v3 = vmul.f32 0.5, %v3182_v26  ;;  %v3183_v45 = vadd.f32 %v3108_v60, %v2121_v37  ;;  %v3185_v38 = vadd.f32 %v3179_v5, %v2234_v7  ;;  %v7641_v37 = vld [vmem:[#allocation11_spill] sm:$0xff] }
 0xc07   :  { %4035 = vtanh.f32 %v3186_v3  ;;  %v3190_v2 = vmul.f32 0.5, %v3183_v45  ;;  %v3195_v42 = vmul.f32 0.5, %v3185_v38  ;;  %v7640_v38 = vld [vmem:[#allocation14_spill] sm:$0xff]  ;;  %v7642_v3 = vld [vmem:[#allocation16_spill] sm:$0xff] }
 0xc09   :  { %4037 = vtanh.f32 %v3190_v2 }
 0xc0a   :  { %4039 = vtanh.f32 %v3184_v56 }
 0xc0b   :  { %4041 = vtanh.f32 %v3195_v42  ;;  %v7639_v42 = vld [vmem:[#allocation9_spill] sm:$0xff] }
 0xc14   :  { %v4036_v25 = vpop.eup %4035 }
 0xc15   :  { %v3188_v54 = vmul.f32 0.5, %v4036_v25  ;;  %v7644_v25 = vld [vmem:[#allocation18_spill] sm:$0xff] }
 0xc16   :  { %v4038_v48 = vpop.eup %4037 }
 0xc17   :  { %v3189_v11 = vadd.f32 0.5, %v3188_v54  ;;  %v3192_v18 = vmul.f32 0.5, %v4038_v48  ;;  %v4040_v58 = vpop.eup %4039  ;;  %v7645_v54 = vld [vmem:[#allocation15_spill] sm:$0xff]  ;;  %v7646_v48 = vld [vmem:[#allocation20_spill] sm:$0xff] }
 0xc18   :  { %v4042_v56 = vpop.eup %4041 }
 0xc19   :  { %v3193_v26 = vadd.f32 0.5, %v3192_v18  ;;  %v3200_v60 = vmul.f32 %v4040_v58, %v3189_v11  ;;  %v3197_v2 = vmul.f32 0.5, %v4042_v56  ;;  %v7636_v11 = vld [vmem:[#allocation30_spill] sm:$0xff]  ;;  %v7638_v18 = vld [vmem:[#allocation12_spill] sm:$0xff]  ;;  %v7647_v58 = vld [vmem:[#allocation17_spill] sm:$0xff] }
 0xc1a   :  { %v7651_v56 = vld [vmem:[#allocation35_spill] sm:$0xff] }
 0xc1b   :  { %v3199_v52 = vmul.f32 %v3193_v26, %v6546_v34  ;;  %v3198_v51 = vadd.f32 0.5, %v3197_v2  ;;  %v7637_v34 = vld [vmem:[#allocation32_spill] sm:$0xff]  ;;  %v7648_v26 = vld [vmem:[#allocation7_spill] sm:$0xff]  ;;  %v7652_v2 = vld [vmem:[#allocation34_spill] sm:$0xff] }
 0xc1d   :  { %v6884_v45 = vadd.f32 %v3200_v60, %v3199_v52  ;;  %v7649_v60 = vld [vmem:[#allocation8_spill] sm:$0xff]  ;;  %v7650_v52 = vld [vmem:[#allocation33_spill] sm:$0xff] }
 0xc1f   :  { %4043 = vtanh.f32 %v6884_v45 }
 0xc2c   :  { %v4044_v5 = vpop.eup %4043 }
 0xc2d   :  { %v3203_v7 = vmul.f32 %v4044_v5, %v3198_v51  ;;  %v7653_v51 = vld [vmem:[#allocation36_spill] sm:$0xff]  ;;  %v7654_v5 = vld [vmem:[#allocation22_spill] sm:$0xff] }
 0xc2f   :  { %3275 = vmatmul.mubr.f32.vlgmr.msra.gmra.mxu0 %v3203_v7  ;;  %3346 = vmatmul.mubr.f32.vlgmr.msra.gmra.mxu1 %v3203_v7  ;;  %v7655_v7 = vld [vmem:[#allocation19_spill] sm:$0xff] }
 0xc30   :  { %3381 = vmatpush1.msra.mxu0 %v6414_v33  ;;  %3452 = vmatpush1.msra.mxu1 %v6420_v46 }
 0xc31   :  { %3382 = vmatprep.subr.mxu0 %v6426_v31  ;;  %3453 = vmatprep.subr.mxu1 %v6432_v47 }
 0xc32   :  { %3383 = vmatpush1.msra.mxu0 %v6438_v39  ;;  %3454 = vmatpush1.msra.mxu1 %v6444_v29 }
 0xc33   :  { %3384 = vmatprep.subr.mxu0 %v6450_v32  ;;  %3455 = vmatprep.subr.mxu1 %v6456_v30 }
 0xc34   :  { %3385 = vmatpush1.msra.mxu0 %v6462_v36  ;;  %3456 = vmatpush1.msra.mxu1 %v6468_v49 }
 0xc35   :  { %3386 = vmatprep.subr.mxu0 %v6562_v35  ;;  %3457 = vmatprep.subr.mxu1 %v6568_v4 }
 0xc36   :  { %3387 = vmatpush1.msra.mxu0 %v6574_v0  ;;  %3458 = vmatpush1.msra.mxu1 %v6580_v57 }
 0xc37   :  { %3388 = vmatprep.subr.mxu0 %v6586_v6  ;;  %3459 = vmatprep.subr.mxu1 %v6592_v55 }
 0xc38   :  { %3389 = vmatpush1.msra.mxu0 %v6598_v50  ;;  %3460 = vmatpush1.msra.mxu1 %v6604_v53 }
 0xc39   :  { %3390 = vmatprep.subr.mxu0 %v6610_v59  ;;  %3461 = vmatprep.subr.mxu1 %v6616_v62 }
 0xc3a   :  { %3391 = vmatpush1.msra.mxu0 %v6622_v61  ;;  %3462 = vmatpush1.msra.mxu1 %v6628_v63 }
 0xc3b   :  { %3392 = vmatprep.subr.mxu0 %v6634_v1  ;;  %3463 = vmatprep.subr.mxu1 %v6640_v8 }
 0xc3c   :  { %3393 = vmatpush1.msra.mxu0 %v6646_v9  ;;  %3464 = vmatpush1.msra.mxu1 %v6652_v10 }
 0xc3d   :  { %3394 = vmatprep.subr.mxu0 %v6658_v12  ;;  %3465 = vmatprep.subr.mxu1 %v6664_v13 }
 0xc3e   :  { %3395 = vmatpush1.msra.mxu0 %v6670_v14  ;;  %3466 = vmatpush1.msra.mxu1 %v6676_v15 }
 0xc3f   :  { %3396 = vmatprep.subr.mxu0 %v6682_v16  ;;  %3467 = vmatprep.subr.mxu1 %v6688_v17 }
 0xc40   :  { %3397 = vmatpush1.msra.mxu0 %v6694_v19  ;;  %3468 = vmatpush1.msra.mxu1 %v6700_v20 }
 0xc41   :  { %3398 = vmatprep.subr.mxu0 %v6706_v21  ;;  %3469 = vmatprep.subr.mxu1 %v6712_v22 }
 0xc42   :  { %3399 = vmatpush1.msra.mxu0 %v6718_v23  ;;  %3470 = vmatpush1.msra.mxu1 %v6724_v24 }
 0xc43   :  { %3400 = vmatprep.subr.mxu0 %v6730_v44  ;;  %3471 = vmatprep.subr.mxu1 %v6736_v43 }
 0xc44   :  { %3401 = vmatpush1.msra.mxu0 %v6742_v41  ;;  %3472 = vmatpush1.msra.mxu1 %v7636_v11 }
 0xc45   :  { %3402 = vmatprep.subr.mxu0 %v7637_v34  ;;  %3473 = vmatprep.subr.mxu1 %v7638_v18 }
 0xc46   :  { %3403 = vmatpush1.msra.mxu0 %v7639_v42  ;;  %3474 = vmatpush1.msra.mxu1 %v7640_v38 }
 0xc47   :  { %3404 = vmatprep.subr.mxu0 %v7641_v37  ;;  %3475 = vmatprep.subr.mxu1 %v7642_v3  ;;  %v7664_v37 = vld [vmem:[#allocation46_spill] sm:$0xff] }
 0xc48   :  { %3405 = vmatpush1.msra.mxu0 %v7643_v28  ;;  %3476 = vmatpush1.msra.mxu1 %v7644_v25  ;;  %v7662_v25 = vld [vmem:[#allocation56_spill] sm:$0xff]  ;;  %v2238_v38 = vadd.f32 %v7664_v37, %v6245_v27 }
 0xc49   :  { %3406 = vmatprep.subr.mxu0 %v7645_v54  ;;  %3477 = vmatprep.subr.mxu1 %v7646_v48  ;;  %v7656_v54 = vmov 0.0   ;;  %v7657_v48 = vld [vmem:[#allocation23_spill] sm:$0xff] }
 0xc4a   :  { %3407 = vmatpush1.msra.mxu0 %v7647_v58  ;;  %3478 = vmatpush1.msra.mxu1 %v7648_v26  ;;  %v7658_v26 = vld [vmem:[#allocation29_spill] sm:$0xff] }
 0xc4b   :  { %3408 = vmatprep.subr.mxu0 %v7649_v60  ;;  %3479 = vmatprep.subr.mxu1 %v7650_v52  ;;  %v7659_v60 = vld [vmem:[#allocation31_spill] sm:$0xff]  ;;  %v7660_v52 = vld [vmem:[#allocation53_spill] sm:$0xff] }
 0xc4c   :  { %3409 = vmatpush1.msra.mxu0 %v7651_v56  ;;  %3480 = vmatpush1.msra.mxu1 %v7652_v2  ;;  %v7661_v56 = vld [vmem:[#allocation45_spill] sm:$0xff] }
 0xc4d   :  { %3410 = vmatprep.subr.mxu0 %v7653_v51  ;;  %3481 = vmatprep.subr.mxu1 %v7654_v5  ;;  %v2125_v58 = vadd.f32 %v7661_v56, %v7660_v52  ;;  %v7663_v51 = vld [vmem:[#allocation47_spill] sm:$0xff]  ;;  %v7665_v56 = vld [vmem:[#allocation48_spill] sm:$0xff] }
 0xc4e   :  { %3411 = vmatpush1.msra.mxu0 %v7655_v7  ;;  %3444 = vmatprep.mubr.f32.mxu0 %v7656_v54  ;;  %v2127_v28 = vadd.f32 %v7663_v51, %v7662_v25  ;;  %v2240_v52 = vadd.f32 %v7665_v56, %v6249_v40 }
 0xc4f   :  { %3482 = vmatpush1.msra.mxu1 %v7657_v48  ;;  %3515 = vmatprep.mubr.f32.mxu1 %v7656_v54 }
 0xc50   :  { %3550 = vmatprep.subr.mxu0 %v7658_v26  ;;  %3621 = vmatprep.subr.mxu1 %v7659_v60 }
 0xcef   :  { %v3276_v2 = vpop.f32.mrf.mxu0  ;;  %v3347_v3 = vpop.f32.mrf.mxu1 }
 0xcf0   :  { %v3352_v5 = vadd.f32 %v3276_v2, %v2125_v58  ;;  %v3354_v54 = vadd.f32 %v3347_v3, %v2238_v38 }
 0xcf1   :  { %v3278_v7 = vpop.f32.mrf.mxu0  ;;  %v3349_v60 = vpop.f32.mrf.mxu1 }
 0xcf2   :  { %v3356_v48 = vmul.f32 0.5, %v3352_v5  ;;  %v3353_v42 = vadd.f32 %v3278_v7, %v2127_v28  ;;  %v3355_v18 = vadd.f32 %v3349_v60, %v2240_v52 }
 0xcf4   :  { %4045 = vtanh.f32 %v3356_v48  ;;  %v3360_v26 = vmul.f32 0.5, %v3353_v42  ;;  %v3365_v34 = vmul.f32 0.5, %v3355_v18 }
 0xcf6   :  { %4047 = vtanh.f32 %v3360_v26 }
 0xcf7   :  { %4049 = vtanh.f32 %v3354_v54 }
 0xcf8   :  { %4051 = vtanh.f32 %v3365_v34 }
 0xd01   :  { %v4046_v51 = vpop.eup %4045 }
 0xd02   :  { %v3358_v58 = vmul.f32 0.5, %v4046_v51 }
 0xd03   :  { %v4048_v2 = vpop.eup %4047 }
 0xd04   :  { %v3359_v25 = vadd.f32 0.5, %v3358_v58  ;;  %v3362_v11 = vmul.f32 0.5, %v4048_v2  ;;  %v4050_v37 = vpop.eup %4049 }
 0xd05   :  { %v4052_v3 = vpop.eup %4051 }
 0xd06   :  { %v3363_v5 = vadd.f32 0.5, %v3362_v11  ;;  %v3370_v28 = vmul.f32 %v4050_v37, %v3359_v25  ;;  %v3367_v54 = vmul.f32 0.5, %v4052_v3 }
 0xd08   :  { %v3369_v38 = vmul.f32 %v3363_v5, %v6884_v45  ;;  %v3368_v48 = vadd.f32 0.5, %v3367_v54 }
 0xd0a   :  { %v6962_v42 = vadd.f32 %v3370_v28, %v3369_v38 }
 0xd0c   :  { %4053 = vtanh.f32 %v6962_v42 }
 0xd19   :  { %v4054_v52 = vpop.eup %4053 }
 0xd1a   :  { %v3373_v18 = vmul.f32 %v4054_v52, %v3368_v48  ;;  %v3734_v48 = vld [vmem:[%s7126_s5 + $0x78] sm:$0xff]  ;;  %v3732_v52 = vld [vmem:[%s7126_s5 + $0x68] sm:$0xff] }
 0xd1c   :  { %3445 = vmatmul.mubr.f32.vlgmr.msra.gmra.mxu0 %v3373_v18  ;;  %3516 = vmatmul.mubr.f32.vlgmr.msra.gmra.mxu1 %v3373_v18  ;;  %v3731_v18 = vld [vmem:[%s7126_s5 + $0x60] sm:$0xff] }
 0xd1d   :  { %3551 = vmatpush1.msra.mxu0 %v6414_v33  ;;  %3622 = vmatpush1.msra.mxu1 %v6420_v46  ;;  %v7666_v33 = vld [vmem:[#allocation30_spill] sm:$0xff]  ;;  %v7667_v46 = vld [vmem:[#allocation32_spill] sm:$0xff] }
 0xd1e   :  { %3552 = vmatprep.subr.mxu0 %v6426_v31  ;;  %3623 = vmatprep.subr.mxu1 %v6432_v47  ;;  %v7668_v31 = vld [vmem:[#allocation12_spill] sm:$0xff]  ;;  %v7669_v47 = vld [vmem:[#allocation9_spill] sm:$0xff] }
 0xd1f   :  { %3553 = vmatpush1.msra.mxu0 %v6438_v39  ;;  %3624 = vmatpush1.msra.mxu1 %v6444_v29  ;;  %v7670_v39 = vld [vmem:[#allocation14_spill] sm:$0xff]  ;;  %v7671_v29 = vld [vmem:[#allocation11_spill] sm:$0xff] }
 0xd20   :  { %3554 = vmatprep.subr.mxu0 %v6450_v32  ;;  %3625 = vmatprep.subr.mxu1 %v6456_v30  ;;  %v7672_v32 = vld [vmem:[#allocation16_spill] sm:$0xff]  ;;  %v7673_v30 = vld [vmem:[#allocation13_spill] sm:$0xff] }
 0xd21   :  { %3555 = vmatpush1.msra.mxu0 %v6462_v36  ;;  %3626 = vmatpush1.msra.mxu1 %v6468_v49  ;;  %v7674_v36 = vld [vmem:[#allocation18_spill] sm:$0xff]  ;;  %v7675_v49 = vld [vmem:[#allocation15_spill] sm:$0xff] }
 0xd22   :  { %3556 = vmatprep.subr.mxu0 %v6562_v35  ;;  %3627 = vmatprep.subr.mxu1 %v6568_v4  ;;  %v7676_v35 = vld [vmem:[#allocation20_spill] sm:$0xff]  ;;  %v7677_v4 = vld [vmem:[#allocation17_spill] sm:$0xff] }
 0xd23   :  { %3557 = vmatpush1.msra.mxu0 %v6574_v0  ;;  %3628 = vmatpush1.msra.mxu1 %v6580_v57  ;;  %v7678_v0 = vld [vmem:[#allocation7_spill] sm:$0xff]  ;;  %v7679_v57 = vld [vmem:[#allocation8_spill] sm:$0xff] }
 0xd24   :  { %3558 = vmatprep.subr.mxu0 %v6586_v6  ;;  %3629 = vmatprep.subr.mxu1 %v6592_v55  ;;  %v7680_v6 = vld [vmem:[#allocation33_spill] sm:$0xff]  ;;  %v7681_v55 = vld [vmem:[#allocation35_spill] sm:$0xff] }
 0xd25   :  { %3559 = vmatpush1.msra.mxu0 %v6598_v50  ;;  %3630 = vmatpush1.msra.mxu1 %v6604_v53  ;;  %v7682_v50 = vld [vmem:[#allocation34_spill] sm:$0xff]  ;;  %v7683_v53 = vld [vmem:[#allocation36_spill] sm:$0xff] }
 0xd26   :  { %3560 = vmatprep.subr.mxu0 %v6610_v59  ;;  %3631 = vmatprep.subr.mxu1 %v6616_v62  ;;  %v7684_v59 = vld [vmem:[#allocation22_spill] sm:$0xff]  ;;  %v7685_v62 = vld [vmem:[#allocation19_spill] sm:$0xff] }
 0xd27   :  { %3561 = vmatpush1.msra.mxu0 %v6622_v61  ;;  %3632 = vmatpush1.msra.mxu1 %v6628_v63  ;;  %v7686_v61 = vmov 0.0   ;;  %v7687_v63 = vld [vmem:[#allocation23_spill] sm:$0xff] }
 0xd28   :  { %3562 = vmatprep.subr.mxu0 %v6634_v1  ;;  %3633 = vmatprep.subr.mxu1 %v6640_v8  ;;  %v7688_v1 = vld [vmem:[#allocation53_spill] sm:$0xff] }
 0xd29   :  { %3563 = vmatpush1.msra.mxu0 %v6646_v9  ;;  %3634 = vmatpush1.msra.mxu1 %v6652_v10  ;;  %v7689_v8 = vld [vmem:[#allocation49_spill] sm:$0xff] }
 0xd2a   :  { %3564 = vmatprep.subr.mxu0 %v6658_v12  ;;  %3635 = vmatprep.subr.mxu1 %v6664_v13  ;;  %v2131_v9 = vadd.f32 %v7689_v8, %v7688_v1  ;;  %v7690_v12 = vld [vmem:[#allocation56_spill] sm:$0xff]  ;;  %v7691_v13 = vld [vmem:[#allocation51_spill] sm:$0xff] }
 0xd2b   :  { %3565 = vmatpush1.msra.mxu0 %v6670_v14  ;;  %3636 = vmatpush1.msra.mxu1 %v6676_v15  ;;  %v2133_v14 = vadd.f32 %v7691_v13, %v7690_v12 }
 0xd2c   :  { %3566 = vmatprep.subr.mxu0 %v6682_v16  ;;  %3637 = vmatprep.subr.mxu1 %v6688_v17 }
 0xd2d   :  { %3567 = vmatpush1.msra.mxu0 %v6694_v19  ;;  %3638 = vmatpush1.msra.mxu1 %v6700_v20  ;;  %v7692_v19 = vld [vmem:[#allocation50_spill] sm:$0xff] }
 0xd2e   :  { %3568 = vmatprep.subr.mxu0 %v6706_v21  ;;  %3639 = vmatprep.subr.mxu1 %v6712_v22  ;;  %v2244_v20 = vadd.f32 %v7692_v19, %v6245_v27 }
 0xd2f   :  { %3569 = vmatpush1.msra.mxu0 %v6718_v23  ;;  %3640 = vmatpush1.msra.mxu1 %v6724_v24 }
 0xd30   :  { %3570 = vmatprep.subr.mxu0 %v6730_v44  ;;  %3641 = vmatprep.subr.mxu1 %v6736_v43  ;;  %v7693_v43 = vld [vmem:[#allocation52_spill] sm:$0xff] }
 0xd31   :  { %3571 = vmatpush1.msra.mxu0 %v6742_v41  ;;  %3642 = vmatpush1.msra.mxu1 %v7666_v33  ;;  %v2246_v41 = vadd.f32 %v7693_v43, %v6249_v40  ;;  %v3730_v33 = vld [vmem:[%s7126_s5 + $0x58] sm:$0xff] }
 0xd32   :  { %3572 = vmatprep.subr.mxu0 %v7667_v46  ;;  %3643 = vmatprep.subr.mxu1 %v7668_v31  ;;  %v3729_v46 = vld [vmem:[%s7126_s5 + $0x50] sm:$0xff]  ;;  %v3728_v31 = vld [vmem:[%s7126_s5 + $0x48] sm:$0xff] }
 0xd33   :  { %3573 = vmatpush1.msra.mxu0 %v7669_v47  ;;  %3644 = vmatpush1.msra.mxu1 %v7670_v39  ;;  %v3727_v47 = vld [vmem:[%s7126_s5 + $0x40] sm:$0xff]  ;;  %v3726_v39 = vld [vmem:[%s7126_s5 + $0x38] sm:$0xff] }
 0xd34   :  { %3574 = vmatprep.subr.mxu0 %v7671_v29  ;;  %3645 = vmatprep.subr.mxu1 %v7672_v32  ;;  %v3725_v29 = vld [vmem:[%s7126_s5 + $0x30] sm:$0xff]  ;;  %v3724_v32 = vld [vmem:[%s7126_s5 + $0x28] sm:$0xff] }
 0xd35   :  { %3575 = vmatpush1.msra.mxu0 %v7673_v30  ;;  %3646 = vmatpush1.msra.mxu1 %v7674_v36  ;;  %v3723_v30 = vld [vmem:[%s7126_s5 + $0x20] sm:$0xff]  ;;  %v3722_v36 = vld [vmem:[%s7126_s5 + $0x18] sm:$0xff] }
 0xd36   :  { %3576 = vmatprep.subr.mxu0 %v7675_v49  ;;  %3647 = vmatprep.subr.mxu1 %v7676_v35  ;;  %v3721_v49 = vld [vmem:[%s7126_s5 + $0x10] sm:$0xff]  ;;  %v3720_v35 = vld [vmem:[%s7126_s5 + $0x8] sm:$0xff] }
 0xd37   :  { %3577 = vmatpush1.msra.mxu0 %v7677_v4  ;;  %3648 = vmatpush1.msra.mxu1 %v7678_v0  ;;  %v3719_v4 = vld [vmem:[%s7126_s5] sm:$0xff] }
 0xd38   :  { %3578 = vmatprep.subr.mxu0 %v7679_v57  ;;  %3649 = vmatprep.subr.mxu1 %v7680_v6  ;;  %v7694_v0 = vld [vmem:[#allocation54_spill] sm:$0xff] }
 0xd39   :  { %3579 = vmatpush1.msra.mxu0 %v7681_v55  ;;  %3650 = vmatpush1.msra.mxu1 %v7682_v50  ;;  %v2137_v57 = vadd.f32 %v7694_v0, %v7688_v1  ;;  %v7695_v55 = vld [vmem:[#allocation57_spill] sm:$0xff]  ;;  %v7697_v1 = vld [vmem:[#allocation58_spill] sm:$0xff] }
 0xd3a   :  { %3580 = vmatprep.subr.mxu0 %v7683_v53  ;;  %3651 = vmatprep.subr.mxu1 %v7684_v59  ;;  %v2139_v50 = vadd.f32 %v7695_v55, %v7690_v12 }
 0xd3b   :  { %3581 = vmatpush1.msra.mxu0 %v7685_v62  ;;  %3614 = vmatprep.mubr.f32.mxu0 %v7686_v61 }
 0xd3c   :  { %3652 = vmatpush1.msra.mxu1 %v7687_v63  ;;  %3685 = vmatprep.mubr.f32.mxu1 %v7686_v61  ;;  %v7696_v63 = vld [vmem:[#allocation55_spill] sm:$0xff] }
 0xd3d   :  { %3878 = vmatprep.subr.mxu0 %v7686_v61  ;;  %v2250_v8 = vadd.f32 %v7696_v63, %v6245_v27 }
 0xddc   :  { %v3446_v10 = vpop.f32.mrf.mxu0  ;;  %v3517_v16 = vpop.f32.mrf.mxu1 }
 0xddd   :  { %v3522_v15 = vadd.f32 %v3446_v10, %v2131_v9  ;;  %v3524_v23 = vadd.f32 %v3517_v16, %v2244_v20 }
 0xdde   :  { %v3448_v17 = vpop.f32.mrf.mxu0  ;;  %v3519_v44 = vpop.f32.mrf.mxu1 }
 0xddf   :  { %v3526_v21 = vmul.f32 0.5, %v3522_v15  ;;  %v3523_v22 = vadd.f32 %v3448_v17, %v2133_v14  ;;  %v3525_v45 = vadd.f32 %v3519_v44, %v2246_v41  ;;  %v2252_v15 = vadd.f32 %v7697_v1, %v6249_v40 }
 0xde1   :  { %4055 = vtanh.f32 %v3526_v21  ;;  %v3530_v24 = vmul.f32 0.5, %v3523_v22  ;;  %v3535_v11 = vmul.f32 0.5, %v3525_v45 }
 0xde3   :  { %4057 = vtanh.f32 %v3530_v24 }
 0xde4   :  { %4059 = vtanh.f32 %v3524_v23 }
 0xde5   :  { %4061 = vtanh.f32 %v3535_v11 }
 0xdee   :  { %v4056_v34 = vpop.eup %4055 }
 0xdef   :  { %v3528_v25 = vmul.f32 0.5, %v4056_v34 }
 0xdf0   :  { %v4058_v7 = vpop.eup %4057 }
 0xdf1   :  { %v3529_v26 = vadd.f32 0.5, %v3528_v25  ;;  %v3532_v60 = vmul.f32 0.5, %v4058_v7  ;;  %v4060_v56 = vpop.eup %4059  ;;  %v3860_v25 = vld [vmem:[%s7127_s6] ss:$0 sm:$0xff] }
 0xdf2   :  { %v4062_v5 = vpop.eup %4061 }
 0xdf3   :  { %v3533_v51 = vadd.f32 0.5, %v3532_v60  ;;  %v3540_v58 = vmul.f32 %v4060_v56, %v3529_v26  ;;  %v3537_v28 = vmul.f32 0.5, %v4062_v5 }
 0xdf5   :  { %v3539_v2 = vmul.f32 %v3533_v51, %v6962_v42  ;;  %v3538_v38 = vadd.f32 0.5, %v3537_v28  ;;  %v3733_v42 = vld [vmem:[%s7126_s5 + $0x70] sm:$0xff] }
 0xdf7   :  { %v7039_v37 = vadd.f32 %v3540_v58, %v3539_v2 }
 0xdf9   :  { %4063 = vtanh.f32 %v7039_v37 }
 0xe06   :  { %v4064_v3 = vpop.eup %4063 }
 0xe07   :  { %v3543_v54 = vmul.f32 %v4064_v3, %v3538_v38 }
 0xe09   :  { %3615 = vmatmul.mubr.f32.vlgmr.msra.gmra.mxu0 %v3543_v54  ;;  %3686 = vmatmul.mubr.f32.vlgmr.msra.gmra.mxu1 %v3543_v54 }
 0xe0a   :  { %3879 = vmatpush3.msra.mxu0 %v3734_v48  ;;  %3910 = vmatprep.mubr.msk.f32.mxu0 %vm4140_vm0, %v7686_v61 }
 0xe0b   :  { %3880 = vmatprep.subr.mxu0 %v7686_v61 }
 0xe0c   :  { %3881 = vmatpush3.msra.mxu0 %v3733_v42 }
 0xe0d   :  { %3882 = vmatprep.subr.mxu0 %v7686_v61 }
 0xe0e   :  { %3883 = vmatpush3.msra.mxu0 %v3732_v52 }
 0xe0f   :  { %3884 = vmatprep.subr.mxu0 %v7686_v61 }
 0xe10   :  { %3885 = vmatpush3.msra.mxu0 %v3731_v18 }
 0xe11   :  { %3886 = vmatprep.subr.mxu0 %v7686_v61 }
 0xe12   :  { %3887 = vmatpush3.msra.mxu0 %v3730_v33 }
 0xe13   :  { %3888 = vmatprep.subr.mxu0 %v7686_v61 }
 0xe14   :  { %3889 = vmatpush3.msra.mxu0 %v3729_v46 }
 0xe15   :  { %3890 = vmatprep.subr.mxu0 %v7686_v61 }
 0xe16   :  { %3891 = vmatpush3.msra.mxu0 %v3728_v31 }
 0xe17   :  { %3892 = vmatprep.subr.mxu0 %v7686_v61 }
 0xe18   :  { %3893 = vmatpush3.msra.mxu0 %v3727_v47 }
 0xe19   :  { %3894 = vmatprep.subr.mxu0 %v7686_v61 }
 0xe1a   :  { %3895 = vmatpush3.msra.mxu0 %v3726_v39 }
 0xe1b   :  { %3896 = vmatprep.subr.mxu0 %v7686_v61 }
 0xe1c   :  { %3897 = vmatpush3.msra.mxu0 %v3725_v29 }
 0xe1d   :  { %3898 = vmatprep.subr.mxu0 %v7686_v61 }
 0xe1e   :  { %3899 = vmatpush3.msra.mxu0 %v3724_v32 }
 0xe1f   :  { %3900 = vmatprep.subr.mxu0 %v7686_v61 }
 0xe20   :  { %3901 = vmatpush3.msra.mxu0 %v3723_v30 }
 0xe21   :  { %3902 = vmatprep.subr.mxu0 %v7686_v61 }
 0xe22   :  { %3903 = vmatpush3.msra.mxu0 %v3722_v36 }
 0xe23   :  { %3904 = vmatprep.subr.mxu0 %v7686_v61 }
 0xe24   :  { %3905 = vmatpush3.msra.mxu0 %v3721_v49 }
 0xe25   :  { %3906 = vmatprep.subr.mxu0 %v7686_v61 }
 0xe26   :  { %3907 = vmatpush3.msra.mxu0 %v3720_v35 }
 0xe27   :  { %3908 = vmatprep.subr.mxu0 %v7686_v61 }
 0xe28   :  { %3909 = vmatpush3.msra.mxu0 %v3719_v4 }
 0xec9   :  { %v3616_v6 = vpop.f32.mrf.mxu0  ;;  %v3687_v59 = vpop.f32.mrf.mxu1 }
 0xeca   :  { %v3692_v53 = vadd.f32 %v3616_v6, %v2137_v57  ;;  %v3694_v13 = vadd.f32 %v3687_v59, %v2250_v8 }
 0xecb   :  { %v3618_v62 = vpop.f32.mrf.mxu0  ;;  %v3689_v61 = vpop.f32.mrf.mxu1 }
 0xecc   :  { %v3696_v9 = vmul.f32 0.5, %v3692_v53  ;;  %v3693_v10 = vadd.f32 %v3618_v62, %v2139_v50  ;;  %v3695_v16 = vadd.f32 %v3689_v61, %v2252_v15 }
 0xece   :  { %4065 = vtanh.f32 %v3696_v9  ;;  %v3700_v14 = vmul.f32 0.5, %v3693_v10  ;;  %v3705_v17 = vmul.f32 0.5, %v3695_v16 }
 0xed0   :  { %4067 = vtanh.f32 %v3700_v14 }
 0xed1   :  { %4069 = vtanh.f32 %v3694_v13 }
 0xed2   :  { %4071 = vtanh.f32 %v3705_v17 }
 0xedb   :  { %v4066_v12 = vpop.eup %4065 }
 0xedc   :  { %v3698_v19 = vmul.f32 0.5, %v4066_v12 }
 0xedd   :  { %v4068_v20 = vpop.eup %4067 }
 0xede   :  { %v3699_v21 = vadd.f32 0.5, %v3698_v19  ;;  %v3702_v22 = vmul.f32 0.5, %v4068_v20  ;;  %v4070_v27 = vpop.eup %4069 }
 0xedf   :  { %v4072_v41 = vpop.eup %4071 }
 0xee0   :  { %v3703_v23 = vadd.f32 0.5, %v3702_v22  ;;  %v3710_v24 = vmul.f32 %v4070_v27, %v3699_v21  ;;  %v3707_v45 = vmul.f32 0.5, %v4072_v41 }
 0xee2   :  { %v3709_v44 = vmul.f32 %v3703_v23, %v7039_v37  ;;  %v3708_v11 = vadd.f32 0.5, %v3707_v45 }
 0xee4   :  { %v3711_v43 = vadd.f32 %v3710_v24, %v3709_v44 }
 0xee6   :  { %4073 = vtanh.f32 %v3711_v43 }
 0xef3   :  { %v4074_v34 = vpop.eup %4073 }
 0xef4   :  { %v3713_v40 = vmul.f32 %v4074_v34, %v3708_v11 }
 0xef6   :  { %3911 = vmatmul.mubr.f32.vlgmr.msra.gmra.mxu0 %v3713_v40 }
 0xfb6   :  { %v3809_v7 = vpop.f32.mrf.mxu0 }
 0xfb7   :  { %v3810_v26 = vadd.f32 %v3860_v25, %v3809_v7 }
 0xfb8   :  { %v3912_v60 = vpop.f32.mrf.mxu0 }
 0xfb9   :  { %3813 = vst [vmem:[%s7128_s7] sm:$0xff] %v3810_v26 }

</bundles_post_ra>
